<compile_context>
chip_gen: v5e
topology: v5e:2x2
jax: 0.10.0
libtpu: 0.0.40
codegen_flags: <defaults>
</compile_context>

<pallas_src>
import functools

import jax
import jax.numpy as jnp
from jax import lax
from jax.experimental import pallas as pl
from jax.experimental.pallas import tpu as pltpu

_NEG_INF = -1e30  # large finite negative; safe under exp() and bf16 cast


# -----------------------------------------------------------------------------
# Kernel 1: RMSNorm1 -> fused QKV projection -> RoPE (lane-dense (B, S, D) outs)
# -----------------------------------------------------------------------------
def qkv_rope_kernel(x_ref, ln1_ref, wqkv_ref, bqkv_ref, cos_ref, sina_ref,
                    sinb_ref, q_ref, k_ref, v_ref, *, eps, half):
    x = x_ref[0]                                   # (Tq, D) f32
    D = x.shape[-1]

    # RMSNorm (f32 statistics)
    ms = jnp.mean(x * x, axis=-1, keepdims=True)
    xn = (x * lax.rsqrt(ms + eps) * ln1_ref[0]).astype(wqkv_ref.dtype)

    # fused QKV projection; wqkv is (D, 3D) pre-transposed, q-scale folded in
    qkv = jnp.dot(xn, wqkv_ref[...],
                  preferred_element_type=jnp.float32) + bqkv_ref[...]

    q = qkv[:, 0 * D:1 * D]
    k = qkv[:, 1 * D:2 * D]
    v = qkv[:, 2 * D:3 * D]

    cos = cos_ref[...]     # (Tq, D) per-head tiled
    sina = sina_ref[...]   # sign-folded sin, nonzero on first half of each head block
    sinb = sinb_ref[...]   # sign-folded sin, nonzero on second half of each head block

    def rope(t):
        # Per-head rotate-half on the whole (Tq, D) slab via two full-width rolls
        # (np.roll semantics: out[j] = in[(j - shift) % D]).
        left = jnp.roll(t, D - half, axis=1)       # t[:, (j + half) % D]
        right = jnp.roll(t, half, axis=1)          # t[:, (j - half) % D]
        return t * cos + left * sina + right * sinb

    od = q_ref.dtype
    q_ref[0] = rope(q).astype(od)                  # single lane-dense (Tq, D) stores
    k_ref[0] = rope(k).astype(od)
    v_ref[0] = v.astype(od)


# -----------------------------------------------------------------------------
# Kernel 2: causal flash attention (per-head online softmax) + out-proj + resid
# -----------------------------------------------------------------------------
def flash_attn_kernel(x_ref, q_ref, k_ref, v_ref, wproj_ref, bproj_ref, o_ref,
                      m_ref, l_ref, acc_ref, *, num_heads, exp_dtype,
                      approx_recip):
    Tq = q_ref.shape[1]
    Tk = k_ref.shape[1]
    D = q_ref.shape[2]
    H = num_heads
    hd = D // H
    qi = pl.program_id(1)
    kv = pl.program_id(2)

    first_row = qi * Tq
    last_row = first_row + (Tq - 1)
    first_col = kv * Tk
    last_col = first_col + (Tk - 1)

    @pl.when(kv == 0)
    def _init():
        m_ref[...] = jnp.full(m_ref.shape, _NEG_INF, jnp.float32)
        l_ref[...] = jnp.zeros(l_ref.shape, jnp.float32)
        acc_ref[...] = jnp.zeros(acc_ref.shape, jnp.float32)

    def flash_step(masked):
        q = q_ref[0]                               # (Tq, D) compute dtype
        k = k_ref[0]                               # (Tk, D)
        v = v_ref[0]
        if masked:
            row = first_row + lax.broadcasted_iota(jnp.int32, (Tq, Tk), 0)
            col = first_col + lax.broadcasted_iota(jnp.int32, (Tq, Tk), 1)
            causal = row >= col
        # Static per-head loop: live score/prob tiles stay (Tq, Tk); the full
        # (H, Tq, Tk) tensor is never materialized.
        for h in range(H):
            sl = slice(h * hd, (h + 1) * hd)
            s = lax.dot_general(q[:, sl], k[:, sl], (((1,), (1,)), ((), ())),
                                preferred_element_type=jnp.float32)  # (Tq, Tk)
            if masked:
                s = jnp.where(causal, s, _NEG_INF)
            m_prev = m_ref[:, h:h + 1]                               # (Tq, 1)
            m_new = jnp.maximum(m_prev, jnp.max(s, axis=-1, keepdims=True))
            alpha = jnp.exp(m_prev - m_new)
            p = jnp.exp((s - m_new).astype(exp_dtype))               # EUP (bf16 on v6e/v7x)
            l_ref[:, h:h + 1] = (alpha * l_ref[:, h:h + 1]
                                 + jnp.sum(p.astype(jnp.float32), axis=-1,
                                           keepdims=True))
            acc_ref[:, sl] = alpha * acc_ref[:, sl] + jnp.dot(
                p.astype(v.dtype), v[:, sl], preferred_element_type=jnp.float32)
            m_ref[:, h:h + 1] = m_new

    # interior tiles (entirely below the diagonal): no mask arithmetic
    @pl.when(jnp.logical_and(first_col <= last_row, last_col <= first_row))
    def _interior():
        flash_step(masked=False)

    # diagonal-intersecting tiles: causal mask
    @pl.when(jnp.logical_and(first_col <= last_row, last_col > first_row))
    def _diagonal():
        flash_step(masked=True)

    @pl.when(kv == pl.num_programs(2) - 1)
    def _finalize():
        parts = []
        for h in range(H):
            inv = pl.reciprocal(l_ref[:, h:h + 1], approx=approx_recip)
            parts.append(acc_ref[:, h * hd:(h + 1) * hd] * inv)
        y = jnp.concatenate(parts, axis=-1).astype(wproj_ref.dtype)  # (Tq, D)
        # single K=D out-projection (full MXU depth) + bias + residual 1
        attn = jnp.dot(y, wproj_ref[...],
                       preferred_element_type=jnp.float32) + bproj_ref[0]
        o_ref[0] = (x_ref[0] + attn).astype(o_ref.dtype)


# -----------------------------------------------------------------------------
# Kernel 3: RMSNorm2 + SwiGLU (hidden dim streamed over a grid axis) + residual
# -----------------------------------------------------------------------------
def swiglu_kernel(x_ref, ln2_ref, w1_ref, w3_ref, w2_ref, o_ref,
                  xn_ref, acc_ref, *, eps):
    hb = pl.program_id(2)

    @pl.when(hb == 0)
    def _init():
        x = x_ref[0]                               # (Tq, D) f32
        ms = jnp.mean(x * x, axis=-1, keepdims=True)
        xn_ref[...] = (x * lax.rsqrt(ms + eps) * ln2_ref[0]).astype(xn_ref.dtype)
        acc_ref[...] = jnp.zeros(acc_ref.shape, jnp.float32)

    xn = xn_ref[...]                               # (Tq, D) compute dtype
    h1 = jnp.dot(xn, w1_ref[...], preferred_element_type=jnp.float32)  # (Tq, Th)
    h3 = jnp.dot(xn, w3_ref[...], preferred_element_type=jnp.float32)
    hmid = (h1 * jax.nn.sigmoid(h1) * h3).astype(w2_ref.dtype)
    acc_ref[...] += jnp.dot(hmid, w2_ref[...], preferred_element_type=jnp.float32)

    @pl.when(hb == pl.num_programs(2) - 1)
    def _finalize():
        o_ref[0] = (x_ref[0] + acc_ref[...]).astype(o_ref.dtype)


# -----------------------------------------------------------------------------
# Helpers
# -----------------------------------------------------------------------------
def _const_spec(arr, single_buffer):
    """Grid-invariant BlockSpec; single-buffered (pl.Buffered(1)) if supported."""
    nd = arr.ndim
    idx = lambda *_: (0,) * nd
    if single_buffer:
        try:
            return pl.BlockSpec(arr.shape, idx, pipeline_mode=pl.Buffered(1))
        except Exception:
            pass
    return pl.BlockSpec(arr.shape, idx)


def _default_vmem_limit():
    try:
        cap = int(pltpu.get_tpu_info().vmem_capacity_bytes)
    except Exception:
        cap = 128 * 1024 * 1024
    # ~32 MiB on v7x (64 MiB physical), 64 MiB on v5e/v6e (128 MiB physical)
    return int(min(64 * 1024 * 1024, max(32 * 1024 * 1024, cap // 2)))


def _bf16_exp_supported():
    try:
        kind = jax.devices()[0].device_kind.lower()
    except Exception:
        return False
    return ("v6" in kind) or ("v7" in kind)   # v5e EUP has no bf16 path


def _pick_tile(total, prefs, requested=None):
    if requested is not None:
        assert total % requested == 0
        return requested
    for p in prefs:
        if p <= total and total % p == 0:
            return p
    return total


# -----------------------------------------------------------------------------
# Wrapper
# -----------------------------------------------------------------------------
def transformer_block(x, params, *, num_heads, eps=1e-8,
                      compute_dtype=jnp.bfloat16, q_tile=None, kv_tile=None,
                      hidden_tile=None, vmem_limit_bytes=None,
                      single_buffer_weights=True, exp_dtype=None):
    (ln1_w, wqkv, bqkv, wproj, bproj, ln2_w, w1, w3, w2, cos, sin) = params
    B, S, D = x.shape
    H = num_heads
    hd = D // H
    assert D % H == 0 and hd % 2 == 0
    half = hd // 2
    hidden = w1.shape[0]

    f32 = jnp.float32
    cd = compute_dtype

    Tq = _pick_tile(S, (128, 256, 64, 32, 16, 8), q_tile)
    Tk = _pick_tile(S, (128, 256, 64, 32, 16, 8), kv_tile)
    Th = _pick_tile(hidden, (512, 256, 128), hidden_tile)

    if vmem_limit_bytes is None:
        vmem_limit_bytes = _default_vmem_limit()
    if exp_dtype is None:
        exp_dtype = (jnp.bfloat16
                     if (cd == jnp.bfloat16 and _bf16_exp_supported())
                     else jnp.float32)
    approx_recip = cd == jnp.bfloat16   # exact reciprocal on the f32 parity path

    # ---- host-side parameter prep (done once; free relative to the kernels) --
    scale = 1.0 / float(hd) ** 0.5
    qkv_scale = jnp.concatenate(
        [jnp.full((D,), scale, f32), jnp.ones((2 * D,), f32)])
    wqkv_t = (wqkv.astype(f32).T * qkv_scale[None, :]).astype(cd)    # (D, 3D)
    bqkv_s = (bqkv.astype(f32) * qkv_scale).reshape(1, 3 * D)        # f32
    wproj_t = wproj.astype(f32).T.astype(cd)                         # (D, D)
    w1_t = w1.astype(f32).T.astype(cd)                               # (D, 4D)
    w3_t = w3.astype(f32).T.astype(cd)                               # (D, 4D)
    w2_t = w2.astype(f32).T.astype(cd)                               # (4D, D)
    ln1_2d = ln1_w.astype(f32).reshape(1, D)
    ln2_2d = ln2_w.astype(f32).reshape(1, D)
    bproj_2d = bproj.astype(f32).reshape(1, D)

    # RoPE tables pre-tiled per head to (S, D); rotate-half sign folded into sin.
    cos_hd = cos.astype(f32)[:S]                                     # (S, hd)
    sin_hd = sin.astype(f32)[:S]
    sign = jnp.concatenate([-jnp.ones((half,), f32), jnp.ones((half,), f32)])
    first_mask = jnp.concatenate([jnp.ones((half,), f32), jnp.zeros((half,), f32)])
    cos_full = jnp.tile(cos_hd, (1, H))                              # (S, D)
    sina = jnp.tile(sin_hd * (sign * first_mask)[None, :], (1, H))   # first halves
    sinb = jnp.tile(sin_hd * (sign * (1.0 - first_mask))[None, :], (1, H))

    x_f = x.astype(f32)

    cp1 = pltpu.CompilerParams(
        dimension_semantics=("parallel", "parallel"),
        vmem_limit_bytes=vmem_limit_bytes)
    cp23 = pltpu.CompilerParams(
        dimension_semantics=("parallel", "parallel", "arbitrary"),
        vmem_limit_bytes=vmem_limit_bytes)

    sbw = single_buffer_weights

    # ---- kernel 1: RMSNorm1 + QKV + RoPE ------------------------------------
    qkv_out = jax.ShapeDtypeStruct((B, S, D), cd)
    row_spec = pl.BlockSpec((1, Tq, D), lambda b, r: (b, r, 0))
    tab_spec = pl.BlockSpec((Tq, D), lambda b, r: (r, 0))
    q_r, k_r, v_r = pl.pallas_call(
        functools.partial(qkv_rope_kernel, eps=eps, half=half),
        out_shape=(qkv_out, qkv_out, qkv_out),
        grid_spec=pltpu.PrefetchScalarGridSpec(
            num_scalar_prefetch=0,
            grid=(B, S // Tq),
            in_specs=[
                row_spec,
                _const_spec(ln1_2d, sbw),
                _const_spec(wqkv_t, sbw),
                _const_spec(bqkv_s, sbw),
                tab_spec, tab_spec, tab_spec,
            ],
            out_specs=(row_spec, row_spec, row_spec),
        ),
        compiler_params=cp1,
    )(x_f, ln1_2d, wqkv_t, bqkv_s, cos_full, sina, sinb)

    # ---- kernel 2: causal flash attention + out-proj + residual 1 -----------
    def kv_index_map(b, qi, kv):
        # clamp to the causal bound: upper-triangle K/V tiles are never copied
        kv_lim = (qi * Tq + (Tq - 1)) // Tk
        return (b, jnp.minimum(kv, kv_lim), 0)

    x1 = pl.pallas_call(
        functools.partial(flash_attn_kernel, num_heads=H, exp_dtype=exp_dtype,
                          approx_recip=approx_recip),
        out_shape=jax.ShapeDtypeStruct((B, S, D), f32),
        grid_spec=pltpu.PrefetchScalarGridSpec(
            num_scalar_prefetch=0,
            grid=(B, S // Tq, S // Tk),
            in_specs=[
                pl.BlockSpec((1, Tq, D), lambda b, qi, kv: (b, qi, 0)),   # x
                pl.BlockSpec((1, Tq, D), lambda b, qi, kv: (b, qi, 0)),   # q
                pl.BlockSpec((1, Tk, D), kv_index_map),                   # k
                pl.BlockSpec((1, Tk, D), kv_index_map),                   # v
                _const_spec(wproj_t, sbw),
                _const_spec(bproj_2d, sbw),
            ],
            out_specs=pl.BlockSpec((1, Tq, D), lambda b, qi, kv: (b, qi, 0)),
            scratch_shapes=[
                pltpu.VMEM((Tq, H), jnp.float32),    # running max per head
                pltpu.VMEM((Tq, H), jnp.float32),    # running denom per head
                pltpu.VMEM((Tq, D), jnp.float32),    # output accumulator
            ],
        ),
        compiler_params=cp23,
    )(x_f, q_r, k_r, v_r, wproj_t, bproj_2d)

    # ---- kernel 3: RMSNorm2 + SwiGLU (hidden dim streamed) + residual 2 -----
    out = pl.pallas_call(
        functools.partial(swiglu_kernel, eps=eps),
        out_shape=jax.ShapeDtypeStruct((B, S, D), f32),
        grid_spec=pltpu.PrefetchScalarGridSpec(
            num_scalar_prefetch=0,
            grid=(B, S // Tq, hidden // Th),
            in_specs=[
                pl.BlockSpec((1, Tq, D), lambda b, i, hb: (b, i, 0)),     # x1
                _const_spec(ln2_2d, sbw),
                pl.BlockSpec((D, Th), lambda b, i, hb: (0, hb)),          # w1
                pl.BlockSpec((D, Th), lambda b, i, hb: (0, hb)),          # w3
                pl.BlockSpec((Th, D), lambda b, i, hb: (hb, 0)),          # w2
            ],
            out_specs=pl.BlockSpec((1, Tq, D), lambda b, i, hb: (b, i, 0)),
            scratch_shapes=[
                pltpu.VMEM((Tq, D), cd),             # cached RMSNorm2 output
                pltpu.VMEM((Tq, D), jnp.float32),    # MLP accumulator
            ],
        ),
        compiler_params=cp23,
    )(x1, ln2_2d, w1_t, w3_t, w2_t)
    return out


# -----------------------------------------------------------------------------
# Pure-JAX reference (mirrors the PyTorch forward exactly, f32)
# -----------------------------------------------------------------------------
def reference_block(x, params, *, num_heads, eps=1e-8):
    (ln1_w, wqkv, bqkv, wproj, bproj, ln2_w, w1, w3, w2, cos, sin) = params
    B, S, D = x.shape
    H = num_heads
    hd = D // H

    def rms(v, w):
        return v * lax.rsqrt(jnp.mean(v * v, -1, keepdims=True) + eps) * w

    xn = rms(x, ln1_w)
    qkv = xn @ wqkv.T + bqkv
    q, k, v = jnp.split(qkv, 3, axis=-1)
    q = q.reshape(B, S, H, hd).transpose(0, 2, 1, 3)
    k = k.reshape(B, S, H, hd).transpose(0, 2, 1, 3)
    v = v.reshape(B, S, H, hd).transpose(0, 2, 1, 3)
    c = cos[None, None, :S]
    s = sin[None, None, :S]
    q_ri = jnp.concatenate([-q[..., hd // 2:], q[..., :hd // 2]], -1)
    k_ri = jnp.concatenate([-k[..., hd // 2:], k[..., :hd // 2]], -1)
    q = q * c + q_ri * s
    k = k * c + k_ri * s
    scores = jnp.einsum('bhqd,bhkd->bhqk', q, k) / jnp.sqrt(jnp.float32(hd))
    mask = jnp.tril(jnp.ones((S, S), bool))
    scores = jnp.where(mask[None, None], scores, -jnp.inf)
    p = jax.nn.softmax(scores, axis=-1)
    y = jnp.einsum('bhqk,bhkd->bhqd', p, v)
    y = y.transpose(0, 2, 1, 3).reshape(B, S, D)
    x = x + (y @ wproj.T + bproj)
    xn2 = rms(x, ln2_w)
    h = jax.nn.silu(xn2 @ w1.T) * (xn2 @ w3.T)
    return x + h @ w2.T


def precompute_freqs_cis(dim, end, theta=10000.0):
    freqs = 1.0 / theta ** (jnp.arange(0, dim, 2, dtype=jnp.float32) / dim)
    freqs = jnp.outer(jnp.arange(end, dtype=jnp.float32), freqs)
    cos, sin = jnp.cos(freqs), jnp.sin(freqs)
    return (jnp.concatenate([cos, cos], -1),     # (end, dim)
            jnp.concatenate([sin, sin], -1))


if __name__ == "__main__":
    # small shapes, but large enough to exercise the q-tile / kv-tile / hidden grid
    B, S, D, H = 2, 256, 128, 4
    hd = D // H

    key = jax.random.PRNGKey(0)
    ks = jax.random.split(key, 10)
    std = 0.02

    x = jax.random.normal(ks[0], (B, S, D), jnp.float32)
    ln1_w = 1.0 + 0.01 * jax.random.normal(ks[1], (D,), jnp.float32)
    ln2_w = 1.0 + 0.01 * jax.random.normal(ks[2], (D,), jnp.float32)
    wqkv = std * jax.random.normal(ks[3], (3 * D, D), jnp.float32)
    bqkv = std * jax.random.normal(ks[4], (3 * D,), jnp.float32)
    wproj = std * jax.random.normal(ks[5], (D, D), jnp.float32)
    bproj = std * jax.random.normal(ks[6], (D,), jnp.float32)
    w1 = std * jax.random.normal(ks[7], (4 * D, D), jnp.float32)
    w3 = std * jax.random.normal(ks[8], (4 * D, D), jnp.float32)
    w2 = std * jax.random.normal(ks[9], (D, 4 * D), jnp.float32)
    cos, sin = precompute_freqs_cis(hd, S)

    params = (ln1_w, wqkv, bqkv, wproj, bproj, ln2_w, w1, w3, w2, cos, sin)

    ref = reference_block(x, params, num_heads=H)

    def run(**kw):
        return jax.block_until_ready(
            transformer_block(x, params, num_heads=H, **kw))

    # bf16 compute path (default: MXU-native inputs, f32 accumulation)
    try:
        out_bf16 = run()
        sbw = True
    except Exception:
        # fallback if single-buffered (pl.Buffered(1)) weight specs are rejected
        out_bf16 = run(single_buffer_weights=False)
        sbw = False
    assert out_bf16.shape == (B, S, D)
    assert jnp.allclose(out_bf16, ref, atol=3e-2, rtol=3e-2), \
        "bf16 kernel mismatch vs reference"

    # f32 parity path (exact reciprocal, f32 exp)
    out_f32 = run(compute_dtype=jnp.float32, single_buffer_weights=sbw)
    assert out_f32.shape == (B, S, D)
    assert jnp.allclose(out_f32, ref, atol=5e-3, rtol=5e-3), \
        "f32 kernel mismatch vs reference"

    print("KERNEL_OK")
</pallas_src>

<mosaic_0001>
module attributes {stable_mosaic.version = 11 : i64} {
  func.func @qkv_rope_kernel(%arg0: i32, %arg1: i32, %arg2: memref<1x128x128xf32, #tpu.memory_space<vmem>>, %arg3: memref<1x128xf32, #tpu.memory_space<vmem>>, %arg4: memref<128x384xbf16, #tpu.memory_space<vmem>>, %arg5: memref<1x384xf32, #tpu.memory_space<vmem>>, %arg6: memref<128x128xf32, #tpu.memory_space<vmem>>, %arg7: memref<128x128xf32, #tpu.memory_space<vmem>>, %arg8: memref<128x128xf32, #tpu.memory_space<vmem>>, %arg9: memref<1x128x128xbf16, #tpu.memory_space<vmem>>, %arg10: memref<1x128x128xbf16, #tpu.memory_space<vmem>>, %arg11: memref<1x128x128xbf16, #tpu.memory_space<vmem>>) attributes {dimension_semantics = [#tpu.dimension_semantics<parallel>, #tpu.dimension_semantics<parallel>], iteration_bounds = array<i64: 2, 2>, scalar_prefetch = 0 : i64, scratch_operands = 0 : i64, tpu.core_type = #tpu.core_type<tc>, window_params = [{transform_indices = @transform_0, window_bounds = array<i64: 1, 128, 128>}, {pipeline_mode = #tpu.pipeline_mode<synchronous>, transform_indices = @transform_1, window_bounds = array<i64: 1, 128>}, {pipeline_mode = #tpu.pipeline_mode<synchronous>, transform_indices = @transform_2, window_bounds = array<i64: 128, 384>}, {pipeline_mode = #tpu.pipeline_mode<synchronous>, transform_indices = @transform_3, window_bounds = array<i64: 1, 384>}, {transform_indices = @transform_4, window_bounds = array<i64: 128, 128>}, {transform_indices = @transform_5, window_bounds = array<i64: 128, 128>}, {transform_indices = @transform_6, window_bounds = array<i64: 128, 128>}, {transform_indices = @transform_7, window_bounds = array<i64: 1, 128, 128>}, {transform_indices = @transform_8, window_bounds = array<i64: 1, 128, 128>}, {transform_indices = @transform_9, window_bounds = array<i64: 1, 128, 128>}]} {
    %c0 = arith.constant 0 : index
    %c0_0 = arith.constant 0 : index
    %c0_1 = arith.constant 0 : index
    %0 = vector.load %arg2[%c0, %c0_0, %c0_1] : memref<1x128x128xf32, #tpu.memory_space<vmem>>, vector<1x128x128xf32>
    %1 = vector.shape_cast %0 : vector<1x128x128xf32> to vector<128x128xf32>
    %2 = arith.mulf %1, %1 : vector<128x128xf32>
    %cst = arith.constant dense<0.000000e+00> : vector<128xf32>
    %3 = vector.multi_reduction <add>, %2, %cst [1] : vector<128x128xf32> to vector<128xf32>
    %4 = vector.shape_cast %3 : vector<128xf32> to vector<128x1xf32>
    %cst_2 = arith.constant 1.280000e+02 : f32
    %5 = vector.broadcast %cst_2 : f32 to vector<128x1xf32>
    %6 = arith.divf %4, %5 : vector<128x1xf32>
    %cst_3 = arith.constant 9.99999993E-9 : f32
    %7 = vector.broadcast %cst_3 : f32 to vector<128x1xf32>
    %8 = arith.addf %6, %7 : vector<128x1xf32>
    %9 = math.rsqrt %8 : vector<128x1xf32>
    %10 = vector.broadcast %9 : vector<128x1xf32> to vector<128x128xf32>
    %11 = arith.mulf %1, %10 : vector<128x128xf32>
    %c0_4 = arith.constant 0 : index
    %c0_5 = arith.constant 0 : index
    %12 = vector.load %arg3[%c0_4, %c0_5] : memref<1x128xf32, #tpu.memory_space<vmem>>, vector<1x128xf32>
    %13 = vector.shape_cast %12 : vector<1x128xf32> to vector<128xf32>
    %14 = vector.shape_cast %13 : vector<128xf32> to vector<1x128xf32>
    %15 = vector.broadcast %14 : vector<1x128xf32> to vector<128x128xf32>
    %16 = arith.mulf %11, %15 : vector<128x128xf32>
    %17 = arith.truncf %16 : vector<128x128xf32> to vector<128x128xbf16>
    %c0_6 = arith.constant 0 : index
    %c0_7 = arith.constant 0 : index
    %18 = vector.load %arg4[%c0_6, %c0_7] : memref<128x384xbf16, #tpu.memory_space<vmem>>, vector<128x384xbf16>
    %cst_8 = arith.constant dense<0.000000e+00> : vector<128x384xf32>
    %19 = tpu.matmul %17, %18, %cst_8 {dimension_numbers = #tpu.dot_dimension_numbers<[1], [0], [0], [1], [0, 0, 1, 1], [], []>} : vector<128x128xbf16>, vector<128x384xbf16>, vector<128x384xf32> -> vector<128x384xf32>
    %c0_9 = arith.constant 0 : index
    %c0_10 = arith.constant 0 : index
    %20 = vector.load %arg5[%c0_9, %c0_10] : memref<1x384xf32, #tpu.memory_space<vmem>>, vector<1x384xf32>
    %21 = vector.broadcast %20 : vector<1x384xf32> to vector<128x384xf32>
    %22 = arith.addf %19, %21 : vector<128x384xf32>
    %23 = vector.extract_strided_slice %22 {offsets = [0, 0], sizes = [128, 128], strides = [1, 1]} : vector<128x384xf32> to vector<128x128xf32>
    %24 = vector.extract_strided_slice %22 {offsets = [0, 128], sizes = [128, 128], strides = [1, 1]} : vector<128x384xf32> to vector<128x128xf32>
    %25 = vector.extract_strided_slice %22 {offsets = [0, 256], sizes = [128, 128], strides = [1, 1]} : vector<128x384xf32> to vector<128x128xf32>
    %c0_11 = arith.constant 0 : index
    %c0_12 = arith.constant 0 : index
    %26 = vector.load %arg6[%c0_11, %c0_12] : memref<128x128xf32, #tpu.memory_space<vmem>>, vector<128x128xf32>
    %c0_13 = arith.constant 0 : index
    %c0_14 = arith.constant 0 : index
    %27 = vector.load %arg7[%c0_13, %c0_14] : memref<128x128xf32, #tpu.memory_space<vmem>>, vector<128x128xf32>
    %c0_15 = arith.constant 0 : index
    %c0_16 = arith.constant 0 : index
    %28 = vector.load %arg8[%c0_15, %c0_16] : memref<128x128xf32, #tpu.memory_space<vmem>>, vector<128x128xf32>
    %29 = vector.extract_strided_slice %23 {offsets = [0, 16], sizes = [128, 112], strides = [1, 1]} : vector<128x128xf32> to vector<128x112xf32>
    %30 = vector.extract_strided_slice %23 {offsets = [0, 0], sizes = [128, 16], strides = [1, 1]} : vector<128x128xf32> to vector<128x16xf32>
    %31 = tpu.concatenate %29, %30 in 1 : vector<128x112xf32>, vector<128x16xf32> -> vector<128x128xf32>
    %32 = vector.extract_strided_slice %23 {offsets = [0, 112], sizes = [128, 16], strides = [1, 1]} : vector<128x128xf32> to vector<128x16xf32>
    %33 = vector.extract_strided_slice %23 {offsets = [0, 0], sizes = [128, 112], strides = [1, 1]} : vector<128x128xf32> to vector<128x112xf32>
    %34 = tpu.concatenate %32, %33 in 1 : vector<128x16xf32>, vector<128x112xf32> -> vector<128x128xf32>
    %35 = arith.mulf %23, %26 : vector<128x128xf32>
    %36 = arith.mulf %31, %27 : vector<128x128xf32>
    %37 = arith.addf %35, %36 : vector<128x128xf32>
    %38 = arith.mulf %34, %28 : vector<128x128xf32>
    %39 = arith.addf %37, %38 : vector<128x128xf32>
    %40 = arith.truncf %39 : vector<128x128xf32> to vector<128x128xbf16>
    %c0_17 = arith.constant 0 : index
    %c0_18 = arith.constant 0 : index
    %c0_19 = arith.constant 0 : index
    %41 = vector.load %arg9[%c0_17, %c0_18, %c0_19] : memref<1x128x128xbf16, #tpu.memory_space<vmem>>, vector<1x128x128xbf16>
    %42 = vector.shape_cast %41 : vector<1x128x128xbf16> to vector<128x128xbf16>
    %43 = vector.shape_cast %40 : vector<128x128xbf16> to vector<1x128x128xbf16>
    tpu.vector_store %arg9[%c0_17, %c0_18, %c0_19], %43 {strides = array<i32>} : memref<1x128x128xbf16, #tpu.memory_space<vmem>>, vector<1x128x128xbf16>,
    %44 = vector.extract_strided_slice %24 {offsets = [0, 16], sizes = [128, 112], strides = [1, 1]} : vector<128x128xf32> to vector<128x112xf32>
    %45 = vector.extract_strided_slice %24 {offsets = [0, 0], sizes = [128, 16], strides = [1, 1]} : vector<128x128xf32> to vector<128x16xf32>
    %46 = tpu.concatenate %44, %45 in 1 : vector<128x112xf32>, vector<128x16xf32> -> vector<128x128xf32>
    %47 = vector.extract_strided_slice %24 {offsets = [0, 112], sizes = [128, 16], strides = [1, 1]} : vector<128x128xf32> to vector<128x16xf32>
    %48 = vector.extract_strided_slice %24 {offsets = [0, 0], sizes = [128, 112], strides = [1, 1]} : vector<128x128xf32> to vector<128x112xf32>
    %49 = tpu.concatenate %47, %48 in 1 : vector<128x16xf32>, vector<128x112xf32> -> vector<128x128xf32>
    %50 = arith.mulf %24, %26 : vector<128x128xf32>
    %51 = arith.mulf %46, %27 : vector<128x128xf32>
    %52 = arith.addf %50, %51 : vector<128x128xf32>
    %53 = arith.mulf %49, %28 : vector<128x128xf32>
    %54 = arith.addf %52, %53 : vector<128x128xf32>
    %55 = arith.truncf %54 : vector<128x128xf32> to vector<128x128xbf16>
    %c0_20 = arith.constant 0 : index
    %c0_21 = arith.constant 0 : index
    %c0_22 = arith.constant 0 : index
    %56 = vector.load %arg10[%c0_20, %c0_21, %c0_22] : memref<1x128x128xbf16, #tpu.memory_space<vmem>>, vector<1x128x128xbf16>
    %57 = vector.shape_cast %56 : vector<1x128x128xbf16> to vector<128x128xbf16>
    %58 = vector.shape_cast %55 : vector<128x128xbf16> to vector<1x128x128xbf16>
    tpu.vector_store %arg10[%c0_20, %c0_21, %c0_22], %58 {strides = array<i32>} : memref<1x128x128xbf16, #tpu.memory_space<vmem>>, vector<1x128x128xbf16>,
    %59 = arith.truncf %25 : vector<128x128xf32> to vector<128x128xbf16>
    %c0_23 = arith.constant 0 : index
    %c0_24 = arith.constant 0 : index
    %c0_25 = arith.constant 0 : index
    %60 = vector.load %arg11[%c0_23, %c0_24, %c0_25] : memref<1x128x128xbf16, #tpu.memory_space<vmem>>, vector<1x128x128xbf16>
    %61 = vector.shape_cast %60 : vector<1x128x128xbf16> to vector<128x128xbf16>
    %62 = vector.shape_cast %59 : vector<128x128xbf16> to vector<1x128x128xbf16>
    tpu.vector_store %arg11[%c0_23, %c0_24, %c0_25], %62 {strides = array<i32>} : memref<1x128x128xbf16, #tpu.memory_space<vmem>>, vector<1x128x128xbf16>,
    return
  }
  func.func @transform_0(%arg0: i32, %arg1: i32) -> (i32, i32, i32) {
    %c0_i32 = arith.constant 0 : i32
    %c0_i32_0 = arith.constant 0 : i32
    return %arg0, %arg1, %c0_i32 : i32, i32, i32
  }
  func.func @transform_1(%arg0: i32, %arg1: i32) -> (i32, i32) {
    %c0_i32 = arith.constant 0 : i32
    %c0_i32_0 = arith.constant 0 : i32
    %c0_i32_1 = arith.constant 0 : i32
    return %c0_i32, %c0_i32_0 : i32, i32
  }
  func.func @transform_2(%arg0: i32, %arg1: i32) -> (i32, i32) {
    %c0_i32 = arith.constant 0 : i32
    %c0_i32_0 = arith.constant 0 : i32
    %c0_i32_1 = arith.constant 0 : i32
    return %c0_i32, %c0_i32_0 : i32, i32
  }
  func.func @transform_3(%arg0: i32, %arg1: i32) -> (i32, i32) {
    %c0_i32 = arith.constant 0 : i32
    %c0_i32_0 = arith.constant 0 : i32
    %c0_i32_1 = arith.constant 0 : i32
    return %c0_i32, %c0_i32_0 : i32, i32
  }
  func.func @transform_4(%arg0: i32, %arg1: i32) -> (i32, i32) {
    %c0_i32 = arith.constant 0 : i32
    %c0_i32_0 = arith.constant 0 : i32
    return %arg1, %c0_i32 : i32, i32
  }
  func.func @transform_5(%arg0: i32, %arg1: i32) -> (i32, i32) {
    %c0_i32 = arith.constant 0 : i32
    %c0_i32_0 = arith.constant 0 : i32
    return %arg1, %c0_i32 : i32, i32
  }
  func.func @transform_6(%arg0: i32, %arg1: i32) -> (i32, i32) {
    %c0_i32 = arith.constant 0 : i32
    %c0_i32_0 = arith.constant 0 : i32
    return %arg1, %c0_i32 : i32, i32
  }
  func.func @transform_7(%arg0: i32, %arg1: i32) -> (i32, i32, i32) {
    %c0_i32 = arith.constant 0 : i32
    %c0_i32_0 = arith.constant 0 : i32
    return %arg0, %arg1, %c0_i32 : i32, i32, i32
  }
  func.func @transform_8(%arg0: i32, %arg1: i32) -> (i32, i32, i32) {
    %c0_i32 = arith.constant 0 : i32
    %c0_i32_0 = arith.constant 0 : i32
    return %arg0, %arg1, %c0_i32 : i32, i32, i32
  }
  func.func @transform_9(%arg0: i32, %arg1: i32) -> (i32, i32, i32) {
    %c0_i32 = arith.constant 0 : i32
    %c0_i32_0 = arith.constant 0 : i32
    return %arg0, %arg1, %c0_i32 : i32, i32, i32
  }
}

module attributes {stable_mosaic.version = 11 : i64} {
  func.func @qkv_rope_kernel(%arg0: i32, %arg1: i32, %arg2: memref<1x128x128xf32, #tpu.memory_space<vmem>>, %arg3: memref<1x128xf32, #tpu.memory_space<vmem>>, %arg4: memref<128x384xbf16, #tpu.memory_space<vmem>>, %arg5: memref<1x384xf32, #tpu.memory_space<vmem>>, %arg6: memref<128x128xf32, #tpu.memory_space<vmem>>, %arg7: memref<128x128xf32, #tpu.memory_space<vmem>>, %arg8: memref<128x128xf32, #tpu.memory_space<vmem>>, %arg9: memref<1x128x128xbf16, #tpu.memory_space<vmem>>, %arg10: memref<1x128x128xbf16, #tpu.memory_space<vmem>>, %arg11: memref<1x128x128xbf16, #tpu.memory_space<vmem>>) attributes {dimension_semantics = [#tpu.dimension_semantics<parallel>, #tpu.dimension_semantics<parallel>], iteration_bounds = array<i64: 2, 2>, scalar_prefetch = 0 : i64, scratch_operands = 0 : i64, tpu.core_type = #tpu.core_type<tc>, window_params = [{transform_indices = @transform_0, window_bounds = array<i64: 1, 128, 128>}, {pipeline_mode = #tpu.pipeline_mode<synchronous>, transform_indices = @transform_1, window_bounds = array<i64: 1, 128>}, {pipeline_mode = #tpu.pipeline_mode<synchronous>, transform_indices = @transform_2, window_bounds = array<i64: 128, 384>}, {pipeline_mode = #tpu.pipeline_mode<synchronous>, transform_indices = @transform_3, window_bounds = array<i64: 1, 384>}, {transform_indices = @transform_4, window_bounds = array<i64: 128, 128>}, {transform_indices = @transform_5, window_bounds = array<i64: 128, 128>}, {transform_indices = @transform_6, window_bounds = array<i64: 128, 128>}, {transform_indices = @transform_7, window_bounds = array<i64: 1, 128, 128>}, {transform_indices = @transform_8, window_bounds = array<i64: 1, 128, 128>}, {transform_indices = @transform_9, window_bounds = array<i64: 1, 128, 128>}]} {
    %c0 = arith.constant 0 : index
    %c0_0 = arith.constant 0 : index
    %c0_1 = arith.constant 0 : index
    %0 = vector.load %arg2[%c0, %c0_0, %c0_1] : memref<1x128x128xf32, #tpu.memory_space<vmem>>, vector<1x128x128xf32>
    %1 = vector.shape_cast %0 : vector<1x128x128xf32> to vector<128x128xf32>
    %2 = arith.mulf %1, %1 : vector<128x128xf32>
    %cst = arith.constant dense<0.000000e+00> : vector<128xf32>
    %3 = vector.multi_reduction <add>, %2, %cst [1] : vector<128x128xf32> to vector<128xf32>
    %4 = vector.shape_cast %3 : vector<128xf32> to vector<128x1xf32>
    %cst_2 = arith.constant 1.280000e+02 : f32
    %5 = vector.broadcast %cst_2 : f32 to vector<128x1xf32>
    %6 = arith.divf %4, %5 : vector<128x1xf32>
    %cst_3 = arith.constant 9.99999993E-9 : f32
    %7 = vector.broadcast %cst_3 : f32 to vector<128x1xf32>
    %8 = arith.addf %6, %7 : vector<128x1xf32>
    %9 = math.rsqrt %8 : vector<128x1xf32>
    %10 = vector.broadcast %9 : vector<128x1xf32> to vector<128x128xf32>
    %11 = arith.mulf %1, %10 : vector<128x128xf32>
    %c0_4 = arith.constant 0 : index
    %c0_5 = arith.constant 0 : index
    %12 = vector.load %arg3[%c0_4, %c0_5] : memref<1x128xf32, #tpu.memory_space<vmem>>, vector<1x128xf32>
    %13 = vector.shape_cast %12 : vector<1x128xf32> to vector<128xf32>
    %14 = vector.shape_cast %13 : vector<128xf32> to vector<1x128xf32>
    %15 = vector.broadcast %14 : vector<1x128xf32> to vector<128x128xf32>
    %16 = arith.mulf %11, %15 : vector<128x128xf32>
    %17 = arith.truncf %16 : vector<128x128xf32> to vector<128x128xbf16>
    %c0_6 = arith.constant 0 : index
    %c0_7 = arith.constant 0 : index
    %18 = vector.load %arg4[%c0_6, %c0_7] : memref<128x384xbf16, #tpu.memory_space<vmem>>, vector<128x384xbf16>
    %cst_8 = arith.constant dense<0.000000e+00> : vector<128x384xf32>
    %19 = tpu.matmul %17, %18, %cst_8 {dimension_numbers = #tpu.dot_dimension_numbers<[1], [0], [0], [1], [0, 0, 1, 1], [], []>} : vector<128x128xbf16>, vector<128x384xbf16>, vector<128x384xf32> -> vector<128x384xf32>
    %c0_9 = arith.constant 0 : index
    %c0_10 = arith.constant 0 : index
    %20 = vector.load %arg5[%c0_9, %c0_10] : memref<1x384xf32, #tpu.memory_space<vmem>>, vector<1x384xf32>
    %21 = vector.broadcast %20 : vector<1x384xf32> to vector<128x384xf32>
    %22 = arith.addf %19, %21 : vector<128x384xf32>
    %23 = vector.extract_strided_slice %22 {offsets = [0, 0], sizes = [128, 128], strides = [1, 1]} : vector<128x384xf32> to vector<128x128xf32>
    %24 = vector.extract_strided_slice %22 {offsets = [0, 128], sizes = [128, 128], strides = [1, 1]} : vector<128x384xf32> to vector<128x128xf32>
    %25 = vector.extract_strided_slice %22 {offsets = [0, 256], sizes = [128, 128], strides = [1, 1]} : vector<128x384xf32> to vector<128x128xf32>
    %c0_11 = arith.constant 0 : index
    %c0_12 = arith.constant 0 : index
    %26 = vector.load %arg6[%c0_11, %c0_12] : memref<128x128xf32, #tpu.memory_space<vmem>>, vector<128x128xf32>
    %c0_13 = arith.constant 0 : index
    %c0_14 = arith.constant 0 : index
    %27 = vector.load %arg7[%c0_13, %c0_14] : memref<128x128xf32, #tpu.memory_space<vmem>>, vector<128x128xf32>
    %c0_15 = arith.constant 0 : index
    %c0_16 = arith.constant 0 : index
    %28 = vector.load %arg8[%c0_15, %c0_16] : memref<128x128xf32, #tpu.memory_space<vmem>>, vector<128x128xf32>
    %29 = vector.extract_strided_slice %23 {offsets = [0, 16], sizes = [128, 112], strides = [1, 1]} : vector<128x128xf32> to vector<128x112xf32>
    %30 = vector.extract_strided_slice %23 {offsets = [0, 0], sizes = [128, 16], strides = [1, 1]} : vector<128x128xf32> to vector<128x16xf32>
    %31 = tpu.concatenate %29, %30 in 1 : vector<128x112xf32>, vector<128x16xf32> -> vector<128x128xf32>
    %32 = vector.extract_strided_slice %23 {offsets = [0, 112], sizes = [128, 16], strides = [1, 1]} : vector<128x128xf32> to vector<128x16xf32>
    %33 = vector.extract_strided_slice %23 {offsets = [0, 0], sizes = [128, 112], strides = [1, 1]} : vector<128x128xf32> to vector<128x112xf32>
    %34 = tpu.concatenate %32, %33 in 1 : vector<128x16xf32>, vector<128x112xf32> -> vector<128x128xf32>
    %35 = arith.mulf %23, %26 : vector<128x128xf32>
    %36 = arith.mulf %31, %27 : vector<128x128xf32>
    %37 = arith.addf %35, %36 : vector<128x128xf32>
    %38 = arith.mulf %34, %28 : vector<128x128xf32>
    %39 = arith.addf %37, %38 : vector<128x128xf32>
    %40 = arith.truncf %39 : vector<128x128xf32> to vector<128x128xbf16>
    %c0_17 = arith.constant 0 : index
    %c0_18 = arith.constant 0 : index
    %c0_19 = arith.constant 0 : index
    %41 = vector.load %arg9[%c0_17, %c0_18, %c0_19] : memref<1x128x128xbf16, #tpu.memory_space<vmem>>, vector<1x128x128xbf16>
    %42 = vector.shape_cast %41 : vector<1x128x128xbf16> to vector<128x128xbf16>
    %43 = vector.shape_cast %40 : vector<128x128xbf16> to vector<1x128x128xbf16>
    tpu.vector_store %arg9[%c0_17, %c0_18, %c0_19], %43 {strides = array<i32>} : memref<1x128x128xbf16, #tpu.memory_space<vmem>>, vector<1x128x128xbf16>,
    %44 = vector.extract_strided_slice %24 {offsets = [0, 16], sizes = [128, 112], strides = [1, 1]} : vector<128x128xf32> to vector<128x112xf32>
    %45 = vector.extract_strided_slice %24 {offsets = [0, 0], sizes = [128, 16], strides = [1, 1]} : vector<128x128xf32> to vector<128x16xf32>
    %46 = tpu.concatenate %44, %45 in 1 : vector<128x112xf32>, vector<128x16xf32> -> vector<128x128xf32>
    %47 = vector.extract_strided_slice %24 {offsets = [0, 112], sizes = [128, 16], strides = [1, 1]} : vector<128x128xf32> to vector<128x16xf32>
    %48 = vector.extract_strided_slice %24 {offsets = [0, 0], sizes = [128, 112], strides = [1, 1]} : vector<128x128xf32> to vector<128x112xf32>
    %49 = tpu.concatenate %47, %48 in 1 : vector<128x16xf32>, vector<128x112xf32> -> vector<128x128xf32>
    %50 = arith.mulf %24, %26 : vector<128x128xf32>
    %51 = arith.mulf %46, %27 : vector<128x128xf32>
    %52 = arith.addf %50, %51 : vector<128x128xf32>
    %53 = arith.mulf %49, %28 : vector<128x128xf32>
    %54 = arith.addf %52, %53 : vector<128x128xf32>
    %55 = arith.truncf %54 : vector<128x128xf32> to vector<128x128xbf16>
    %c0_20 = arith.constant 0 : index
    %c0_21 = arith.constant 0 : index
    %c0_22 = arith.constant 0 : index
    %56 = vector.load %arg10[%c0_20, %c0_21, %c0_22] : memref<1x128x128xbf16, #tpu.memory_space<vmem>>, vector<1x128x128xbf16>
    %57 = vector.shape_cast %56 : vector<1x128x128xbf16> to vector<128x128xbf16>
    %58 = vector.shape_cast %55 : vector<128x128xbf16> to vector<1x128x128xbf16>
    tpu.vector_store %arg10[%c0_20, %c0_21, %c0_22], %58 {strides = array<i32>} : memref<1x128x128xbf16, #tpu.memory_space<vmem>>, vector<1x128x128xbf16>,
    %59 = arith.truncf %25 : vector<128x128xf32> to vector<128x128xbf16>
    %c0_23 = arith.constant 0 : index
    %c0_24 = arith.constant 0 : index
    %c0_25 = arith.constant 0 : index
    %60 = vector.load %arg11[%c0_23, %c0_24, %c0_25] : memref<1x128x128xbf16, #tpu.memory_space<vmem>>, vector<1x128x128xbf16>
    %61 = vector.shape_cast %60 : vector<1x128x128xbf16> to vector<128x128xbf16>
    %62 = vector.shape_cast %59 : vector<128x128xbf16> to vector<1x128x128xbf16>
    tpu.vector_store %arg11[%c0_23, %c0_24, %c0_25], %62 {strides = array<i32>} : memref<1x128x128xbf16, #tpu.memory_space<vmem>>, vector<1x128x128xbf16>,
    return
  }
  func.func @transform_0(%arg0: i32, %arg1: i32) -> (i32, i32, i32) {
    %c0_i32 = arith.constant 0 : i32
    %c0_i32_0 = arith.constant 0 : i32
    return %arg0, %arg1, %c0_i32 : i32, i32, i32
  }
  func.func @transform_1(%arg0: i32, %arg1: i32) -> (i32, i32) {
    %c0_i32 = arith.constant 0 : i32
    %c0_i32_0 = arith.constant 0 : i32
    %c0_i32_1 = arith.constant 0 : i32
    return %c0_i32, %c0_i32_0 : i32, i32
  }
  func.func @transform_2(%arg0: i32, %arg1: i32) -> (i32, i32) {
    %c0_i32 = arith.constant 0 : i32
    %c0_i32_0 = arith.constant 0 : i32
    %c0_i32_1 = arith.constant 0 : i32
    return %c0_i32, %c0_i32_0 : i32, i32
  }
  func.func @transform_3(%arg0: i32, %arg1: i32) -> (i32, i32) {
    %c0_i32 = arith.constant 0 : i32
    %c0_i32_0 = arith.constant 0 : i32
    %c0_i32_1 = arith.constant 0 : i32
    return %c0_i32, %c0_i32_0 : i32, i32
  }
  func.func @transform_4(%arg0: i32, %arg1: i32) -> (i32, i32) {
    %c0_i32 = arith.constant 0 : i32
    %c0_i32_0 = arith.constant 0 : i32
    return %arg1, %c0_i32 : i32, i32
  }
  func.func @transform_5(%arg0: i32, %arg1: i32) -> (i32, i32) {
    %c0_i32 = arith.constant 0 : i32
    %c0_i32_0 = arith.constant 0 : i32
    return %arg1, %c0_i32 : i32, i32
  }
  func.func @transform_6(%arg0: i32, %arg1: i32) -> (i32, i32) {
    %c0_i32 = arith.constant 0 : i32
    %c0_i32_0 = arith.constant 0 : i32
    return %arg1, %c0_i32 : i32, i32
  }
  func.func @transform_7(%arg0: i32, %arg1: i32) -> (i32, i32, i32) {
    %c0_i32 = arith.constant 0 : i32
    %c0_i32_0 = arith.constant 0 : i32
    return %arg0, %arg1, %c0_i32 : i32, i32, i32
  }
  func.func @transform_8(%arg0: i32, %arg1: i32) -> (i32, i32, i32) {
    %c0_i32 = arith.constant 0 : i32
    %c0_i32_0 = arith.constant 0 : i32
    return %arg0, %arg1, %c0_i32 : i32, i32, i32
  }
  func.func @transform_9(%arg0: i32, %arg1: i32) -> (i32, i32, i32) {
    %c0_i32 = arith.constant 0 : i32
    %c0_i32_0 = arith.constant 0 : i32
    return %arg0, %arg1, %c0_i32 : i32, i32, i32
  }
}

</mosaic_0001>

<bundles_post_ra>
// kernel: tpu_custom_call.1
= control target key start
LH: loop header
LB: loop body
LE: loop exit
PB: predicated region body
PF: predicated region fallthrough
CT: control target
= control target key end

     0   :  { %s4231_s0 = inlined_call_operand.hbm [shape: f32[2,256,128], index: 0, kind: input, shape index: {}]   ;;  %s4232_s1 = inlined_call_operand.hbm [shape: f32[1,128], index: 1, kind: input, shape index: {}]   ;;  %s4233_s2 = inlined_call_operand.hbm [shape: bf16[128,384], index: 2, kind: input, shape index: {}]   ;;  %s4234_s3 = inlined_call_operand.hbm [shape: f32[1,384], index: 3, kind: input, shape index: {}]   ;;  %s4235_s4 = inlined_call_operand.hbm [shape: f32[256,128], index: 4, kind: input, shape index: {}]   ;;  %s4236_s5 = inlined_call_operand.hbm [shape: f32[256,128], index: 5, kind: input, shape index: {}]   ;;  %s4237_s6 = inlined_call_operand.hbm [shape: f32[256,128], index: 6, kind: input, shape index: {}]   ;;  %s4238_s7 = inlined_call_operand.hbm [shape: bf16[2,256,128], index: 7, kind: output, shape index: {0}]   ;;  %s4239_s8 = inlined_call_operand.hbm [shape: bf16[2,256,128], index: 8, kind: output, shape index: {1}]   ;;  %s4240_s9 = inlined_call_operand.hbm [shape: bf16[2,256,128], index: 9, kind: output, shape index: {2}]  }
   0x1   :  { %4257 = sst [smem:[#allocation35_spill]] %s4231_s0 }
   0x2   :  { %4258 = sst [smem:[#allocation36_spill]] %s4232_s1 }
   0x3   :  { %4259 = sst [smem:[#allocation37_spill]] %s4233_s2 }
   0x4   :  { %4260 = sst [smem:[#allocation38_spill]] %s4235_s4 }
   0x5   :  { %4261 = sst [smem:[#allocation39_spill]] %s4236_s5 }
   0x6   :  { %4262 = sst [smem:[#allocation40_spill]] %s4237_s6 }
   0x7   :  { %4263 = sst [smem:[#allocation41_spill]] %s4238_s7 }
   0x8   :  { %4264 = sst [smem:[#allocation42_spill]] %s4239_s8 }
   0x9   :  { %4265 = sst [smem:[#allocation43_spill]] %s4240_s9 }
   0xa   :  { %15 = vsyncpa [#allocation3], 0 }
   0xb   :  { %17 = vsyncpa [#allocation3 + $0x1], 0 }
   0xc   :  { %18 = vsyncpa [#allocation6], 0 }
   0xd   :  { %19 = vsyncpa [#allocation9], 0 }
   0xe   :  { %20 = vsyncpa [#allocation4], 0 }
   0xf   :  { %22 = vsyncpa [#allocation4 + $0x1], 0 }
  0x10   :  { %23 = vsyncpa [#allocation15], 0 }
  0x11   :  { %25 = vsyncpa [#allocation15 + $0x1], 0  ;;  %s3030_s30 = smov 0   ;;  %s3032_s10 = smov 0  }
  0x12   :  { %s3034_s11 = smov 0   ;;  %s3036_s12 = smov 0  }
  0x13   :  { %s3038_s13 = smov 0   ;;  %s3040_s14 = smov 0  }
  0x14   :  { %s3042_s15 = smov 0   ;;  %s3044_s16 = smov 0  }
  0x15   :  { %s3046_s17 = smov 0   ;;  %s3048_s18 = smov 0  }
  0x16   :  { %s3050_s19 = smov 0  }
  0x17 LB: > { %4266 = sst [smem:[#allocation23_spill]] %s2934_s11  ;;  %s40_s20 = sadd.s32 1, %s2958_s17  ;;  %s2966_s19 = sphi %s3050_s19, %s31_s19   ;;  %s2962_s18 = sphi %s3048_s18, %s4326_s18   ;;  %s2958_s17 = sphi %s3046_s17, %s4325_s17   ;;  %s2954_s16 = sphi %s3044_s16, %s4324_s16   ;;  %s2950_s15 = sphi %s3042_s15, %s4323_s15   ;;  %s2946_s14 = sphi %s3040_s14, %s4322_s14   ;;  %s2942_s13 = sphi %s3038_s13, %s4330_s13   ;;  %s2938_s12 = sphi %s3036_s12, %s4329_s12   ;;  %s2934_s11 = sphi %s3034_s11, %s4320_s11   ;;  %s2930_s10 = sphi %s3032_s10, %s4328_s10   ;;  %s2926_s30 = sphi %s3030_s30, %s4327_s30  }
  0x18   : > { %4267 = sst [smem:[#allocation24_spill]] %s2938_s12  ;;  %s43_s21 = sadd.s32 1, %s2962_s18 }
  0x19   : > { %4268 = sst [smem:[#allocation25_spill]] %s2946_s14  ;;  %p41_p0 = scmp.ge.s32.totalorder %s40_s20, 2 }
  0x1a   : > { %4269 = sst [smem:[#allocation26_spill]] %s2950_s15  ;;  %s52_s22 = sadd.s32 1, %s2946_s14 }
  0x1b   : > { %4270 = sst [smem:[#allocation27_spill]] %s2954_s16  ;;  %p59_p1 = scmp.ne.s32.totalorder %s2946_s14, %s2942_s13 }
  0x1c   : > { %4271 = sst [smem:[#allocation28_spill]] %s2958_s17  ;;  %p60_p2 = scmp.eq.s32.totalorder %s2966_s19, 0 }
  0x1d   : > { %4272 = sst [smem:[#allocation29_spill]] %s2962_s18  ;;  %s4332_s20 = smov (%p41_p0, %s40_s20), 0 }
  0x1e   : > { %4273 = sst [smem:[#allocation30_spill]] %s4332_s20  ;;  %s4334_s21 = smov (!%p41_p0, %s43_s21), %s2962_s18 }
  0x1f   : > { %s3096_s23 = ssub.s32 %s2958_s17, %s4332_s20  ;;  %p3103_p3 = por %p60_p2, %p59_p1 }
  0x20   : > { %p45_p4 = scmp.ge.s32.totalorder %s4334_s21, 2  ;;  %p139_p5 = scmp.eq.s32.totalorder %s3096_s23, 0 }
  0x21   : > { %p2422_p6 = scmp.lt.s32.totalorder %s2966_s19, 4  ;;  %s352_s25 = sand.u32 1, %s2966_s19  }
  0x22   : > { %s4336_s21 = smov (%p45_p4, %s4334_s21), 0  ;;  %s354_s26 = sand.u32 1, %s2946_s14  }
  0x23   : > { %4275 = sst [smem:[#allocation31_spill]] %s4336_s21  ;;  %s47_s27 = ssub.s32 %s2962_s18, %s4336_s21 }
  0x24   : > { %s49_s28 = sor.u32 %s3096_s23, %s47_s27  ;;  %s2034_s29 = sshll.u32 %s354_s26, 7 }
  0x25   : > { %p50_p7 = scmp.eq.s32.totalorder %s49_s28, 0  ;;  %s2035_s20 = sshll.u32 %s2958_s17, 4 }
  0x26   : > { %s2036_s9 = sshll.u32 %s2962_s18, 5  ;;  %s356_s16 = scalar_lea.vmem [#allocation2], %s2034_s29 }
  0x27   : > { %s3119_s8 = scalar_select %p50_p7, %s2946_s14, %s52_s22  }
  0x28   : > { %s361_s7 = sadd.s32 %s2036_s9, %s2035_s20  ;;  %s366_s15 = sshll.u32 %s356_s16, 4  ;;  %s367_s15 = int_to_ptr.vmem [resolvable:$true] %s366_s15 }
  0x29   : > { %4276 = sst [smem:[#allocation32_spill]] %s3119_s8  ;;  %s2037_s6 = sshll.u32 %s361_s7, 3 }
  0x2a   : > { %s4277_s0 = sld [smem:[#allocation35_spill]]  ;;  %p2397_p8 = pnand %p2422_p6, %p3103_p3 }
  0x2b   : > { %s3128_s21 = scalar_lea.sflag [#allocation3], %s352_s25  ;;  %s4247_s9 = smov 128  }
  0x2c   : > { %s4249_s20 = smov 8   ;;  %s3135_s7 = sshll.u32 %s2958_s17, 7 }
  0x2d   : > { %p148_p9 = scmp.ne.s32.totalorder %s2934_s11, %s2930_s10  ;;  %s378_s24 = sand.u32 1, %s2934_s11  }
  0x2e   : > { %s3148_s25 = sshll.u32 %s378_s24, 7  ;;  %s4279_s4 = sld [smem:[#allocation38_spill]] }
  0x2f   : > { %p150_p10 = por %p148_p9, %p60_p2  ;;  %s380_s23 = scalar_lea.vmem [#allocation10], %s3148_s25 }
  0x30   : > { %s363_s28 = scalar_lea.hbm %s4277_s0, %s2037_s6  ;;  %s141_s6 = sadd.s32 1, %s2934_s11 }
  0x31   : > { %s364_s22 = sshll.u32 %s363_s28, 4  ;;  %s388_s28 = sshll.u32 %s380_s23, 4  ;;  %s365_s22 = int_to_ptr.hbm [resolvable:$true] %s364_s22  ;;  %s389_s28 = int_to_ptr.vmem [resolvable:$true] %s388_s28 }
  0x32   : > { %2399 = dma.hbm_to_vmem [thread:$0]  (!%p2397_p8), %s365_s22, 2048, %s367_s15, %s3128_s21, %s4247_s9, %s4247_s9, %s4249_s20  }
  0x33   : > { %s3143_s16 = scalar_select %p139_p5, %s2934_s11, %s141_s6  }
  0x34   : > { %s385_s27 = scalar_lea.hbm %s4279_s4, %s3135_s7  ;;  %p3157_p11 = pnand %p2422_p6, %p150_p10 }
  0x35   : > { %4278 = sst [smem:[#allocation33_spill]] %s3143_s16  ;;  %s386_s26 = sshll.u32 %s385_s27, 4  ;;  %s387_s26 = int_to_ptr.hbm [resolvable:$true] %s386_s26 }
  0x36   : > { %2402 = dma.hbm_to_vmem [thread:$0]  (!%p3157_p11), %s387_s26, 2048, %s389_s28, %s3128_s21, %s4247_s9, %s4247_s9, %s4249_s20  }
  0x37   : > { %s3168_s6 = sadd.s32 4294967295, %s2966_s19   ;;  %s4246_s24 = sadd.s32 4294967294, %s2966_s19  }
  0x38   : > { %p65_p12 = scmp.ne.s32.totalorder %s2942_s13, %s2938_s12  ;;  %p66_p13 = scmp.eq.s32.totalorder %s3168_s6, 0 }
  0x39   : > { %p154_p0 = scmp.ne.s32.totalorder %s2930_s10, %s2926_s30  ;;  %p232_p2 = scmp.eq.s32.totalorder %s3168_s6, 3 }
  0x3a   : > { %p238_p3 = scmp.eq.s32.totalorder %s4246_s24, 3  ;;  %p3181_p4 = por %p66_p13, %p65_p12 }
  0x3b   : > { %p3187_p5 = por %p154_p0, %p66_p13  ;;  %p3194_p6 = por %p232_p2, %p59_p1 }
  0x3c   : > { %p3198_p7 = por %p238_p3, %p65_p12  ;;  %p2029_p8 = scmp.ge.s32.totalorder %s2966_s19, 1 }
  0x3d   : > { %p301_p9 = scmp.lt.s32.totalorder %s2966_s19, 5  ;;  %s4286_s1 = sld [smem:[#allocation36_spill]] }
  0x3e   : > { %s4284_s30 = scalar_select %p3198_p7, 1, 0 }
  0x3f   : > { %p3207_p10 = pnand %p2029_p8, %p301_p9  ;;  %s2970_s9 = smov [#allocation5]  }
  0x40   : > { %4285 = sst [smem:[#allocation34_spill]] %s4284_s30  ;;  %s315_s20 = sshll.u32 %s2970_s9, 4  ;;  %s316_s20 = int_to_ptr.vmem [resolvable:$true] %s315_s20 }
  0x41   : > { %p2386_p1 = pneg %p3207_p10  ;;  %s4288_s5 = sld [smem:[#allocation39_spill]] }
  0x42   : > { %s4290_s9 = smov 8   ;;  %s4291_s8 = smov 128  }
  0x43   : > { %s313_s28 = sshll.u32 %s4286_s1, 4  ;;  %p3219_p12 = pnand %p2386_p1, %p66_p13  ;;  %s314_s28 = int_to_ptr.hbm [resolvable:$true] %s313_s28 }
  0x44   : > { %s402_s1 = scalar_lea.vmem [#allocation11], %s3148_s25  ;;  %s4292_s2 = sld [smem:[#allocation37_spill]] }
  0x45   : > { %s410_s17 = sshll.u32 %s402_s1, 4  ;;  %s2973_s11 = smov 12   ;;  %s411_s17 = int_to_ptr.vmem [resolvable:$true] %s410_s17 }
  0x46   : > { %2389 = dma.hbm_to_vmem [thread:$0]  (!%p3219_p12), %s314_s28, 16, %s316_s20, [#allocation6]  }
  0x47   : > { %s407_s18 = scalar_lea.hbm %s4288_s5, %s3135_s7  ;;  %s339_s20 = sshll.u32 %s4234_s3, 4  ;;  %s340_s20 = int_to_ptr.hbm [resolvable:$true] %s339_s20 }
  0x48   : > { %s408_s23 = sshll.u32 %s407_s18, 4  ;;  %s2971_s18 = smov [#allocation7]   ;;  %s409_s23 = int_to_ptr.hbm [resolvable:$true] %s408_s23 }
  0x49   : > { %2405 = dma.hbm_to_vmem [thread:$0]  (!%p3157_p11), %s409_s23, 2048, %s411_s17, %s3128_s21, %s4291_s8, %s4291_s8, %s4290_s9  }
  0x4a   : > { %s324_s5 = sshll.u32 %s4292_s2, 4  ;;  %s326_s14 = sshll.u32 %s2971_s18, 4  ;;  %s325_s5 = int_to_ptr.hbm [resolvable:$true] %s324_s5  ;;  %s327_s14 = int_to_ptr.vmem [resolvable:$true] %s326_s14 }
  0x4b   : > { %s2972_s28 = smov 192   ;;  %s2974_s17 = smov [#allocation8]  }
  0x4c   : > { %2392 = dma.hbm_to_vmem [thread:$0]  (!%p3219_p12), %s325_s5, 3072, %s327_s14, [#allocation6], %s2972_s28, %s2972_s28, %s2973_s11  }
  0x4d   : > { %s341_s23 = sshll.u32 %s2974_s17, 4  ;;  %s4293_s2 = sld [smem:[#allocation40_spill]]  ;;  %s342_s23 = int_to_ptr.vmem [resolvable:$true] %s341_s23 }
  0x4e   : > { %2395 = dma.hbm_to_vmem [thread:$0]  (!%p3219_p12), %s340_s20, 48, %s342_s23, [#allocation9]  }
  0x4f   : > { %s424_s12 = scalar_lea.vmem [#allocation12], %s3148_s25  ;;  %s3257_s5 = sand.u32 (!%p3207_p10), 1, %s2942_s13  }
  0x50   : > { %s432_s16 = sshll.u32 %s424_s12, 4  ;;  %s2048_s11 = sshll.u32 (!%p3207_p10), %s3257_s5, 7  ;;  %s433_s16 = int_to_ptr.vmem [resolvable:$true] %s432_s16 }
  0x51   : > { %444 = sbr.rel (%p3207_p10) target bundleno = 684 (0x2ac), region = 48  ;;  %s3262_s14 = scalar_lea.vmem (!%p3207_p10), [#allocation2], %s2048_s11 }
  0x53   : > { %s429_s30 = scalar_lea.hbm %s4293_s2, %s3135_s7  ;;  %s446_s2 = sand.u32 (!%p3207_p10), 1, %s3168_s6  }
  0x54   : > { %s430_s18 = sshll.u32 %s429_s30, 4  ;;  %s447_s12 = scalar_lea.sflag (!%p3207_p10), [#allocation3], %s446_s2  ;;  %s431_s18 = int_to_ptr.hbm [resolvable:$true] %s430_s18 }
  0x55   : > { %2408 = dma.hbm_to_vmem [thread:$0]  (!%p3157_p11), %s431_s18, 2048, %s433_s16, %s3128_s21, %s4291_s8, %s4291_s8, %s4290_s9  }
  0x56   : > { %2901 = dma.done.wait (%p3181_p4), %s447_s12, 2048  }
  0x57   : > { %2903 = vsyncadd (%p3181_p4), %s447_s12, 4294965248 }
  0x58   : > { %2905 = dma.done.wait (%p66_p13), [#allocation6], 3088  }
  0x59   : > { %2907 = vsyncadd (%p66_p13), [#allocation6], 4294964208 }
  0x5a   : > { %2909 = dma.done.wait (%p66_p13), [#allocation9], 48  }
  0x5b   : > { %2911 = vsyncadd (%p66_p13), [#allocation9], 4294967248  ;;  %s473_s8 = sand.u32 1, %s2930_s10  }
  0x5c   : > { %s3277_s21 = sshll.u32 %s473_s8, 7 }
  0x5d   : > { %s3280_s7 = scalar_lea.vmem [#allocation10], %s3277_s21 }
  0x5e   : > { %2913 = dma.done.wait (%p3187_p5), %s447_s12, 6144  }
  0x5f   : > { %2915 = vsyncadd (%p3187_p5), %s447_s12, 4294961152  ;;  %v3287_v0 = vld [vmem:[%s3262_s14 + $0x60] sm:$0xff]  ;;  %v3293_v2 = vld [vmem:[%s3262_s14 + $0x10] sm:$0xff]  ;;  %v2975_v28 = vmov 128.0   ;;  %s2976_s25 = smov 16   ;;  %s2977_s22 = smov 112  }
  0x60   : > { %v3290_v1 = vld [vmem:[%s3262_s14] sm:$0xff]  ;;  %v591_v3 = vmul.f32 %v3287_v0, %v3287_v0  ;;  %v581_v5 = vmul.f32 %v3293_v2, %v3293_v2  ;;  %v3302_v6 = vld [vmem:[%s3262_s14 + $0x68] sm:$0xff]  ;;  %v3308_v8 = vld [vmem:[%s3262_s14 + $0x18] sm:$0xff]  ;;  %2528 = vrcp.f32 %v2975_v28  ;;  %s3695_s24 = sshll.u32 %s3257_s5, 6  ;;  %s3875_s29 = scalar_lea.vmem [#allocation11], %s3277_s21 }
  0x61   : > { %v579_v4 = vmul.f32 %v3290_v1, %v3290_v1  ;;  %v3305_v7 = vld [vmem:[%s3262_s14 + $0x8] sm:$0xff]  ;;  %v592_v9 = vmul.f32 %v3302_v6, %v3302_v6  ;;  %v582_v11 = vmul.f32 %v3308_v8, %v3308_v8  ;;  %v3317_v12 = vld [vmem:[%s3262_s14 + $0x20] sm:$0xff]  ;;  %v3320_v13 = vld [vmem:[%s3262_s14 + $0x70] sm:$0xff]  ;;  %s3707_s15 = scalar_lea.vmem [#allocation16], %s3695_s24  ;;  %s3889_s30 = scalar_lea.vmem [#allocation12], %s3277_s21 }
  0x62   : > { %619 = vadd.xlane.f32.xlu2 %v591_v3  ;;  %599 = vadd.xlane.f32.xlu1 %v581_v5  ;;  %v580_v10 = vmul.f32 %v3305_v7, %v3305_v7  ;;  %v3323_v14 = vld [vmem:[%s3262_s14 + $0x28] sm:$0xff]  ;;  %v583_v15 = vmul.f32 %v3317_v12, %v3317_v12  ;;  %v593_v16 = vmul.f32 %v3320_v13, %v3320_v13  ;;  %v3332_v18 = vld [vmem:[%s3262_s14 + $0x78] sm:$0xff]  ;;  %v3338_v20 = vld [vmem:[%s3262_s14 + $0x30] sm:$0xff]  ;;  %s3912_s26 = scalar_lea.vmem [#allocation13], %s3695_s24  ;;  %s3956_s9 = scalar_lea.vmem [#allocation14], %s3695_s24 }
  0x63   : > { %595 = vadd.xlane.f32.xlu0 %v579_v4  ;;  %v584_v17 = vmul.f32 %v3323_v14, %v3323_v14  ;;  %v3335_v19 = vld [vmem:[%s3262_s14 + $0x38] sm:$0xff]  ;;  %v594_v21 = vmul.f32 %v3332_v18, %v3332_v18  ;;  %v585_v23 = vmul.f32 %v3338_v20, %v3338_v20  ;;  %v3347_v24 = vld [vmem:[%s3262_s14 + $0x40] sm:$0xff]  ;;  %v3350_v25 = vld [vmem:[%s3262_s14 + $0x48] sm:$0xff]  ;;  %s4308_s1 = sld [smem:[#allocation26_spill]]  ;;  %s1738_s12 = sshll.u32 %s3912_s26, 4  ;;  %s4106_s12 = int_to_ptr.vmem [resolvable:$true] %s1738_s12 }
  0x64   : > { %v586_v22 = vmul.f32 %v3335_v19, %v3335_v19  ;;  %v587_v26 = vmul.f32 %v3347_v24, %v3347_v24  ;;  %v588_v27 = vmul.f32 %v3350_v25, %v3350_v25  ;;  %v2144_v29 = vld [vmem:[#allocation7 + $0xa8] sm:$0xf]  ;;  %v2193_v30 = vld [vmem:[#allocation7 + $0xb0] sm:$0xf0]  ;;  %v2192_v31 = vld [vmem:[#allocation7 + $0xac] sm:$0xf] }
  0x65   : > { %v2145_v32 = vor.u32 %v2193_v30, %v2144_v29  ;;  %v2146_v33 = vld [vmem:[#allocation7 + $0xb4] sm:$0xf0]  ;;  %v2152_v34 = vld [vmem:[#allocation7 + $0xb0] sm:$0xf]  ;;  %v2194_v35 = vld [vmem:[#allocation7 + $0xb8] sm:$0xf0] }
  0x66   : > { %v3356_v36 = vor.u32 %v2192_v31, %v2146_v33  ;;  %v3358_v37 = vor.u32 %v2194_v35, %v2152_v34  ;;  %v3361_v38 = vld [vmem:[%s3262_s14 + $0x50] sm:$0xff]  ;;  %v3364_v39 = vld [vmem:[%s3262_s14 + $0x58] sm:$0xff]  ;;  %v3372_v42 = vpop.eup %2528  ;;  %v2134_v47 = vld [vmem:[#allocation7 + $0x9c] sm:$0xf0]  ;;  %s4309_s20 = sld [smem:[#allocation27_spill]]  ;;  %s1714_s21 = scalar_lea.sflag [#allocation4], %s3257_s5 }
  0x67   : > { %1038 = vmatpush.bf16.msra.mxu0 %v2145_v32  ;;  %2336 = vmatpush.bf16.msra.mxu3 %v2145_v32  ;;  %v589_v40 = vmul.f32 %v3361_v38, %v3361_v38  ;;  %v590_v41 = vmul.f32 %v3364_v39, %v3364_v39  ;;  %v2132_v43 = vld [vmem:[#allocation7 + $0x90] sm:$0xf]  ;;  %v2190_v44 = vld [vmem:[#allocation7 + $0x98] sm:$0xf0]  ;;  %v2189_v45 = vld [vmem:[#allocation7 + $0x94] sm:$0xf]  ;;  %vm632_vm0 = vweird.f32 %v3372_v42 }
  0x68   : > { %1087 = vmatpush.bf16.msra.mxu1 %v3356_v36  ;;  %1136 = vmatpush.bf16.msra.mxu2 %v3358_v37  ;;  %v2133_v46 = vor.u32 %v2190_v44, %v2132_v43  ;;  %v2140_v48 = vld [vmem:[#allocation7 + $0x98] sm:$0xf]  ;;  %v2191_v49 = vld [vmem:[#allocation7 + $0xa0] sm:$0xf0]  ;;  %v3374_v50 = vor.u32 %v2189_v45, %v2134_v47  ;;  %v628_v52 = vmul.f32 128.0, %v3372_v42  ;;  %s4310_s16 = sld [smem:[#allocation41_spill]] }
  0x69   : > { %v3376_v51 = vor.u32 %v2191_v49, %v2140_v48  ;;  %v2120_v53 = vld [vmem:[#allocation7 + $0x78] sm:$0xf]  ;;  %v2187_v54 = vld [vmem:[#allocation7 + $0x80] sm:$0xf0]  ;;  %v2186_v55 = vld [vmem:[#allocation7 + $0x7c] sm:$0xf] }
  0x6a   : > { %621 = vadd.xlane.f32.xlu2 %v592_v9  ;;  %601 = vadd.xlane.f32.xlu1 %v582_v11  ;;  %v2121_v56 = vor.u32 %v2187_v54, %v2120_v53  ;;  %v2122_v57 = vld [vmem:[#allocation7 + $0x84] sm:$0xf0]  ;;  %v2128_v58 = vld [vmem:[#allocation7 + $0x80] sm:$0xf]  ;;  %v2188_v59 = vld [vmem:[#allocation7 + $0x88] sm:$0xf0] }
  0x6b   : > { %597 = vadd.xlane.f32.xlu0 %v580_v10  ;;  %1039 = vmatpush.bf16.msra.mxu0 %v2133_v46  ;;  %v3381_v60 = vor.u32 %v2186_v55, %v2122_v57  ;;  %v3383_v61 = vor.u32 %v2188_v59, %v2128_v58  ;;  %v629_v62 = vsub.f32 1.0, %v628_v52  ;;  %v2108_v63 = vld [vmem:[#allocation7 + $0x60] sm:$0xf]  ;;  %v2184_v3 = vld [vmem:[#allocation7 + $0x68] sm:$0xf0]  ;;  %s2157_s28 = sshll.u32 %s4308_s1, 4 }
  0x6c   : > { %2337 = vmatpush.bf16.msra.mxu3 %v2133_v46  ;;  %1088 = vmatpush.bf16.msra.mxu1 %v3374_v50  ;;  %v2183_v4 = vld [vmem:[#allocation7 + $0x64] sm:$0xf]  ;;  %v2109_v5 = vor.u32 %v2184_v3, %v2108_v63  ;;  %v2110_v9 = vld [vmem:[#allocation7 + $0x6c] sm:$0xf0]  ;;  %v2116_v10 = vld [vmem:[#allocation7 + $0x68] sm:$0xf] }
  0x6d   : > { %1137 = vmatpush.bf16.msra.mxu2 %v3376_v51  ;;  %v2185_v11 = vld [vmem:[#allocation7 + $0x70] sm:$0xf0]  ;;  %v2104_v28 = vld [vmem:[#allocation7 + $0x50] sm:$0xf]  ;;  %v2182_v29 = vld [vmem:[#allocation7 + $0x58] sm:$0xf0] }
  0x6e   : > { %v3396_v31 = vor.u32 %v2182_v29, %v2104_v28  ;;  %v2084_v32 = vld [vmem:[#allocation7 + $0x30] sm:$0xf]  ;;  %v2178_v33 = vld [vmem:[#allocation7 + $0x38] sm:$0xf0]  ;;  %v2177_v34 = vld [vmem:[#allocation7 + $0x34] sm:$0xf]  ;;  %s4311_s8 = smov %s4310_s16 }
  0x6f   : > { %1040 = vmatpush.bf16.msra.mxu0 %v2121_v56  ;;  %v2092_v43 = vld [vmem:[#allocation7 + $0x38] sm:$0xf]  ;;  %v2179_v44 = vld [vmem:[#allocation7 + $0x40] sm:$0xf0]  ;;  %v2174_v49 = vld [vmem:[#allocation7 + $0x1c] sm:$0xf] }
  0x70   : > { %2338 = vmatpush.bf16.msra.mxu3 %v2121_v56  ;;  %1089 = vmatpush.bf16.msra.mxu1 %v3381_v60  ;;  %v3404_v46 = vor.u32 %v2179_v44, %v2092_v43  ;;  %v2072_v47 = vld [vmem:[#allocation7 + $0x18] sm:$0xf]  ;;  %v2175_v48 = vld [vmem:[#allocation7 + $0x20] sm:$0xf0]  ;;  %v2074_v54 = vld [vmem:[#allocation7 + $0x24] sm:$0xf0] }
  0x71   : > { %1138 = vmatpush.bf16.msra.mxu2 %v3383_v61  ;;  %v2073_v53 = vor.u32 %v2175_v48, %v2072_v47  ;;  %v2080_v55 = vld [vmem:[#allocation7 + $0x20] sm:$0xf]  ;;  %v2176_v56 = vld [vmem:[#allocation7 + $0x28] sm:$0xf0]  ;;  %v3411_v57 = vor.u32 %v2174_v49, %v2074_v54  ;;  %s2158_s17 = sshll.u32 %s4309_s20, 5 }
  0x72   : > { %623 = vadd.xlane.f32.xlu2 %v593_v16  ;;  %605 = vadd.xlane.f32.xlu1 %v584_v17  ;;  %v3389_v16 = vor.u32 %v2185_v11, %v2116_v10  ;;  %v2096_v17 = vld [vmem:[#allocation7 + $0x48] sm:$0xf]  ;;  %v3413_v58 = vor.u32 %v2176_v56, %v2080_v55  ;;  %v2062_v11 = vld [vmem:[#allocation7 + $0xc] sm:$0xf0]  ;;  %s1735_s23 = sadd.s32 %s2158_s17, %s2157_s28 }
  0x73   : > { %603 = vadd.xlane.f32.xlu0 %v583_v15  ;;  %v3387_v15 = vor.u32 %v2183_v4, %v2110_v9  ;;  %1041 = vmatpush.bf16.msra.mxu0 %v2109_v5  ;;  %v2171_v9 = vld [vmem:[#allocation7 + $0x4] sm:$0xf]  ;;  %s4093_s0 = sshll.u32 %s1735_s23, 2 }
  0x74   : > { %2339 = vmatpush.bf16.msra.mxu3 %v2109_v5  ;;  %v2172_v5 = vld [vmem:[#allocation7 + $0x8] sm:$0xf0]  ;;  %s1737_s11 = scalar_lea.hbm %s4310_s16, %s4093_s0 }
  0x75   : > { %1090 = vmatpush.bf16.msra.mxu1 %v3387_v15  ;;  %1139 = vmatpush.bf16.msra.mxu2 %v3389_v16  ;;  %s4104_s14 = sshll.u32 %s1737_s11, 4  ;;  %s1741_s14 = int_to_ptr.hbm [resolvable:$true] %s4104_s14 }
  0x79   : > { %1140 = vmatpush.bf16.msra.mxu2 %v3396_v31 }
  0x7a   : > { %609 = vadd.xlane.f32.xlu2 %v586_v22  ;;  %607 = vadd.xlane.f32.xlu1 %v585_v23  ;;  %v2180_v22 = vld [vmem:[#allocation7 + $0x4c] sm:$0xf]  ;;  %v630_v23 = vmul.f32 %v3372_v42, %v629_v62 }
  0x7b   : > { %625 = vadd.xlane.f32.xlu0 %v594_v21  ;;  %v2181_v21 = vld [vmem:[#allocation7 + $0x50] sm:$0xf0] }
  0x7c   : > { %v631_v35 = vadd.f32 %v3372_v42, %v630_v23 }
  0x7d   : > { %1141 = vmatpush.bf16.msra.mxu2 %v3404_v46 }
  0x7e   : > { %v3409_v52 = vsel %vm632_vm0, %v3372_v42, %v631_v35  ;;  %v2060_v42 = vld [vmem:[#allocation7] sm:$0xf] }
  0x7f   : > { %v2061_v10 = vor.u32 %v2172_v5, %v2060_v42 }
  0x81   : > { %1142 = vmatpush.bf16.msra.mxu2 %v3413_v58 }
  0x82   : > { %613 = vadd.xlane.f32.xlu1 %v588_v27  ;;  %615 = vadd.xlane.f32.xlu2 %v589_v40  ;;  %v2098_v27 = vld [vmem:[#allocation7 + $0x54] sm:$0xf0]  ;;  %v2085_v40 = vor.u32 %v2178_v33, %v2084_v32 }
  0x83   : > { %611 = vadd.xlane.f32.xlu0 %v587_v26  ;;  %v2097_v26 = vor.u32 %v2181_v21, %v2096_v17  ;;  %v3394_v30 = vor.u32 %v2180_v22, %v2098_v27  ;;  %v2068_v17 = vld [vmem:[#allocation7 + $0x8] sm:$0xf]  ;;  %v2173_v21 = vld [vmem:[#allocation7 + $0x10] sm:$0xf0] }
  0x84   : > { %v3425_v27 = vor.u32 %v2173_v21, %v2068_v17 }
  0x85   : > { %1042 = vmatpush.bf16.msra.mxu0 %v2097_v26  ;;  %2340 = vmatpush.bf16.msra.mxu3 %v2097_v26  ;;  %v3423_v26 = vor.u32 %v2171_v9, %v2062_v11 }
  0x86   : > { %1091 = vmatpush.bf16.msra.mxu1 %v3394_v30  ;;  %1143 = vmatpush.bf16.msra.mxu2 %v3425_v27 }
  0x89   : > { %1043 = vmatpush.bf16.msra.mxu0 %v2085_v40  ;;  %2341 = vmatpush.bf16.msra.mxu3 %v2085_v40 }
  0x8b   : > { %617 = vadd.xlane.f32.xlu0 %v590_v41  ;;  %v2086_v41 = vld [vmem:[#allocation7 + $0x3c] sm:$0xf0] }
  0x8c   : > { %v3402_v45 = vor.u32 %v2177_v34, %v2086_v41 }
  0x8d   : > { %1044 = vmatpush.bf16.msra.mxu0 %v2073_v53  ;;  %2342 = vmatpush.bf16.msra.mxu3 %v2073_v53 }
  0x8e   : > { %1092 = vmatpush.bf16.msra.mxu1 %v3402_v45 }
  0x91   : > { %1045 = vmatpush.bf16.msra.mxu0 %v2061_v10  ;;  %2343 = vmatpush.bf16.msra.mxu3 %v2061_v10 }
  0x92   : > { %1093 = vmatpush.bf16.msra.mxu1 %v3411_v57 }
  0x95   : > { %2344 = vmatpush.bf16.msrb.mxu3 %v3356_v36 }
  0x96   : > { %1094 = vmatpush.bf16.msra.mxu1 %v3423_v26 }
  0x99   : > { %2345 = vmatpush.bf16.msrb.mxu3 %v3374_v50 }
  0x9d   : > { %2346 = vmatpush.bf16.msrb.mxu3 %v3381_v60 }
  0xa1   : > { %2347 = vmatpush.bf16.msrb.mxu3 %v3387_v15 }
  0xa5   : > { %2348 = vmatpush.bf16.msrb.mxu3 %v3394_v30 }
  0xa9   : > { %2349 = vmatpush.bf16.msrb.mxu3 %v3402_v45 }
  0xad   : > { %2350 = vmatpush.bf16.msrb.mxu3 %v3411_v57 }
  0xb1   : > { %2351 = vmatpush.bf16.msrb.mxu3 %v3423_v26 }
  0xd5   : > { %v620_v59 = vpop.xlane.xlu2 %619  ;;  %v600_v4 = vpop.xlane.xlu1 %599 }
  0xd6   : > { %v596_v62 = vpop.xlane.xlu0 %595  ;;  %v646_v63 = vmul.f32 %v3409_v52, %v620_v59  ;;  %v636_v28 = vmul.f32 %v3409_v52, %v600_v4 }
  0xd7   : > { %v634_v3 = vmul.f32 %v3409_v52, %v596_v62 }
  0xd8   : > { %v3419_v22 = vadd.f32 1e-08, %v646_v63  ;;  %v3433_v29 = vadd.f32 1e-08, %v636_v28 }
  0xd9   : > { %v3421_v23 = vadd.f32 1e-08, %v634_v3 }
  0xda   : > { %2530 = vrsqrt.f32 %v3419_v22  ;;  %vm792_vm1 = vweird.f32 %v3419_v22  ;;  %vm692_vm13 = vweird.f32 %v3433_v29 }
  0xdb   : > { %2532 = vrsqrt.f32 %v3421_v23  ;;  %vm672_vm3 = vweird.f32 %v3421_v23 }
  0xdc   : > { %2534 = vrsqrt.f32 %v3433_v29 }
  0xdd   : > { %v622_v32 = vpop.xlane.xlu2 %621  ;;  %v602_v40 = vpop.xlane.xlu1 %601 }
  0xde   : > { %v598_v33 = vpop.xlane.xlu0 %597  ;;  %v647_v34 = vmul.f32 %v3409_v52, %v622_v32  ;;  %v637_v41 = vmul.f32 %v3409_v52, %v602_v40 }
  0xdf   : > { %v635_v35 = vmul.f32 %v3409_v52, %v598_v33 }
  0xe0   : > { %v3439_v43 = vpop.eup %2530  ;;  %v3441_v44 = vadd.f32 1e-08, %v647_v34  ;;  %v3450_v49 = vadd.f32 1e-08, %v637_v41 }
  0xe1   : > { %v3443_v47 = vadd.f32 1e-08, %v635_v35  ;;  %v3445_v36 = vpop.eup %2532  ;;  %v787_v48 = vmul.f32 %v3439_v43, %v3419_v22  ;;  %vm793_vm2 = vweird.f32 %v3439_v43 }
  0xe2   : > { %v667_v53 = vmul.f32 %v3445_v36, %v3421_v23  ;;  %2536 = vrsqrt.f32 %v3441_v44  ;;  %v3461_v4 = vpop.eup %2534  ;;  %vm673_vm4 = vweird.f32 %v3445_v36  ;;  %vm802_vm5 = vweird.f32 %v3441_v44  ;;  %vm3490_vm6 = vmor %vm792_vm1, %vm793_vm2 }
  0xe3   : > { %v788_v50 = vmul.f32 %v3439_v43, %v787_v48  ;;  %2538 = vrsqrt.f32 %v3443_v47  ;;  %v687_v28 = vmul.f32 %v3461_v4, %v3433_v29  ;;  %vm3506_vm8 = vmor %vm672_vm3, %vm673_vm4  ;;  %vm682_vm10 = vweird.f32 %v3443_v47 }
  0xe4   : > { %v668_v54 = vmul.f32 %v3445_v36, %v667_v53  ;;  %2540 = vrsqrt.f32 %v3450_v49  ;;  %vm693_vm14 = vweird.f32 %v3461_v4  ;;  %vm702_vm15 = vweird.f32 %v3450_v49 }
  0xe5   : > { %v789_v55 = vmul.f32 0.5, %v788_v50  ;;  %v624_v59 = vpop.xlane.xlu2 %623  ;;  %v606_v63 = vpop.xlane.xlu1 %605  ;;  %v688_v30 = vmul.f32 %v3461_v4, %v687_v28  ;;  %vm3551_vm3 = vmor %vm692_vm13, %vm693_vm14 }
  0xe6   : > { %v604_v56 = vpop.xlane.xlu0 %603  ;;  %v669_v62 = vmul.f32 0.5, %v668_v54  ;;  %v648_v3 = vmul.f32 %v3409_v52, %v624_v59  ;;  %v639_v17 = vmul.f32 %v3409_v52, %v606_v63 }
  0xe7   : > { %v790_v42 = vsub.f32 1.5, %v789_v55  ;;  %v638_v9 = vmul.f32 %v3409_v52, %v604_v56  ;;  %v689_v45 = vmul.f32 0.5, %v688_v30 }
  0xe8   : > { %v2537_v5 = vpop.eup %2536  ;;  %v670_v10 = vsub.f32 1.5, %v669_v62  ;;  %v3473_v33 = vadd.f32 1e-08, %v648_v3  ;;  %v3486_v50 = vadd.f32 1e-08, %v639_v17 }
  0xe9   : > { %v2539_v60 = vpop.eup %2538  ;;  %v797_v11 = vmul.f32 %v2537_v5, %v3441_v44  ;;  %v791_v15 = vmul.f32 %v3439_v43, %v790_v42  ;;  %v3482_v41 = vadd.f32 1e-08, %v638_v9  ;;  %vm803_vm7 = vweird.f32 %v2537_v5 }
  0xea   : > { %v3467_v21 = vpop.eup %2540  ;;  %v677_v32 = vmul.f32 %v2539_v60, %v3443_v47  ;;  %v671_v48 = vmul.f32 %v3445_v36, %v670_v10  ;;  %2542 = vrsqrt.f32 %v3473_v33  ;;  %vm683_vm9 = vweird.f32 %v2539_v60  ;;  %vm804_vm11 = vmor %vm802_vm5, %vm803_vm7 }
  0xeb   : > { %v798_v34 = vmul.f32 %v2537_v5, %v797_v11  ;;  %v697_v35 = vmul.f32 %v3467_v21, %v3450_v49  ;;  %v795_v62 = vsel %vm3490_vm6, %v3439_v43, %v791_v15  ;;  %2544 = vrsqrt.f32 %v3482_v41  ;;  %v3521_v11 = vld [vmem:[#allocation5] ss:$0 sm:$0xff]  ;;  %vm684_vm12 = vmor %vm682_vm10, %vm683_vm9 }
  0xec   : > { %v678_v40 = vmul.f32 %v2539_v60, %v677_v32  ;;  %v675_v43 = vsel %vm3506_vm8, %v3445_v36, %v671_v48  ;;  %2546 = vrsqrt.f32 %v3486_v50  ;;  %v838_v17 = vmul.f32 %v795_v62, %v3287_v0 }
  0xed   : > { %v799_v53 = vmul.f32 0.5, %v798_v34  ;;  %v698_v3 = vmul.f32 %v3467_v21, %v697_v35  ;;  %v826_v15 = vmul.f32 %v675_v43, %v3290_v1  ;;  %vm703_vm0 = vweird.f32 %v3467_v21  ;;  %v610_v49 = vpop.xlane.xlu2 %609 }
  0xee   : > { %v626_v54 = vpop.xlane.xlu0 %625  ;;  %v679_v56 = vmul.f32 0.5, %v678_v40  ;;  %v690_v40 = vsub.f32 1.5, %v689_v45  ;;  %vm812_vm1 = vweird.f32 %v3473_v33  ;;  %vm3561_vm4 = vmor %vm702_vm15, %vm703_vm0  ;;  %v608_v45 = vpop.xlane.xlu1 %607  ;;  %vm712_vm9 = vweird.f32 %v3482_v41 }
  0xef   : > { %v649_v59 = vmul.f32 %v3409_v52, %v626_v54  ;;  %v800_v63 = vsub.f32 1.5, %v799_v53  ;;  %v699_v32 = vmul.f32 0.5, %v698_v3  ;;  %v846_v53 = vmul.f32 %v3521_v11, %v826_v15 }
  0xf0   : > { %v680_v42 = vsub.f32 1.5, %v679_v56  ;;  %v2543_v36 = vpop.eup %2542  ;;  %v691_v56 = vmul.f32 %v3461_v4, %v690_v40 }
  0xf1   : > { %v3511_v9 = vadd.f32 1e-08, %v649_v59  ;;  %v801_v10 = vmul.f32 %v2537_v5, %v800_v63  ;;  %v807_v44 = vmul.f32 %v2543_v36, %v3473_v33  ;;  %v3529_v35 = vpop.eup %2544  ;;  %v700_v1 = vsub.f32 1.5, %v699_v32 }
  0xf2   : > { %v681_v23 = vmul.f32 %v2539_v60, %v680_v42  ;;  %v3534_v57 = vpop.eup %2546  ;;  %vm813_vm2 = vweird.f32 %v2543_v36  ;;  %v707_v59 = vmul.f32 %v3529_v35, %v3482_v41  ;;  %vm713_vm10 = vweird.f32 %v3529_v35 }
  0xf3   : > { %2548 = vrsqrt.f32 %v3511_v9  ;;  %v805_v28 = vsel %vm804_vm11, %v2537_v5, %v801_v10  ;;  %v858_v5 = vmul.f32 %v3521_v11, %v838_v17  ;;  %v701_v33 = vmul.f32 %v3467_v21, %v700_v1  ;;  %vm3568_vm5 = vmor %vm812_vm1, %vm813_vm2 }
  0xf4   : > { %v685_v47 = vsel %vm684_vm12, %v2539_v60, %v681_v23  ;;  %v839_v34 = vmul.f32 %v805_v28, %v3302_v6  ;;  %v808_v6 = vmul.f32 %v2543_v36, %v807_v44  ;;  %v717_v29 = vmul.f32 %v3534_v57, %v3486_v50  ;;  %vm3615_vm13 = vmor %vm712_vm9, %vm713_vm10 }
  0xf5   : > { %v827_v0 = vmul.f32 %v685_v47, %v3305_v7  ;;  %vm822_vm6 = vweird.f32 %v3511_v9  ;;  %v695_v23 = vsel %vm3551_vm3, %v3461_v4, %v691_v56  ;;  %v641_v17 = vmul.f32 %v3409_v52, %v610_v49 }
  0xf6   : > { %v859_v48 = vmul.f32 %v3521_v11, %v839_v34  ;;  %v809_v55 = vmul.f32 0.5, %v808_v6  ;;  %v640_v28 = vmul.f32 %v3409_v52, %v608_v45  ;;  %v705_v32 = vsel %vm3561_vm4, %v3467_v21, %v701_v33  ;;  %v612_v56 = vpop.xlane.xlu0 %611 }
  0xf7   : > { %v847_v7 = vmul.f32 %v3521_v11, %v827_v0  ;;  %v3587_v34 = vadd.f32 1e-08, %v641_v17  ;;  %v828_v0 = vmul.f32 %v695_v23, %v3293_v2  ;;  %v829_v21 = vmul.f32 %v705_v32, %v3308_v8 }
  0xf8   : > { %v3542_v54 = vpack.c.bf16 %v859_v48, %v858_v5  ;;  %v810_v3 = vsub.f32 1.5, %v809_v55  ;;  %v3589_v44 = vadd.f32 1e-08, %v640_v28  ;;  %vm722_vm11 = vweird.f32 %v3486_v50 }
  0xf9   : > { %v2549_v60 = vpop.eup %2548  ;;  %v862_v62 = vpack.c.bf16 %v847_v7, %v846_v53  ;;  %2550 = vrsqrt.f32 %v3587_v34  ;;  %v848_v1 = vmul.f32 %v3521_v11, %v828_v0  ;;  %v849_v6 = vmul.f32 %v3521_v11, %v829_v21 }
  0xfa   : > { %v817_v30 = vmul.f32 %v2549_v60, %v3511_v9  ;;  %1076 = vmatmul.bf16.vlgmr.msra.gmra.mxu3 %v3542_v54  ;;  %v811_v43 = vmul.f32 %v2543_v36, %v810_v3  ;;  %vm823_vm7 = vweird.f32 %v2549_v60  ;;  %v718_v9 = vmul.f32 %v3534_v57, %v717_v29 }
  0xfb   : > { %2352 = vmatpush.bf16.msra.mxu3 %v3358_v37  ;;  %1046 = vmatmul.bf16.vlgmr.msra.gmra.mxu0 %v862_v62  ;;  %v708_v37 = vmul.f32 %v3529_v35, %v707_v59  ;;  %vm824_vm8 = vmor %vm822_vm6, %vm823_vm7  ;;  %2552 = vrsqrt.f32 %v3589_v44  ;;  %vm723_vm12 = vweird.f32 %v3534_v57  ;;  %v863_v55 = vpack.c.bf16 %v849_v6, %v848_v1 }
  0xfc   : > { %v818_v22 = vmul.f32 %v2549_v60, %v817_v30  ;;  %1095 = vmatmul.bf16.vlgmr.msra.gmra.mxu1 %v862_v62  ;;  %1144 = vmatmul.bf16.vlgmr.msra.gmra.mxu2 %v862_v62  ;;  %v815_v47 = vsel %vm3568_vm5, %v2543_v36, %v811_v43  ;;  %v719_v48 = vmul.f32 0.5, %v718_v9  ;;  %v614_v30 = vpop.xlane.xlu1 %613  ;;  %v642_v62 = vmul.f32 %v3409_v52, %v612_v56  ;;  %vm3623_vm14 = vmor %vm722_vm11, %vm723_vm12 }
  0xfd   : > { %v840_v4 = vmul.f32 %v815_v47, %v3320_v13  ;;  %v709_v5 = vmul.f32 0.5, %v708_v37  ;;  %v643_v59 = vmul.f32 %v3409_v52, %v614_v30  ;;  %vm742_vm15 = vweird.f32 %v3587_v34 }
  0xfe   : > { %v819_v10 = vmul.f32 0.5, %v818_v22  ;;  %v720_v53 = vsub.f32 1.5, %v719_v48  ;;  %v658_v22 = vadd.f32 1e-08, %v642_v62  ;;  %vm732_vm1 = vweird.f32 %v3589_v44 }
  0xff   : > { %2353 = vmatpush.bf16.msra.mxu3 %v3376_v51  ;;  %v860_v51 = vmul.f32 %v3521_v11, %v840_v4  ;;  %v710_v8 = vsub.f32 1.5, %v709_v5  ;;  %v3602_v7 = vpop.eup %2550  ;;  %v659_v3 = vadd.f32 1e-08, %v643_v59 }
 0x100   : > { %v820_v15 = vsub.f32 1.5, %v819_v10  ;;  %v721_v50 = vmul.f32 %v3534_v57, %v720_v53  ;;  %vm743_vm0 = vweird.f32 %v3602_v7  ;;  %vm752_vm7 = vweird.f32 %v658_v22 }
 0x101   : > { %v711_v41 = vmul.f32 %v3529_v35, %v710_v8  ;;  %2554 = vrsqrt.f32 %v659_v3  ;;  %vm744_vm3 = vmor %vm742_vm15, %vm743_vm0  ;;  %vm762_vm5 = vweird.f32 %v659_v3  ;;  %v618_v8 = vpop.xlane.xlu0 %617 }
 0x102   : > { %v821_v40 = vmul.f32 %v2549_v60, %v820_v15  ;;  %v725_v42 = vsel %vm3623_vm14, %v3534_v57, %v721_v50  ;;  %2556 = vrsqrt.f32 %v658_v22 }
 0x103   : > { %2354 = vmatpush.bf16.msra.mxu3 %v3383_v61  ;;  %v831_v45 = vmul.f32 %v725_v42, %v3323_v14 }
 0x104   : > { %v825_v36 = vsel %vm824_vm8, %v2549_v60, %v821_v40  ;;  %v737_v60 = vmul.f32 %v3602_v7, %v3587_v34 }
 0x105   : > { %v841_v13 = vmul.f32 %v825_v36, %v3332_v18  ;;  %v2553_v18 = vpop.eup %2552  ;;  %v851_v57 = vmul.f32 %v3521_v11, %v831_v45 }
 0x106   : > { %v738_v63 = vmul.f32 %v3602_v7, %v737_v60  ;;  %vm733_vm2 = vweird.f32 %v2553_v18 }
 0x107   : > { %v861_v2 = vmul.f32 %v3521_v11, %v841_v13  ;;  %2355 = vmatpush.bf16.msra.mxu3 %v3389_v16  ;;  %v727_v16 = vmul.f32 %v2553_v18, %v3589_v44  ;;  %v2555_v23 = vpop.eup %2554  ;;  %vm734_vm4 = vmor %vm732_vm1, %vm733_vm2 }
 0x108   : > { %v739_v43 = vmul.f32 0.5, %v738_v63  ;;  %vm763_vm6 = vweird.f32 %v2555_v23 }
 0x109   : > { %v3606_v61 = vpack.c.bf16 %v861_v2, %v860_v51  ;;  %v728_v29 = vmul.f32 %v2553_v18, %v727_v16  ;;  %vm764_vm9 = vmor %vm762_vm5, %vm763_vm6  ;;  %v616_v2 = vpop.xlane.xlu2 %615 }
 0x10a   : > { %v740_v37 = vsub.f32 1.5, %v739_v43  ;;  %v644_v53 = vmul.f32 %v3409_v52, %v616_v2 }
 0x10b   : > { %1081 = vmatmul.bf16.gmra.mxu3 %v3606_v61  ;;  %1051 = vmatmul.bf16.gmra.mxu0 %v863_v55  ;;  %v729_v10 = vmul.f32 0.5, %v728_v29 }
 0x10c   : > { %2356 = vmatpush.bf16.msra.mxu3 %v3396_v31  ;;  %1100 = vmatmul.bf16.gmra.mxu1 %v863_v55  ;;  %v715_v31 = vsel %vm3615_vm13, %v3529_v35, %v711_v41  ;;  %v2557_v35 = vpop.eup %2556 }
 0x10d   : > { %1149 = vmatmul.bf16.gmra.mxu2 %v863_v55  ;;  %v830_v49 = vmul.f32 %v715_v31, %v3317_v12  ;;  %v730_v17 = vsub.f32 1.5, %v729_v10  ;;  %v741_v12 = vmul.f32 %v3602_v7, %v740_v37  ;;  %vm753_vm8 = vweird.f32 %v2557_v35 }
 0x10e   : > { %vm754_vm10 = vmor %vm752_vm7, %vm753_vm8 }
 0x10f   : > { %v850_v28 = vmul.f32 %v3521_v11, %v830_v49  ;;  %v731_v14 = vmul.f32 %v2553_v18, %v730_v17  ;;  %v745_v9 = vsel %vm744_vm3, %v3602_v7, %v741_v12  ;;  %v645_v7 = vmul.f32 %v3409_v52, %v618_v8  ;;  %v902_v49 = vld [vmem:[#allocation8] sm:$0x7] }
 0x110   : > { %2357 = vmatpush.bf16.msra.mxu3 %v3404_v46  ;;  %v757_v46 = vmul.f32 %v2555_v23, %v659_v3  ;;  %v833_v34 = vmul.f32 %v745_v9, %v3335_v19  ;;  %v3664_v45 = vperm.slane %v902_v49, 0  ;;  %v3690_v12 = vperm.slane %v902_v49, 2 }
 0x111   : > { %v864_v32 = vpack.c.bf16 %v851_v57, %v850_v28  ;;  %v735_v47 = vsel %vm734_vm4, %v2553_v18, %v731_v14  ;;  %v660_v18 = vadd.f32 1e-08, %v644_v53  ;;  %v661_v60 = vadd.f32 1e-08, %v645_v7 }
 0x112   : > { %v758_v15 = vmul.f32 %v2555_v23, %v757_v46  ;;  %v853_v21 = vmul.f32 %v3521_v11, %v833_v34 }
 0x113   : > { %2558 = vrsqrt.f32 %v660_v18  ;;  %vm772_vm11 = vweird.f32 %v660_v18  ;;  %vm782_vm13 = vweird.f32 %v661_v60 }
 0x114   : > { %2358 = vmatpush.bf16.msra.mxu3 %v3413_v58  ;;  %v747_v58 = vmul.f32 %v2557_v35, %v658_v22  ;;  %v759_v44 = vmul.f32 0.5, %v758_v15  ;;  %2560 = vrsqrt.f32 %v661_v60 }
 0x116   : > { %v748_v4 = vmul.f32 %v2557_v35, %v747_v58  ;;  %v760_v5 = vsub.f32 1.5, %v759_v44 }
 0x118   : > { %2359 = vmatpush.bf16.msra.mxu3 %v3425_v27  ;;  %v832_v27 = vmul.f32 %v735_v47, %v3338_v20  ;;  %v749_v40 = vmul.f32 0.5, %v748_v4  ;;  %v761_v13 = vmul.f32 %v2555_v23, %v760_v5 }
 0x11a   : > { %v852_v0 = vmul.f32 %v3521_v11, %v832_v27  ;;  %v750_v48 = vsub.f32 1.5, %v749_v40  ;;  %v765_v19 = vsel %vm764_vm9, %v2555_v23, %v761_v13  ;;  %v3666_v23 = vperm.slane %v902_v49, 1 }
 0x11b   : > { %1125 = vmatmul.bf16.vlgmr.msrb.gmra.mxu3 %v3542_v54  ;;  %1056 = vmatmul.bf16.gmra.mxu0 %v864_v32  ;;  %v835_v6 = vmul.f32 %v765_v19, %v3350_v25 }
 0x11c   : > { %1105 = vmatmul.bf16.gmra.mxu1 %v864_v32  ;;  %v865_v36 = vpack.c.bf16 %v853_v21, %v852_v0  ;;  %v751_v51 = vmul.f32 %v2557_v35, %v750_v48 }
 0x11d   : > { %1154 = vmatmul.bf16.gmra.mxu2 %v864_v32  ;;  %v855_v16 = vmul.f32 %v3521_v11, %v835_v6 }
 0x11e   : > { %v755_v20 = vsel %vm754_vm10, %v2557_v35, %v751_v51 }
 0x11f   : > { %v834_v1 = vmul.f32 %v755_v20, %v3347_v24  ;;  %v2559_v24 = vpop.eup %2558 }
 0x120   : > { %v2561_v25 = vpop.eup %2560  ;;  %v767_v56 = vmul.f32 %v2559_v24, %v660_v18  ;;  %vm773_vm12 = vweird.f32 %v2559_v24 }
 0x121   : > { %v854_v55 = vmul.f32 %v3521_v11, %v834_v1  ;;  %v777_v41 = vmul.f32 %v2561_v25, %v661_v60  ;;  %vm783_vm14 = vweird.f32 %v2561_v25  ;;  %vm774_vm15 = vmor %vm772_vm11, %vm773_vm12  ;;  %v3738_v1 = vld [vmem:[%s3280_s7 + $0x60] sm:$0xff] }
 0x122   : > { %v768_v26 = vmul.f32 %v2559_v24, %v767_v56  ;;  %vm784_vm0 = vmor %vm782_vm13, %vm783_vm14 }
 0x123   : > { %v866_v30 = vpack.c.bf16 %v855_v16, %v854_v55  ;;  %v778_v52 = vmul.f32 %v2561_v25, %v777_v41 }
 0x124   : > { %v769_v50 = vmul.f32 0.5, %v768_v26 }
 0x125   : > { %v779_v59 = vmul.f32 0.5, %v778_v52 }
 0x126   : > { %v770_v62 = vsub.f32 1.5, %v769_v50 }
 0x127   : > { %v780_v33 = vsub.f32 1.5, %v779_v59 }
 0x128   : > { %v771_v63 = vmul.f32 %v2559_v24, %v770_v62 }
 0x12a   : > { %v775_v29 = vsel %vm774_vm15, %v2559_v24, %v771_v63 }
 0x12b   : > { %1130 = vmatmul.bf16.gmra.mxu3 %v3606_v61  ;;  %1061 = vmatmul.bf16.gmra.mxu0 %v865_v36  ;;  %v836_v22 = vmul.f32 %v775_v29, %v3361_v38 }
 0x12c   : > { %1110 = vmatmul.bf16.gmra.mxu1 %v865_v36 }
 0x12d   : > { %1159 = vmatmul.bf16.gmra.mxu2 %v865_v36  ;;  %v856_v42 = vmul.f32 %v3521_v11, %v836_v22 }
 0x13b   : > { %1174 = vmatmul.bf16.vlgmr.msra.gmra.mxu3 %v3542_v54  ;;  %1066 = vmatmul.bf16.gmra.mxu0 %v866_v30  ;;  %v781_v54 = vmul.f32 %v2561_v25, %v780_v33 }
 0x13c   : > { %1115 = vmatmul.bf16.gmra.mxu1 %v866_v30 }
 0x13d   : > { %1164 = vmatmul.bf16.gmra.mxu2 %v866_v30  ;;  %v785_v3 = vsel %vm784_vm0, %v2561_v25, %v781_v54 }
 0x13e   : > { %v837_v31 = vmul.f32 %v785_v3, %v3364_v39 }
 0x140   : > { %v857_v43 = vmul.f32 %v3521_v11, %v837_v31 }
 0x142   : > { %v867_v10 = vpack.c.bf16 %v857_v43, %v856_v42 }
 0x14b   : > { %1179 = vmatmul.bf16.gmra.mxu3 %v3606_v61  ;;  %1071 = vmatmul.bf16.gmra.mxu0 %v867_v10 }
 0x14c   : > { %1120 = vmatmul.bf16.gmra.mxu1 %v867_v10 }
 0x14d   : > { %1169 = vmatmul.bf16.gmra.mxu2 %v867_v10 }
 0x178   : > { %v1047_v37 = vpop.f32.mrf.mxu0 }
 0x179   : > { %v1096_v17 = vpop.f32.mrf.mxu1  ;;  %v3669_v38 = vadd.f32 %v1047_v37, %v3664_v45 }
 0x17a   : > { %v3672_v39 = vadd.f32 %v1096_v17, %v3666_v23 }
 0x17b   : > { %1249 = vrot.lane.b32.xlu1 %v3669_v38, %s2977_s22 }
 0x17c   : > { %1521 = vrot.lane.b32.xlu2 %v3672_v39, %s2976_s25  ;;  %1473 = vrot.lane.b32.xlu0 %v3672_v39, %s2977_s22 }
 0x17d   : > { %v1077_v11 = vpop.f32.mrf.mxu3 }
 0x17e   : > { %v3681_v28 = vadd.f32 %v1077_v11, %v3664_v45 }
 0x17f   : > { %v1145_v61 = vpop.f32.mrf.mxu2 }
 0x180   : > { %v1049_v35 = vpop.f32.mrf.mxu0  ;;  %v1146_v58 = vadd.f32 %v1145_v61, %v3690_v12 }
 0x181   : > { %v3684_v57 = vadd.f32 %v1049_v35, %v3664_v45  ;;  %v1098_v15 = vpop.f32.mrf.mxu1 }
 0x182   : > { %v3713_v44 = vadd.f32 %v1098_v15, %v3666_v23 }
 0x183   : > { %1297 = vrot.lane.b32.xlu1 %v3669_v38, %s2976_s25 }
 0x184   : > { %1273 = vrot.lane.b32.xlu2 %v3681_v28, %s2977_s22  ;;  %1299 = vrot.lane.b32.xlu0 %v3684_v57, %s2976_s25 }
 0x185   : > { %v1079_v14 = vpop.f32.mrf.mxu3 }
 0x186   : > { %v3700_v9 = vadd.f32 %v1079_v14, %v3664_v45 }
 0x187   : > { %v1147_v46 = vpop.f32.mrf.mxu2 }
 0x188   : > { %v1148_v32 = vadd.f32 %v1147_v46, %v3690_v12  ;;  %v1052_v27 = vpop.f32.mrf.mxu0 }
 0x189   : > { %v3716_v40 = vadd.f32 %v1052_v27, %v3664_v45  ;;  %v1101_v21 = vpop.f32.mrf.mxu1 }
 0x18a   : > { %v2278_v47 = vpack.c.bf16 %v1148_v32, %v1146_v58  ;;  %v3727_v13 = vadd.f32 %v1101_v21, %v3666_v23 }
 0x18b   : > { %1321 = vrot.lane.b32.xlu1 %v3681_v28, %s2976_s25 }
 0x18c   : > { %1323 = vrot.lane.b32.xlu0 %v3700_v9, %s2976_s25  ;;  %1251 = vrot.lane.b32.xlu2 %v3684_v57, %s2977_s22  ;;  %2279 = vst [vmem:[%s3707_s15] sm:$0xff] %v2278_v47  }
 0x18e   : > { %v1082_v4 = vpop.f32.mrf.mxu3 }
 0x18f   : > { %v3744_v8 = vadd.f32 %v1082_v4, %v3664_v45 }
 0x190   : > { %v1150_v34 = vpop.f32.mrf.mxu2  ;;  %v1054_v53 = vpop.f32.mrf.mxu0 }
 0x191   : > { %v1151_v48 = vadd.f32 %v1150_v34, %v3690_v12  ;;  %v1103_v18 = vpop.f32.mrf.mxu1  ;;  %v3757_v30 = vadd.f32 %v1054_v53, %v3664_v45 }
 0x192   : > { %v3760_v24 = vadd.f32 %v1103_v18, %v3666_v23 }
 0x193   : > { %1523 = vrot.lane.b32.xlu1 %v3713_v44, %s2976_s25 }
 0x194   : > { %1253 = vrot.lane.b32.xlu0 %v3716_v40, %s2977_s22  ;;  %1475 = vrot.lane.b32.xlu2 %v3713_v44, %s2977_s22 }
 0x196   : > { %v1084_v0 = vpop.f32.mrf.mxu3 }
 0x197   : > { %v3773_v50 = vadd.f32 %v1084_v0, %v3664_v45 }
 0x198   : > { %v1152_v5 = vpop.f32.mrf.mxu2  ;;  %v1057_v41 = vpop.f32.mrf.mxu0 }
 0x199   : > { %v1153_v36 = vadd.f32 %v1152_v5, %v3690_v12  ;;  %v3770_v52 = vadd.f32 %v1057_v41, %v3664_v45  ;;  %v1106_v29 = vpop.f32.mrf.mxu1 }
 0x19a   : > { %v3790_v42 = vadd.f32 %v1106_v29, %v3666_v23  ;;  %v1201_v29 = vld [vmem:[%s3875_s29] sm:$0xff] }
 0x19b   : > { %v2283_v51 = vpack.c.bf16 %v1153_v36, %v1151_v48  ;;  %1275 = vrot.lane.b32.xlu1 %v3700_v9, %s2977_s22 }
 0x19c   : > { %1525 = vrot.lane.b32.xlu0 %v3727_v13, %s2976_s25  ;;  %1301 = vrot.lane.b32.xlu2 %v3716_v40, %s2976_s25 }
 0x19d   : > { %2329 = vst [vmem:[%s3707_s15 + $0x8] sm:$0xff] %v2283_v51  }
 0x19e   : > { %v1126_v19 = vpop.f32.mrf.mxu3 }
 0x19f   : > { %v1127_v20 = vadd.f32 %v1126_v19, %v3666_v23 }
 0x1a0   : > { %v1155_v6 = vpop.f32.mrf.mxu2  ;;  %v1059_v22 = vpop.f32.mrf.mxu0 }
 0x1a1   : > { %v3741_v2 = vmul.f32 %v3738_v1, %v1127_v20  ;;  %v1156_v55 = vadd.f32 %v1155_v6, %v3690_v12  ;;  %v3793_v43 = vadd.f32 %v1059_v22, %v3664_v45  ;;  %v1108_v17 = vpop.f32.mrf.mxu1  ;;  %v1186_v22 = vld [vmem:[%s3280_s7 + $0x8] sm:$0xff] }
 0x1a2   : > { %v3806_v46 = vadd.f32 %v1108_v17, %v3666_v23 }
 0x1a3   : > { %1477 = vrot.lane.b32.xlu1 %v3727_v13, %s2977_s22 }
 0x1a4   : > { %1325 = vrot.lane.b32.xlu2 %v3744_v8, %s2976_s25  ;;  %1277 = vrot.lane.b32.xlu0 %v3744_v8, %s2977_s22 }
 0x1a6   : > { %v3752_v7 = vpop.f32.mrf.mxu3 }
 0x1a7   : > { %v3833_v19 = vadd.f32 %v3752_v7, %v3666_v23 }
 0x1a8   : > { %v1157_v60 = vpop.f32.mrf.mxu2  ;;  %v1062_v32 = vpop.f32.mrf.mxu0 }
 0x1a9   : > { %v1158_v16 = vadd.f32 %v1157_v60, %v3690_v12  ;;  %v1111_v15 = vpop.f32.mrf.mxu1  ;;  %v3819_v27 = vadd.f32 %v1062_v32, %v3664_v45 }
 0x1aa   : > { %v3816_v4 = vadd.f32 %v1111_v15, %v3666_v23 }
 0x1ab   : > { %v2288_v25 = vpack.c.bf16 %v1158_v16, %v1156_v55  ;;  %1303 = vrot.lane.b32.xlu1 %v3757_v30, %s2976_s25 }
 0x1ac   : > { %1255 = vrot.lane.b32.xlu2 %v3757_v30, %s2977_s22  ;;  %1479 = vrot.lane.b32.xlu0 %v3760_v24, %s2977_s22 }
 0x1ad   : > { %2330 = vst [vmem:[%s3707_s15 + $0x10] sm:$0xff] %v2288_v25  }
 0x1ae   : > { %v1131_v56 = vpop.f32.mrf.mxu3 }
 0x1af   : > { %v3841_v53 = vadd.f32 %v1131_v56, %v3666_v23 }
 0x1b0   : > { %v1160_v26 = vpop.f32.mrf.mxu2  ;;  %v1064_v36 = vpop.f32.mrf.mxu0 }
 0x1b1   : > { %v1161_v62 = vadd.f32 %v1160_v26, %v3690_v12  ;;  %v1113_v25 = vpop.f32.mrf.mxu1 }
 0x1b2   : > { %v3866_v26 = vadd.f32 %v1113_v25, %v3666_v23 }
 0x1b3   : > { %1327 = vrot.lane.b32.xlu1 %v3773_v50, %s2976_s25 }
 0x1b4   : > { %1527 = vrot.lane.b32.xlu2 %v3760_v24, %s2976_s25  ;;  %1305 = vrot.lane.b32.xlu0 %v3770_v52, %s2976_s25 }
 0x1b6   : > { %v1133_v59 = vpop.f32.mrf.mxu3 }
 0x1b7   : > { %v3854_v16 = vadd.f32 %v1133_v59, %v3666_v23 }
 0x1b8   : > { %v1162_v33 = vpop.f32.mrf.mxu2  ;;  %v1067_v56 = vpop.f32.mrf.mxu0 }
 0x1b9   : > { %v1163_v63 = vadd.f32 %v1162_v33, %v3690_v12  ;;  %v3863_v41 = vadd.f32 %v1067_v56, %v3664_v45  ;;  %v1116_v59 = vpop.f32.mrf.mxu1 }
 0x1bb   : > { %v2293_v54 = vpack.c.bf16 %v1163_v63, %v1161_v62  ;;  %1257 = vrot.lane.b32.xlu1 %v3770_v52, %s2977_s22 }
 0x1bc   : > { %1279 = vrot.lane.b32.xlu2 %v3773_v50, %s2977_s22  ;;  %1497 = vrot.lane.b32.xlu0 %v1127_v20, %s2977_s22 }
 0x1bd   : > { %2331 = vst [vmem:[%s3707_s15 + $0x18] sm:$0xff] %v2293_v54   ;;  %v1202_v54 = vld [vmem:[%s3875_s29 + $0x8] sm:$0xff] }
 0x1be   : > { %v1175_v3 = vpop.f32.mrf.mxu3 }
 0x1bf   : > { %v1176_v49 = vadd.f32 %v1175_v3, %v3690_v12  ;;  %v3880_v3 = vadd.f32 %v1116_v59, %v3666_v23 }
 0x1c0   : > { %v1165_v31 = vpop.f32.mrf.mxu2  ;;  %v1069_v17 = vpop.f32.mrf.mxu0 }
 0x1c1   : > { %v1166_v11 = vadd.f32 %v1165_v31, %v3690_v12  ;;  %v1118_v32 = vpop.f32.mrf.mxu1 }
 0x1c3   : > { %1529 = vrot.lane.b32.xlu1 %v3790_v42, %s2976_s25 }
 0x1c4   : > { %1481 = vrot.lane.b32.xlu2 %v3790_v42, %s2977_s22  ;;  %1259 = vrot.lane.b32.xlu0 %v3793_v43, %s2977_s22 }
 0x1c6   : > { %v1177_v10 = vpop.f32.mrf.mxu3 }
 0x1c7   : > { %v1178_v37 = vadd.f32 %v1177_v10, %v3690_v12  ;;  %v1185_v10 = vld [vmem:[%s3280_s7] sm:$0xff] }
 0x1c8   : > { %v1167_v35 = vpop.f32.mrf.mxu2  ;;  %v1569_v59 = vmul.f32 %v1185_v10, %v3672_v39 }
 0x1c9   : > { %v2308_v61 = vpack.c.bf16 %v1178_v37, %v1176_v49  ;;  %v1168_v14 = vadd.f32 %v1167_v35, %v3690_v12  ;;  %v1218_v37 = vld [vmem:[%s3889_s30 + $0x8] sm:$0xff] }
 0x1cb   : > { %2334 = vst [vmem:[%s3707_s15 + $0x30] sm:$0xff] %v2308_v61   ;;  %v2298_v58 = vpack.c.bf16 %v1168_v14, %v1166_v11  ;;  %1483 = vrot.lane.b32.xlu1 %v3806_v46, %s2977_s22  ;;  %v1346_v11 = vmul.f32 %v1186_v22, %v3684_v57  ;;  %v1345_v61 = vmul.f32 %v1185_v10, %v3669_v38 }
 0x1cc   : > { %1545 = vrot.lane.b32.xlu2 %v1127_v20, %s2976_s25  ;;  %1531 = vrot.lane.b32.xlu0 %v3806_v46, %s2976_s25  ;;  %v3836_v20 = vadd.f32 %v1064_v36, %v3664_v45  ;;  %v3900_v36 = vadd.f32 %v1118_v32, %v3666_v23 }
 0x1cd   : > { %2332 = vst [vmem:[%s3707_s15 + $0x20] sm:$0xff] %v2298_v58   ;;  %v1217_v58 = vld [vmem:[%s3889_s30] sm:$0xff] }
 0x1ce   : > { %v1180_v47 = vpop.f32.mrf.mxu3 }
 0x1cf   : > { %v1181_v21 = vadd.f32 %v1180_v47, %v3690_v12 }
 0x1d0   : > { %v1170_v34 = vpop.f32.mrf.mxu2 }
 0x1d1   : > { %v1171_v6 = vadd.f32 %v1170_v34, %v3690_v12 }
 0x1d3   : > { %1309 = vrot.lane.b32.xlu1 %v3819_v27, %s2976_s25 }
 0x1d4   : > { %1307 = vrot.lane.b32.xlu2 %v3793_v43, %s2976_s25  ;;  %1485 = vrot.lane.b32.xlu0 %v3816_v4, %s2977_s22 }
 0x1d6   : > { %v1182_v0 = vpop.f32.mrf.mxu3  ;;  %v3828_v5 = vpop.permute.xlu2 %1521 }
 0x1d7   : > { %v1183_v48 = vadd.f32 %v1182_v0, %v3690_v12 }
 0x1d8   : > { %v1172_v18 = vpop.f32.mrf.mxu2 }
 0x1d9   : > { %v2313_v51 = vpack.c.bf16 %v1183_v48, %v1181_v21  ;;  %v1173_v60 = vadd.f32 %v1172_v18, %v3690_v12 }
 0x1db   : > { %2335 = vst [vmem:[%s3707_s15 + $0x38] sm:$0xff] %v2313_v51   ;;  %1501 = vrot.lane.b32.xlu1 %v3841_v53, %s2977_s22  ;;  %v2303_v55 = vpack.c.bf16 %v1173_v60, %v1171_v6  ;;  %v3903_v51 = vadd.f32 %v1069_v17, %v3664_v45  ;;  %v1072_v6 = vpop.f32.mrf.mxu0 }
 0x1dc   : > { %1499 = vrot.lane.b32.xlu2 %v3833_v19, %s2977_s22  ;;  %1311 = vrot.lane.b32.xlu0 %v3836_v20, %s2976_s25  ;;  %v3918_v25 = vadd.f32 %v1072_v6, %v3664_v45 }
 0x1dd   : > { %2333 = vst [vmem:[%s3707_s15 + $0x28] sm:$0xff] %v2303_v55  }
 0x1de   : > { %v3850_v7 = vpop.permute.xlu2 %1273 }
 0x1e3   : > { %1263 = vrot.lane.b32.xlu1 %v3836_v20, %s2977_s22 }
 0x1e4   : > { %1261 = vrot.lane.b32.xlu2 %v3819_v27, %s2977_s22  ;;  %1503 = vrot.lane.b32.xlu0 %v3854_v16, %s2977_s22 }
 0x1e6   : > { %v1252_v12 = vpop.permute.xlu2 %1251 }
 0x1e7   : > { %v1362_v31 = vmul.f32 %v1252_v12, %v1202_v54 }
 0x1e9   : > { %v1378_v47 = vadd.f32 %v1362_v31, %v1346_v11  ;;  %v1570_v31 = vmul.f32 %v1186_v22, %v3713_v44  ;;  %v3933_v44 = vld [vmem:[%s3875_s29 + $0x60] sm:$0xff] }
 0x1eb   : > { %1535 = vrot.lane.b32.xlu1 %v3866_v26, %s2976_s25 }
 0x1ec   : > { %1533 = vrot.lane.b32.xlu2 %v3816_v4, %s2976_s25  ;;  %1265 = vrot.lane.b32.xlu0 %v3863_v41, %s2977_s22 }
 0x1ed   : > { %v1250_v63 = vpop.permute.xlu1 %1249 }
 0x1ee   : > { %v1476_v62 = vpop.permute.xlu2 %1475  ;;  %v1474_v33 = vpop.permute.xlu0 %1473  ;;  %v1361_v49 = vmul.f32 %v1250_v63, %v1201_v29 }
 0x1ef   : > { %v1585_v12 = vmul.f32 %v1474_v33, %v1201_v29  ;;  %v1586_v56 = vmul.f32 %v1476_v62, %v1202_v54  ;;  %v1121_v63 = vpop.f32.mrf.mxu1  ;;  %v1074_v62 = vpop.f32.mrf.mxu0  ;;  %v1617_v54 = vmul.f32 %v3828_v5, %v1217_v58  ;;  %v3943_v5 = vld [vmem:[%s3889_s30 + $0x60] sm:$0xff] }
 0x1f0   : > { %v1377_v0 = vadd.f32 %v1361_v49, %v1345_v61  ;;  %v3930_v61 = vadd.f32 %v1074_v62, %v3664_v45  ;;  %v3936_v22 = vadd.f32 %v1121_v63, %v3666_v23  ;;  %v3948_v45 = vld [vmem:[%s3280_s7 + $0x68] sm:$0xff]  ;;  %v1203_v63 = vld [vmem:[%s3875_s29 + $0x10] sm:$0xff] }
 0x1f1   : > { %v1601_v49 = vadd.f32 %v1585_v12, %v1569_v59  ;;  %v1602_v29 = vadd.f32 %v1586_v56, %v1570_v31 }
 0x1f3   : > { %1489 = vrot.lane.b32.xlu1 %v3880_v3, %s2977_s22  ;;  %v1633_v11 = vadd.f32 %v1617_v54, %v1601_v49  ;;  %v1187_v49 = vld [vmem:[%s3280_s7 + $0x10] sm:$0xff] }
 0x1f4   : > { %1487 = vrot.lane.b32.xlu2 %v3866_v26, %s2977_s22  ;;  %1537 = vrot.lane.b32.xlu0 %v3880_v3, %s2976_s25 }
 0x1f5   : > { %v1298_v15 = vpop.permute.xlu1 %1297 }
 0x1f6   : > { %v3896_v35 = vpop.permute.xlu2 %1301  ;;  %v1300_v14 = vpop.permute.xlu0 %1299  ;;  %v1393_v21 = vmul.f32 %v1298_v15, %v1217_v58  ;;  %v1373_v58 = vmul.f32 %v3850_v7, %v3933_v44 }
 0x1f7   : > { %v1394_v34 = vmul.f32 %v1300_v14, %v1218_v37 }
 0x1f8   : > { %v1409_v57 = vadd.f32 %v1393_v21, %v1377_v0  ;;  %v3960_v0 = vld [vmem:[%s3889_s30 + $0x68] sm:$0xff] }
 0x1f9   : > { %v1410_v48 = vadd.f32 %v1394_v34, %v1378_v47  ;;  %v1123_v34 = vpop.f32.mrf.mxu1 }
 0x1fa   : > { %v3969_v12 = vadd.f32 %v1123_v34, %v3666_v23 }
 0x1fb   : > { %v2198_v38 = vpack.c.bf16 %v1410_v48, %v1409_v57  ;;  %1315 = vrot.lane.b32.xlu1 %v3903_v51, %s2976_s25  ;;  %v1357_v48 = vmul.f32 %v3738_v1, %v3681_v28 }
 0x1fc   : > { %1313 = vrot.lane.b32.xlu2 %v3863_v41, %s2976_s25  ;;  %1491 = vrot.lane.b32.xlu0 %v3900_v36, %s2977_s22 }
 0x1fd   : > { %2199 = vst [vmem:[%s3912_s26] sm:$0xff] %v2198_v38   ;;  %v1322_v55 = vpop.permute.xlu1 %1321  ;;  %v1358_v38 = vmul.f32 %v3948_v45, %v3700_v9  ;;  %v1389_v6 = vadd.f32 %v1373_v58, %v1357_v48 }
 0x1fe   : > { %v3915_v18 = vpop.permute.xlu2 %1325  ;;  %v1324_v60 = vpop.permute.xlu0 %1323  ;;  %v1405_v57 = vmul.f32 %v1322_v55, %v3943_v5 }
 0x1ff   : > { %v1406_v56 = vmul.f32 %v1324_v60, %v3960_v0  ;;  %v1204_v60 = vld [vmem:[%s3875_s29 + $0x18] sm:$0xff] }
 0x200   : > { %v1421_v28 = vadd.f32 %v1405_v57, %v1389_v6 }
 0x203   : > { %1269 = vrot.lane.b32.xlu1 %v3918_v25, %s2977_s22 }
 0x204   : > { %1267 = vrot.lane.b32.xlu2 %v3903_v51, %s2977_s22  ;;  %1317 = vrot.lane.b32.xlu0 %v3918_v25, %s2976_s25 }
 0x205   : > { %v1524_v39 = vpop.permute.xlu1 %1523 }
 0x206   : > { %v1256_v17 = vpop.permute.xlu2 %1255  ;;  %v1254_v33 = vpop.permute.xlu0 %1253  ;;  %v1618_v10 = vmul.f32 %v1524_v39, %v1218_v37  ;;  %v3951_v37 = vld [vmem:[%s3875_s29 + $0x68] sm:$0xff]  ;;  %v1188_v39 = vld [vmem:[%s3280_s7 + $0x18] sm:$0xff] }
 0x207   : > { %v1363_v62 = vmul.f32 %v1254_v33, %v1203_v63  ;;  %v1348_v33 = vmul.f32 %v1188_v39, %v3757_v30  ;;  %v1572_v57 = vmul.f32 %v1188_v39, %v3760_v24 }
 0x208   : > { %v1634_v14 = vadd.f32 %v1618_v10, %v1602_v29  ;;  %v1364_v29 = vmul.f32 %v1256_v17, %v1204_v60  ;;  %v1347_v10 = vmul.f32 %v1187_v49, %v3716_v40  ;;  %v1220_v17 = vld [vmem:[%s3889_s30 + $0x18] sm:$0xff] }
 0x20a   : > { %v2238_v32 = vpack.c.bf16 %v1634_v14, %v1633_v11  ;;  %v1219_v11 = vld [vmem:[%s3889_s30 + $0x10] sm:$0xff]  ;;  %v1571_v14 = vmul.f32 %v1187_v49, %v3727_v13 }
 0x20b   : > { %1541 = vrot.lane.b32.xlu1 %v3936_v22, %s2976_s25 }
 0x20c   : > { %1539 = vrot.lane.b32.xlu2 %v3900_v36, %s2976_s25  ;;  %1271 = vrot.lane.b32.xlu0 %v3930_v61, %s2977_s22  ;;  %2239 = vst [vmem:[%s3956_s9] sm:$0xff] %v2238_v32   ;;  %v1379_v32 = vadd.f32 %v1363_v62, %v1347_v10  ;;  %v4017_v62 = vld [vmem:[%s3889_s30 + $0x70] sm:$0xff] }
 0x20d   : > { %v1276_v21 = vpop.permute.xlu1 %1275 }
 0x20e   : > { %v1528_v47 = vpop.permute.xlu2 %1527  ;;  %v1526_v15 = vpop.permute.xlu0 %1525  ;;  %v1374_v7 = vmul.f32 %v1276_v21, %v3951_v37  ;;  %v3997_v21 = vld [vmem:[%s3875_s29 + $0x70] sm:$0xff] }
 0x20f   : > { %v1620_v30 = vmul.f32 %v1528_v47, %v1220_v17 }
 0x210   : > { %v1390_v59 = vadd.f32 %v1374_v7, %v1358_v38  ;;  %v1395_v38 = vmul.f32 %v3896_v35, %v1219_v11  ;;  %v1380_v7 = vadd.f32 %v1364_v29, %v1348_v33 }
 0x212   : > { %v1422_v1 = vadd.f32 %v1406_v56, %v1390_v59  ;;  %v1619_v56 = vmul.f32 %v1526_v15, %v1219_v11  ;;  %v4002_v59 = vld [vmem:[%s3875_s29 + $0x78] sm:$0xff] }
 0x213   : > { %1495 = vrot.lane.b32.xlu1 %v3969_v12, %s2977_s22 }
 0x214   : > { %1493 = vrot.lane.b32.xlu2 %v3936_v22, %s2977_s22  ;;  %1543 = vrot.lane.b32.xlu0 %v3969_v12, %s2976_s25  ;;  %v2228_v9 = vpack.c.bf16 %v1422_v1, %v1421_v28  ;;  %v4005_v28 = vld [vmem:[%s3280_s7 + $0x70] sm:$0xff] }
 0x215   : > { %v1478_v31 = vpop.permute.xlu1 %1477  ;;  %v1359_v47 = vmul.f32 %v4005_v28, %v3744_v8 }
 0x216   : > { %v1280_v55 = vpop.permute.xlu2 %1279  ;;  %v1278_v23 = vpop.permute.xlu0 %1277  ;;  %2320 = vst [vmem:[%s3912_s26 + $0x30] sm:$0xff] %v2228_v9   ;;  %v1587_v54 = vmul.f32 %v1478_v31, %v1203_v63  ;;  %v1411_v9 = vadd.f32 %v1395_v38, %v1379_v32  ;;  %v1189_v38 = vld [vmem:[%s3280_s7 + $0x20] sm:$0xff] }
 0x217   : > { %v1375_v63 = vmul.f32 %v1278_v23, %v3997_v21  ;;  %v1376_v49 = vmul.f32 %v1280_v55, %v4002_v59  ;;  %v4020_v23 = vld [vmem:[%s3889_s30 + $0x78] sm:$0xff] }
 0x218   : > { %v1603_v34 = vadd.f32 %v1587_v54, %v1571_v14  ;;  %v1407_v14 = vmul.f32 %v3915_v18, %v4017_v62  ;;  %v1205_v18 = vld [vmem:[%s3875_s29 + $0x20] sm:$0xff] }
 0x219   : > { %v1391_v29 = vadd.f32 %v1375_v63, %v1359_v47  ;;  %v1222_v63 = vld [vmem:[%s3889_s30 + $0x28] sm:$0xff] }
 0x21a   : > { %v1635_v24 = vadd.f32 %v1619_v56, %v1603_v34  ;;  %v1206_v56 = vld [vmem:[%s3875_s29 + $0x28] sm:$0xff] }
 0x21b   : > { %1547 = vrot.lane.b32.xlu1 %v3833_v19, %s2976_s25 }
 0x21c   : > { %1319 = vrot.lane.b32.xlu2 %v3930_v61, %s2976_s25  ;;  %1549 = vrot.lane.b32.xlu0 %v3841_v53, %s2976_s25 }
 0x21d   : > { %v1304_v48 = vpop.permute.xlu1 %1303 }
 0x21e   : > { %v3994_v58 = vpop.permute.xlu2 %1481  ;;  %v1480_v40 = vpop.permute.xlu0 %1479  ;;  %v1396_v6 = vmul.f32 %v1304_v48, %v1220_v17  ;;  %v1423_v17 = vadd.f32 %v1407_v14, %v1391_v29 }
 0x21f   : > { %v1588_v13 = vmul.f32 %v1480_v40, %v1204_v60  ;;  %v4009_v60 = vld [vmem:[%s3280_s7 + $0x78] sm:$0xff] }
 0x220   : > { %v1412_v31 = vadd.f32 %v1396_v6, %v1380_v7  ;;  %v1360_v54 = vmul.f32 %v4009_v60, %v3773_v50 }
 0x221   : > { %v1604_v1 = vadd.f32 %v1588_v13, %v1572_v57 }
 0x222   : > { %v2203_v15 = vpack.c.bf16 %v1412_v31, %v1411_v9  ;;  %v1392_v33 = vadd.f32 %v1376_v49, %v1360_v54  ;;  %v1221_v9 = vld [vmem:[%s3889_s30 + $0x20] sm:$0xff] }
 0x223   : > { %v1636_v35 = vadd.f32 %v1620_v30, %v1604_v1  ;;  %v1190_v30 = vld [vmem:[%s3280_s7 + $0x28] sm:$0xff]  ;;  %v1349_v1 = vmul.f32 %v1189_v38, %v3770_v52 }
 0x224   : > { %1551 = vrot.lane.b32.xlu2 %v3854_v16, %s2976_s25  ;;  %2315 = vst [vmem:[%s3912_s26 + $0x8] sm:$0xff] %v2203_v15  }
 0x225   : > { %v2243_v39 = vpack.c.bf16 %v1636_v35, %v1635_v24  ;;  %v1328_v8 = vpop.permute.xlu1 %1327  ;;  %v1350_v24 = vmul.f32 %v1190_v30, %v3793_v43  ;;  %v1589_v43 = vmul.f32 %v3994_v58, %v1205_v18 }
 0x226   : > { %v1546_v10 = vpop.permute.xlu2 %1545  ;;  %v1306_v55 = vpop.permute.xlu0 %1305  ;;  %v1408_v32 = vmul.f32 %v1328_v8, %v4020_v23 }
 0x227   : > { %2322 = vst [vmem:[%s3956_s9 + $0x8] sm:$0xff] %v2243_v39   ;;  %v1629_v11 = vmul.f32 %v1546_v10, %v3943_v5  ;;  %v1397_v39 = vmul.f32 %v1306_v55, %v1221_v9 }
 0x228   : > { %v1424_v50 = vadd.f32 %v1408_v32, %v1392_v33 }
 0x22a   : > { %v2233_v40 = vpack.c.bf16 %v1424_v50, %v1423_v17 }
 0x22c   : > { %2321 = vst [vmem:[%s3912_s26 + $0x38] sm:$0xff] %v2233_v40  }
 0x22d   : > { %v1258_v57 = vpop.permute.xlu1 %1257 }
 0x22e   : > { %v1308_v34 = vpop.permute.xlu2 %1307  ;;  %v1498_v48 = vpop.permute.xlu0 %1497  ;;  %v1365_v7 = vmul.f32 %v1258_v57, %v1205_v18  ;;  %v1583_v18 = vmul.f32 %v4005_v28, %v3841_v53 }
 0x22f   : > { %v1597_v13 = vmul.f32 %v1498_v48, %v3933_v44  ;;  %v1398_v54 = vmul.f32 %v1308_v34, %v1222_v63 }
 0x230   : > { %v1381_v49 = vadd.f32 %v1365_v7, %v1349_v1  ;;  %v1191_v1 = vld [vmem:[%s3280_s7 + $0x30] sm:$0xff] }
 0x231   : > { %v1613_v5 = vadd.f32 %v1597_v13, %v3741_v2  ;;  %v1582_v2 = vmul.f32 %v3948_v45, %v3833_v19  ;;  %v1573_v19 = vmul.f32 %v1189_v38, %v3790_v42  ;;  %v1351_v53 = vmul.f32 %v1191_v1, %v3819_v27 }
 0x232   : > { %v1413_v10 = vadd.f32 %v1397_v39, %v1381_v49  ;;  %v1208_v49 = vld [vmem:[%s3875_s29 + $0x38] sm:$0xff] }
 0x233   : > { %v4035_v6 = vadd.f32 %v1629_v11, %v1613_v5  ;;  %v1605_v17 = vadd.f32 %v1589_v43, %v1573_v19 }
 0x235   : > { %v1530_v44 = vpop.permute.xlu1 %1529 }
 0x236   : > { %v1500_v31 = vpop.permute.xlu2 %1499  ;;  %v1260_v35 = vpop.permute.xlu0 %1259  ;;  %v1621_v45 = vmul.f32 %v1530_v44, %v1221_v9  ;;  %v1223_v9 = vld [vmem:[%s3889_s30 + $0x30] sm:$0xff]  ;;  %v1224_v44 = vld [vmem:[%s3889_s30 + $0x38] sm:$0xff] }
 0x237   : > { %v1598_v47 = vmul.f32 %v1500_v31, %v3951_v37  ;;  %v1366_v15 = vmul.f32 %v1260_v35, %v1206_v56  ;;  %v1574_v37 = vmul.f32 %v1190_v30, %v3806_v46 }
 0x238   : > { %v1637_v34 = vadd.f32 %v1621_v45, %v1605_v17 }
 0x239   : > { %v4046_v29 = vadd.f32 %v1598_v47, %v1582_v2  ;;  %v1382_v52 = vadd.f32 %v1366_v15, %v1350_v24  ;;  %v1584_v47 = vmul.f32 %v4009_v60, %v3854_v16 }
 0x23b   : > { %v1414_v8 = vadd.f32 %v1398_v54, %v1382_v52 }
 0x23d   : > { %v2208_v11 = vpack.c.bf16 %v1414_v8, %v1413_v10  ;;  %v1484_v32 = vpop.permute.xlu1 %1483 }
 0x23e   : > { %v1262_v14 = vpop.permute.xlu2 %1261  ;;  %v1532_v33 = vpop.permute.xlu0 %1531  ;;  %v1590_v55 = vmul.f32 %v1484_v32, %v1206_v56  ;;  %v1207_v56 = vld [vmem:[%s3875_s29 + $0x30] sm:$0xff] }
 0x23f   : > { %2316 = vst [vmem:[%s3912_s26 + $0x10] sm:$0xff] %v2208_v11   ;;  %v1622_v40 = vmul.f32 %v1532_v33, %v1222_v63  ;;  %v1192_v63 = vld [vmem:[%s3280_s7 + $0x38] sm:$0xff]  ;;  %v1367_v31 = vmul.f32 %v1262_v14, %v1207_v56  ;;  %v1575_v14 = vmul.f32 %v1191_v1, %v3816_v4 }
 0x240   : > { %v1606_v50 = vadd.f32 %v1590_v55, %v1574_v37  ;;  %v1352_v28 = vmul.f32 %v1192_v63, %v3836_v20  ;;  %v1576_v27 = vmul.f32 %v1192_v63, %v3866_v26 }
 0x241   : > { %v1383_v52 = vadd.f32 %v1367_v31, %v1351_v53 }
 0x242   : > { %v1638_v58 = vadd.f32 %v1622_v40, %v1606_v50 }
 0x244   : > { %v2248_v48 = vpack.c.bf16 %v1638_v58, %v1637_v34  ;;  %v1209_v34 = vld [vmem:[%s3875_s29 + $0x40] sm:$0xff]  ;;  %v1210_v58 = vld [vmem:[%s3875_s29 + $0x48] sm:$0xff] }
 0x245   : > { %v1310_v5 = vpop.permute.xlu1 %1309 }
 0x246   : > { %v1534_v57 = vpop.permute.xlu2 %1533  ;;  %v1486_v13 = vpop.permute.xlu0 %1485  ;;  %2323 = vst [vmem:[%s3956_s9 + $0x10] sm:$0xff] %v2248_v48   ;;  %v1193_v48 = vld [vmem:[%s3280_s7 + $0x40] sm:$0xff] }
 0x247   : > { %v1591_v10 = vmul.f32 %v1486_v13, %v1207_v56  ;;  %v1623_v19 = vmul.f32 %v1534_v57, %v1223_v9 }
 0x24d   : > { %v1502_v46 = vpop.permute.xlu1 %1501 }
 0x24e   : > { %v1488_v42 = vpop.permute.xlu2 %1487  ;;  %v1312_v38 = vpop.permute.xlu0 %1311  ;;  %v1599_v7 = vmul.f32 %v1502_v46, %v3997_v21  ;;  %v1399_v21 = vmul.f32 %v1310_v5, %v1223_v9  ;;  %v1353_v46 = vmul.f32 %v1193_v48, %v3863_v41  ;;  %v1226_v9 = vld [vmem:[%s3889_s30 + $0x48] sm:$0xff] }
 0x24f   : > { %v1400_v8 = vmul.f32 %v1312_v38, %v1224_v44  ;;  %v1592_v16 = vmul.f32 %v1488_v42, %v1208_v49  ;;  %v1194_v42 = vld [vmem:[%s3280_s7 + $0x48] sm:$0xff] }
 0x250   : > { %v4056_v30 = vadd.f32 %v1599_v7, %v1583_v18  ;;  %v1415_v43 = vadd.f32 %v1399_v21, %v1383_v52  ;;  %v1225_v18 = vld [vmem:[%s3889_s30 + $0x40] sm:$0xff]  ;;  %v1577_v7 = vmul.f32 %v1193_v48, %v3880_v3  ;;  %v1354_v56 = vmul.f32 %v1194_v42, %v3903_v51 }
 0x251   : > { %v1608_v45 = vadd.f32 %v1592_v16, %v1576_v27  ;;  %v1196_v16 = vld [vmem:[%s3280_s7 + $0x58] sm:$0xff] }
 0x252   : > { %v1228_v27 = vld [vmem:[%s3889_s30 + $0x58] sm:$0xff] }
 0x255   : > { %v1264_v2 = vpop.permute.xlu1 %1263 }
 0x256   : > { %v1314_v24 = vpop.permute.xlu2 %1313  ;;  %v1504_v35 = vpop.permute.xlu0 %1503  ;;  %v1368_v39 = vmul.f32 %v1264_v2, %v1208_v49  ;;  %v1578_v49 = vmul.f32 %v1194_v42, %v3900_v36 }
 0x257   : > { %v1600_v15 = vmul.f32 %v1504_v35, %v4002_v59  ;;  %v1607_v59 = vadd.f32 %v1591_v10, %v1575_v14  ;;  %v1401_v2 = vmul.f32 %v1314_v24, %v1225_v18 }
 0x258   : > { %v1384_v11 = vadd.f32 %v1368_v39, %v1352_v28 }
 0x259   : > { %v4069_v54 = vadd.f32 %v1600_v15, %v1584_v47  ;;  %v1639_v4 = vadd.f32 %v1623_v19, %v1607_v59 }
 0x25a   : > { %v1416_v60 = vadd.f32 %v1400_v8, %v1384_v11  ;;  %v1195_v11 = vld [vmem:[%s3280_s7 + $0x50] sm:$0xff]  ;;  %s2786_s7 = sshra.s32 %s1741_s14, 4  ;;  %s2787_s7 = int_to_ptr.hbm [resolvable:$true] %s2786_s7 }
 0x25b   : > { %v1355_v59 = vmul.f32 %v1195_v11, %v3918_v25  ;;  %v1579_v48 = vmul.f32 %v1195_v11, %v3936_v22  ;;  %s2788_s25 = scalar_lea.hbm %s2787_s7, 64  ;;  %p2793_p2 = scmp.lt.s32.totalorder %s2787_s7, %s4311_s8 }
 0x25c   : > { %v2213_v20 = vpack.c.bf16 %v1416_v60, %v1415_v43  ;;  %v1211_v43 = vld [vmem:[%s3875_s29 + $0x50] sm:$0xff]  ;;  %v1212_v60 = vld [vmem:[%s3875_s29 + $0x58] sm:$0xff]  ;;  %p2789_p11 = scmp.ne.s32.totalorder %s2787_s7, %s2788_s25  ;;  %s2792_s29 = scalar_lea.hbm %s4311_s8, 256 }
 0x25d   : > { %v1536_v32 = vpop.permute.xlu1 %1535  ;;  %p2794_p3 = scmp.lt.s32.totalorder %s2792_s29, %s2788_s25 }
 0x25e   : > { %v1266_v33 = vpop.permute.xlu0 %1265  ;;  %2317 = vst [vmem:[%s3912_s26 + $0x18] sm:$0xff] %v2213_v20   ;;  %v1624_v37 = vmul.f32 %v1536_v32, %v1224_v44  ;;  %v1268_v55 = vpop.permute.xlu2 %1267  ;;  %p2790_p13 = pnand %p2789_p11, %p3194_p6 }
 0x25f   : > { %v1369_v13 = vmul.f32 %v1266_v33, %v1209_v34  ;;  %v1370_v38 = vmul.f32 %v1268_v55, %v1210_v58  ;;  %v1227_v33 = vld [vmem:[%s3889_s30 + $0x50] sm:$0xff]  ;;  %p2795_p4 = por %p2794_p3, %p2793_p2 }
 0x260   : > { %v1640_v17 = vadd.f32 %v1624_v37, %v1608_v45  ;;  %v1356_v37 = vmul.f32 %v1196_v16, %v3930_v61  ;;  %p2791_p0 = pneg %p2790_p13 }
 0x261   : > { %v1385_v1 = vadd.f32 %v1369_v13, %v1353_v46  ;;  %v1386_v47 = vadd.f32 %v1370_v38, %v1354_v56 }
 0x262   : > { %v2253_v50 = vpack.c.bf16 %v1640_v17, %v1639_v4  ;;  %p2796_p5 = pnand %p2795_p4, %p2791_p0 }
 0x263   : > { %v1417_v51 = vadd.f32 %v1401_v2, %v1385_v1 }
 0x264   : > { %2324 = vst [vmem:[%s3956_s9 + $0x18] sm:$0xff] %v2253_v50  }
 0x265   : > { %v1490_v26 = vpop.permute.xlu1 %1489 }
 0x266   : > { %v1538_v40 = vpop.permute.xlu0 %1537  ;;  %v1540_v5 = vpop.permute.xlu2 %1539  ;;  %v1593_v57 = vmul.f32 %v1490_v26, %v1209_v34 }
 0x267   : > { %v1626_v15 = vmul.f32 %v1540_v5, %v1226_v9  ;;  %v1625_v53 = vmul.f32 %v1538_v40, %v1225_v18  ;;  %v1580_v5 = vmul.f32 %v1196_v16, %v3969_v12 }
 0x268   : > { %v1609_v31 = vadd.f32 %v1593_v57, %v1577_v7 }
 0x26a   : > { %v1641_v28 = vadd.f32 %v1625_v53, %v1609_v31 }
 0x26d   : > { %v1316_v35 = vpop.permute.xlu1 %1315 }
 0x26e   : > { %v1492_v63 = vpop.permute.xlu0 %1491  ;;  %v1402_v41 = vmul.f32 %v1316_v35, %v1226_v9  ;;  %v1494_v36 = vpop.permute.xlu2 %1493 }
 0x26f   : > { %v1594_v44 = vmul.f32 %v1492_v63, %v1210_v58  ;;  %v1595_v61 = vmul.f32 %v1494_v36, %v1211_v43 }
 0x270   : > { %v1418_v21 = vadd.f32 %v1402_v41, %v1386_v47 }
 0x271   : > { %v1610_v3 = vadd.f32 %v1594_v44, %v1578_v49 }
 0x272   : > { %v2218_v52 = vpack.c.bf16 %v1418_v21, %v1417_v51 }
 0x273   : > { %v1642_v39 = vadd.f32 %v1626_v15, %v1610_v3 }
 0x274   : > { %2318 = vst [vmem:[%s3912_s26 + $0x20] sm:$0xff] %v2218_v52  }
 0x275   : > { %v2258_v10 = vpack.c.bf16 %v1642_v39, %v1641_v28  ;;  %v1270_v8 = vpop.permute.xlu1 %1269 }
 0x276   : > { %v1318_v24 = vpop.permute.xlu0 %1317  ;;  %v1371_v14 = vmul.f32 %v1270_v8, %v1211_v43  ;;  %v1320_v20 = vpop.permute.xlu2 %1319 }
 0x277   : > { %2325 = vst [vmem:[%s3956_s9 + $0x20] sm:$0xff] %v2258_v10   ;;  %v1404_v4 = vmul.f32 %v1320_v20, %v1228_v27  ;;  %v1403_v17 = vmul.f32 %v1318_v24, %v1227_v33 }
 0x278   : > { %v1387_v19 = vadd.f32 %v1371_v14, %v1355_v59 }
 0x27a   : > { %v1419_v25 = vadd.f32 %v1403_v17, %v1387_v19 }
 0x27d   : > { %v1542_v45 = vpop.permute.xlu1 %1541 }
 0x27e   : > { %v1272_v32 = vpop.permute.xlu0 %1271  ;;  %v1627_v13 = vmul.f32 %v1542_v45, %v1227_v33 }
 0x27f   : > { %v1372_v55 = vmul.f32 %v1272_v32, %v1212_v60 }
 0x281   : > { %v1388_v50 = vadd.f32 %v1372_v55, %v1356_v37 }
 0x283   : > { %v1420_v40 = vadd.f32 %v1404_v4, %v1388_v50 }
 0x285   : > { %v2223_v34 = vpack.c.bf16 %v1420_v40, %v1419_v25  ;;  %v1496_v58 = vpop.permute.xlu1 %1495 }
 0x286   : > { %v1544_v26 = vpop.permute.xlu0 %1543  ;;  %v1596_v42 = vmul.f32 %v1496_v58, %v1212_v60 }
 0x287   : > { %2319 = vst [vmem:[%s3912_s26 + $0x28] sm:$0xff] %v2223_v34  }
 0x288   : > { %2799 = shalt.err (!%p2796_p5)
}
 0x289   : > { %s2978_s5 = smov 64   ;;  %s2979_s1 = smov 4   ;;  %v1611_v22 = vadd.f32 %v1595_v61, %v1579_v48  ;;  %v1552_v12 = vpop.permute.xlu2 %1551  ;;  %v1612_v57 = vadd.f32 %v1596_v42, %v1580_v5  ;;  %v1628_v38 = vmul.f32 %v1544_v26, %v1228_v27 }
 0x28a   : > { %2380 = dma.vmem_to_hbm [thread:$0]  (%p3194_p6), %s4106_s12, 1024, %s1741_s14, %s1714_s21, %s2978_s5, %s2978_s5, %s2979_s1   ;;  %v1632_v7 = vmul.f32 %v1552_v12, %v4020_v23 }
 0x28b   : > { %v1643_v46 = vadd.f32 %v1627_v13, %v1611_v22  ;;  %v1644_v18 = vadd.f32 %v1628_v38, %v1612_v57  ;;  %s4312_s17 = sld [smem:[#allocation42_spill]]  ;;  %s1757_s14 = sshll.u32 %s3956_s9, 4  ;;  %s1758_s14 = int_to_ptr.vmem [resolvable:$true] %s1757_s14 }
 0x28c   : > { %s4314_s11 = sld [smem:[#allocation43_spill]]  ;;  %v1648_v23 = vadd.f32 %v1632_v7, %v4069_v54  ;;  %s1776_s25 = sshll.u32 %s3707_s15, 4  ;;  %s4150_s25 = int_to_ptr.vmem [resolvable:$true] %s1776_s25 }
 0x28d   : > { %v2263_v56 = vpack.c.bf16 %v1644_v18, %v1643_v46  ;;  %v1548_v9 = vpop.permute.xlu1 %1547 }
 0x28e   : > { %v1550_v1 = vpop.permute.xlu0 %1549  ;;  %v1630_v31 = vmul.f32 %v1548_v9, %v3960_v0 }
 0x28f   : > { %v1631_v63 = vmul.f32 %v1550_v1, %v4017_v62  ;;  %2326 = vst [vmem:[%s3956_s9 + $0x28] sm:$0xff] %v2263_v56  }
 0x290   : > { %v1646_v62 = vadd.f32 %v1630_v31, %v4046_v29 }
 0x291   : > { %s4313_s23 = smov %s4312_s17  ;;  %s1756_s4 = scalar_lea.hbm %s4312_s17, %s4093_s0  ;;  %v1647_v35 = vadd.f32 %v1631_v63, %v4056_v30 }
 0x292   : > { %s4315_s21 = smov %s4314_s11  ;;  %s1775_s12 = scalar_lea.hbm %s4314_s11, %s4093_s0  ;;  %v2268_v44 = vpack.c.bf16 %v1646_v62, %v4035_v6 }
 0x293   : > { %s4142_s7 = sshll.u32 %s1756_s4, 4  ;;  %s4146_s22 = sshll.u32 %s1775_s12, 4  ;;  %v2273_v49 = vpack.c.bf16 %v1648_v23, %v1647_v35  ;;  %s1760_s7 = int_to_ptr.hbm [resolvable:$true] %s4142_s7  ;;  %s1779_s22 = int_to_ptr.hbm [resolvable:$true] %s4146_s22 }
 0x294   : > { %2327 = vst [vmem:[%s3956_s9 + $0x30] sm:$0xff] %v2268_v44   ;;  %s4157_s0 = scalar_lea.sflag [#allocation15], %s446_s2  ;;  %s2814_s15 = sshra.s32 %s1760_s7, 4  ;;  %s2815_s15 = int_to_ptr.hbm [resolvable:$true] %s2814_s15 }
 0x295   : > { %2328 = vst [vmem:[%s3956_s9 + $0x38] sm:$0xff] %v2273_v49   ;;  %s2816_s24 = scalar_lea.hbm %s2815_s15, 64  ;;  %s2820_s26 = scalar_lea.hbm %s4313_s23, 256 }
 0x296   : > { %p2817_p8 = scmp.ne.s32.totalorder %s2815_s15, %s2816_s24  ;;  %p2821_p1 = scmp.lt.s32.totalorder %s2815_s15, %s4313_s23 }
 0x297   : > { %p2822_p12 = scmp.lt.s32.totalorder %s2820_s26, %s2816_s24 }
 0x298   : > { %p2818_p9 = pnand %p2817_p8, %p3194_p6 }
 0x299   : > { %p2823_p11 = por %p2822_p12, %p2821_p1 }
 0x29a   : > { %p2819_p10 = pneg %p2818_p9 }
 0x29c   : > { %p2824_p13 = pnand %p2823_p11, %p2819_p10 }
 0x29e   : > { %2827 = shalt.err (!%p2824_p13)
}
 0x29f   : > { %2381 = dma.vmem_to_hbm [thread:$0]  (%p3194_p6), %s1758_s14, 1024, %s1760_s7, %s4157_s0, %s2978_s5, %s2978_s5, %s2979_s1  }
 0x2a0   : > { %s2842_s6 = sshra.s32 %s1779_s22, 4  ;;  %s2848_s4 = scalar_lea.hbm %s4315_s21, 256  ;;  %s2843_s6 = int_to_ptr.hbm [resolvable:$true] %s2842_s6 }
 0x2a1   : > { %s2844_s2 = scalar_lea.hbm %s2843_s6, 64  ;;  %p2849_p4 = scmp.lt.s32.totalorder %s2843_s6, %s4315_s21 }
 0x2a2   : > { %p2845_p0 = scmp.ne.s32.totalorder %s2843_s6, %s2844_s2  ;;  %p2850_p5 = scmp.lt.s32.totalorder %s2848_s4, %s2844_s2 }
 0x2a4   : > { %p2846_p2 = pnand %p2845_p0, %p3194_p6  ;;  %p2851_p8 = por %p2850_p5, %p2849_p4 }
 0x2a6   : > { %p2847_p3 = pneg %p2846_p2 }
 0x2a8   : > { %p2852_p9 = pnand %p2851_p8, %p2847_p3 }
 0x2aa   : > { %2855 = shalt.err (!%p2852_p9)
}
 0x2ab   : > { %2382 = dma.vmem_to_hbm [thread:$0]  (%p3194_p6), %s4150_s25, 1024, %s1779_s22, %s4157_s0, %s2978_s5, %s2978_s5, %s2979_s1  }
 0x2ac PF: > { %s4316_s11 = sld [smem:[#allocation24_spill]]  ;;  %p2426_p10 = scmp.ge.s32.totalorder %s2966_s19, 2 }
 0x2ae   : > { %p2410_p1 = pnand %p2426_p10, %p3198_p7 }
 0x2b0   : > { %p2411_p12 = pneg %p2410_p1 }
 0x2b2   : > { %s1793_s14 = sand.u32 1, %s4316_s11  }
 0x2b3   : > { %s1794_s7 = scalar_lea.sflag [#allocation4], %s1793_s14 }
 0x2b4   : > { %2917 = dma.done.wait (%p2411_p12), %s1794_s7, 1024  }
 0x2b5   : > { %2919 = vsyncadd (%p2411_p12), %s1794_s7, 4294966272  ;;  %s4318_s27 = sadd.s32 4294967294, %s2966_s19  }
 0x2b6   : > { %s1803_s15 = sand.u32 1, %s4318_s27  }
 0x2b7   : > { %s1804_s24 = scalar_lea.sflag [#allocation15], %s1803_s15 }
 0x2b8   : > { %2921 = dma.done.wait (%p2411_p12), %s1804_s24, 2048  }
 0x2b9   : > { %2923 = vsyncadd (%p2411_p12), %s1804_s24, 4294965248  ;;  %s31_s19 = sadd.s32 1, %s2966_s19   ;;  %s4319_s5 = sld [smem:[#allocation23_spill]] }
 0x2ba   : > { %p28_p6 = scmp.ge.s32.totalorder %s31_s19, 6   ;;  %s4320_s11 = sld [smem:[#allocation33_spill]] }
 0x2bb   : > { %s4321_s1 = sld [smem:[#allocation25_spill]]  ;;  %s4327_s30 = smov %s2930_s10 }
 0x2bc   : > { %s4322_s14 = sld [smem:[#allocation32_spill]]  ;;  %s4329_s12 = smov %s2942_s13 }
 0x2bd   : > { %s4323_s15 = sld [smem:[#allocation28_spill]]  ;;  %30 = sbr.rel (!%p28_p6) target bundleno = 23 (0x17), region = 170 }
 0x2be   : > { %s4324_s16 = sld [smem:[#allocation29_spill]] }
 0x2bf   : > { %s4325_s17 = sld [smem:[#allocation30_spill]]  ;;  %s4328_s10 = smov %s4319_s5 }
 0x2c0   : > { %s4326_s18 = sld [smem:[#allocation31_spill]] }
 0x2c1   : > { %s4330_s13 = smov %s4321_s1 }
 0x2c2   :  { %1820 = vsyncpa [#allocation3], 1 }
 0x2c3   :  { %1822 = vsyncpa [#allocation3 + $0x1], 1 }
 0x2c4   :  { %1823 = vsyncpa [#allocation6], 1 }
 0x2c5   :  { %1824 = vsyncpa [#allocation9], 1 }
 0x2c6   :  { %1825 = vsyncpa [#allocation4], 1 }
 0x2c7   :  { %1827 = vsyncpa [#allocation4 + $0x1], 1 }
 0x2c8   :  { %1828 = vsyncpa [#allocation15], 1 }
 0x2c9   :  { %1830 = vsyncpa [#allocation15 + $0x1], 1 }

// kernel: tpu_custom_call.1
= control target key start
LH: loop header
LB: loop body
LE: loop exit
PB: predicated region body
PF: predicated region fallthrough
CT: control target
= control target key end

     0   :  { %s4231_s0 = inlined_call_operand.hbm [shape: f32[2,256,128], index: 0, kind: input, shape index: {}]   ;;  %s4232_s1 = inlined_call_operand.hbm [shape: f32[1,128], index: 1, kind: input, shape index: {}]   ;;  %s4233_s2 = inlined_call_operand.hbm [shape: bf16[128,384], index: 2, kind: input, shape index: {}]   ;;  %s4234_s3 = inlined_call_operand.hbm [shape: f32[1,384], index: 3, kind: input, shape index: {}]   ;;  %s4235_s4 = inlined_call_operand.hbm [shape: f32[256,128], index: 4, kind: input, shape index: {}]   ;;  %s4236_s5 = inlined_call_operand.hbm [shape: f32[256,128], index: 5, kind: input, shape index: {}]   ;;  %s4237_s6 = inlined_call_operand.hbm [shape: f32[256,128], index: 6, kind: input, shape index: {}]   ;;  %s4238_s7 = inlined_call_operand.hbm [shape: bf16[2,256,128], index: 7, kind: output, shape index: {0}]   ;;  %s4239_s8 = inlined_call_operand.hbm [shape: bf16[2,256,128], index: 8, kind: output, shape index: {1}]   ;;  %s4240_s9 = inlined_call_operand.hbm [shape: bf16[2,256,128], index: 9, kind: output, shape index: {2}]  }
   0x1   :  { %4257 = sst [smem:[#allocation35_spill]] %s4231_s0 }
   0x2   :  { %4258 = sst [smem:[#allocation36_spill]] %s4232_s1 }
   0x3   :  { %4259 = sst [smem:[#allocation37_spill]] %s4233_s2 }
   0x4   :  { %4260 = sst [smem:[#allocation38_spill]] %s4235_s4 }
   0x5   :  { %4261 = sst [smem:[#allocation39_spill]] %s4236_s5 }
   0x6   :  { %4262 = sst [smem:[#allocation40_spill]] %s4237_s6 }
   0x7   :  { %4263 = sst [smem:[#allocation41_spill]] %s4238_s7 }
   0x8   :  { %4264 = sst [smem:[#allocation42_spill]] %s4239_s8 }
   0x9   :  { %4265 = sst [smem:[#allocation43_spill]] %s4240_s9 }
   0xa   :  { %15 = vsyncpa [#allocation3], 0 }
   0xb   :  { %17 = vsyncpa [#allocation3 + $0x1], 0 }
   0xc   :  { %18 = vsyncpa [#allocation6], 0 }
   0xd   :  { %19 = vsyncpa [#allocation9], 0 }
   0xe   :  { %20 = vsyncpa [#allocation4], 0 }
   0xf   :  { %22 = vsyncpa [#allocation4 + $0x1], 0 }
  0x10   :  { %23 = vsyncpa [#allocation15], 0 }
  0x11   :  { %25 = vsyncpa [#allocation15 + $0x1], 0  ;;  %s3030_s30 = smov 0   ;;  %s3032_s10 = smov 0  }
  0x12   :  { %s3034_s11 = smov 0   ;;  %s3036_s12 = smov 0  }
  0x13   :  { %s3038_s13 = smov 0   ;;  %s3040_s14 = smov 0  }
  0x14   :  { %s3042_s15 = smov 0   ;;  %s3044_s16 = smov 0  }
  0x15   :  { %s3046_s17 = smov 0   ;;  %s3048_s18 = smov 0  }
  0x16   :  { %s3050_s19 = smov 0  }
  0x17 LB: > { %4266 = sst [smem:[#allocation23_spill]] %s2934_s11  ;;  %s40_s20 = sadd.s32 1, %s2958_s17  ;;  %s2966_s19 = sphi %s3050_s19, %s31_s19   ;;  %s2962_s18 = sphi %s3048_s18, %s4326_s18   ;;  %s2958_s17 = sphi %s3046_s17, %s4325_s17   ;;  %s2954_s16 = sphi %s3044_s16, %s4324_s16   ;;  %s2950_s15 = sphi %s3042_s15, %s4323_s15   ;;  %s2946_s14 = sphi %s3040_s14, %s4322_s14   ;;  %s2942_s13 = sphi %s3038_s13, %s4330_s13   ;;  %s2938_s12 = sphi %s3036_s12, %s4329_s12   ;;  %s2934_s11 = sphi %s3034_s11, %s4320_s11   ;;  %s2930_s10 = sphi %s3032_s10, %s4328_s10   ;;  %s2926_s30 = sphi %s3030_s30, %s4327_s30  }
  0x18   : > { %4267 = sst [smem:[#allocation24_spill]] %s2938_s12  ;;  %s43_s21 = sadd.s32 1, %s2962_s18 }
  0x19   : > { %4268 = sst [smem:[#allocation25_spill]] %s2946_s14  ;;  %p41_p0 = scmp.ge.s32.totalorder %s40_s20, 2 }
  0x1a   : > { %4269 = sst [smem:[#allocation26_spill]] %s2950_s15  ;;  %s52_s22 = sadd.s32 1, %s2946_s14 }
  0x1b   : > { %4270 = sst [smem:[#allocation27_spill]] %s2954_s16  ;;  %p59_p1 = scmp.ne.s32.totalorder %s2946_s14, %s2942_s13 }
  0x1c   : > { %4271 = sst [smem:[#allocation28_spill]] %s2958_s17  ;;  %p60_p2 = scmp.eq.s32.totalorder %s2966_s19, 0 }
  0x1d   : > { %4272 = sst [smem:[#allocation29_spill]] %s2962_s18  ;;  %s4332_s20 = smov (%p41_p0, %s40_s20), 0 }
  0x1e   : > { %4273 = sst [smem:[#allocation30_spill]] %s4332_s20  ;;  %s4334_s21 = smov (!%p41_p0, %s43_s21), %s2962_s18 }
  0x1f   : > { %s3096_s23 = ssub.s32 %s2958_s17, %s4332_s20  ;;  %p3103_p3 = por %p60_p2, %p59_p1 }
  0x20   : > { %p45_p4 = scmp.ge.s32.totalorder %s4334_s21, 2  ;;  %p139_p5 = scmp.eq.s32.totalorder %s3096_s23, 0 }
  0x21   : > { %p2422_p6 = scmp.lt.s32.totalorder %s2966_s19, 4  ;;  %s352_s25 = sand.u32 1, %s2966_s19  }
  0x22   : > { %s4336_s21 = smov (%p45_p4, %s4334_s21), 0  ;;  %s354_s26 = sand.u32 1, %s2946_s14  }
  0x23   : > { %4275 = sst [smem:[#allocation31_spill]] %s4336_s21  ;;  %s47_s27 = ssub.s32 %s2962_s18, %s4336_s21 }
  0x24   : > { %s49_s28 = sor.u32 %s3096_s23, %s47_s27  ;;  %s2034_s29 = sshll.u32 %s354_s26, 7 }
  0x25   : > { %p50_p7 = scmp.eq.s32.totalorder %s49_s28, 0  ;;  %s2035_s20 = sshll.u32 %s2958_s17, 4 }
  0x26   : > { %s2036_s9 = sshll.u32 %s2962_s18, 5  ;;  %s356_s16 = scalar_lea.vmem [#allocation2], %s2034_s29 }
  0x27   : > { %s3119_s8 = scalar_select %p50_p7, %s2946_s14, %s52_s22  }
  0x28   : > { %s361_s7 = sadd.s32 %s2036_s9, %s2035_s20  ;;  %s366_s15 = sshll.u32 %s356_s16, 4  ;;  %s367_s15 = int_to_ptr.vmem [resolvable:$true] %s366_s15 }
  0x29   : > { %4276 = sst [smem:[#allocation32_spill]] %s3119_s8  ;;  %s2037_s6 = sshll.u32 %s361_s7, 3 }
  0x2a   : > { %s4277_s0 = sld [smem:[#allocation35_spill]]  ;;  %p2397_p8 = pnand %p2422_p6, %p3103_p3 }
  0x2b   : > { %s3128_s21 = scalar_lea.sflag [#allocation3], %s352_s25  ;;  %s4247_s9 = smov 128  }
  0x2c   : > { %s4249_s20 = smov 8   ;;  %s3135_s7 = sshll.u32 %s2958_s17, 7 }
  0x2d   : > { %p148_p9 = scmp.ne.s32.totalorder %s2934_s11, %s2930_s10  ;;  %s378_s24 = sand.u32 1, %s2934_s11  }
  0x2e   : > { %s3148_s25 = sshll.u32 %s378_s24, 7  ;;  %s4279_s4 = sld [smem:[#allocation38_spill]] }
  0x2f   : > { %p150_p10 = por %p148_p9, %p60_p2  ;;  %s380_s23 = scalar_lea.vmem [#allocation10], %s3148_s25 }
  0x30   : > { %s363_s28 = scalar_lea.hbm %s4277_s0, %s2037_s6  ;;  %s141_s6 = sadd.s32 1, %s2934_s11 }
  0x31   : > { %s364_s22 = sshll.u32 %s363_s28, 4  ;;  %s388_s28 = sshll.u32 %s380_s23, 4  ;;  %s365_s22 = int_to_ptr.hbm [resolvable:$true] %s364_s22  ;;  %s389_s28 = int_to_ptr.vmem [resolvable:$true] %s388_s28 }
  0x32   : > { %2399 = dma.hbm_to_vmem [thread:$0]  (!%p2397_p8), %s365_s22, 2048, %s367_s15, %s3128_s21, %s4247_s9, %s4247_s9, %s4249_s20  }
  0x33   : > { %s3143_s16 = scalar_select %p139_p5, %s2934_s11, %s141_s6  }
  0x34   : > { %s385_s27 = scalar_lea.hbm %s4279_s4, %s3135_s7  ;;  %p3157_p11 = pnand %p2422_p6, %p150_p10 }
  0x35   : > { %4278 = sst [smem:[#allocation33_spill]] %s3143_s16  ;;  %s386_s26 = sshll.u32 %s385_s27, 4  ;;  %s387_s26 = int_to_ptr.hbm [resolvable:$true] %s386_s26 }
  0x36   : > { %2402 = dma.hbm_to_vmem [thread:$0]  (!%p3157_p11), %s387_s26, 2048, %s389_s28, %s3128_s21, %s4247_s9, %s4247_s9, %s4249_s20  }
  0x37   : > { %s3168_s6 = sadd.s32 4294967295, %s2966_s19   ;;  %s4246_s24 = sadd.s32 4294967294, %s2966_s19  }
  0x38   : > { %p65_p12 = scmp.ne.s32.totalorder %s2942_s13, %s2938_s12  ;;  %p66_p13 = scmp.eq.s32.totalorder %s3168_s6, 0 }
  0x39   : > { %p154_p0 = scmp.ne.s32.totalorder %s2930_s10, %s2926_s30  ;;  %p232_p2 = scmp.eq.s32.totalorder %s3168_s6, 3 }
  0x3a   : > { %p238_p3 = scmp.eq.s32.totalorder %s4246_s24, 3  ;;  %p3181_p4 = por %p66_p13, %p65_p12 }
  0x3b   : > { %p3187_p5 = por %p154_p0, %p66_p13  ;;  %p3194_p6 = por %p232_p2, %p59_p1 }
  0x3c   : > { %p3198_p7 = por %p238_p3, %p65_p12  ;;  %p2029_p8 = scmp.ge.s32.totalorder %s2966_s19, 1 }
  0x3d   : > { %p301_p9 = scmp.lt.s32.totalorder %s2966_s19, 5  ;;  %s4286_s1 = sld [smem:[#allocation36_spill]] }
  0x3e   : > { %s4284_s30 = scalar_select %p3198_p7, 1, 0 }
  0x3f   : > { %p3207_p10 = pnand %p2029_p8, %p301_p9  ;;  %s2970_s9 = smov [#allocation5]  }
  0x40   : > { %4285 = sst [smem:[#allocation34_spill]] %s4284_s30  ;;  %s315_s20 = sshll.u32 %s2970_s9, 4  ;;  %s316_s20 = int_to_ptr.vmem [resolvable:$true] %s315_s20 }
  0x41   : > { %p2386_p1 = pneg %p3207_p10  ;;  %s4288_s5 = sld [smem:[#allocation39_spill]] }
  0x42   : > { %s4290_s9 = smov 8   ;;  %s4291_s8 = smov 128  }
  0x43   : > { %s313_s28 = sshll.u32 %s4286_s1, 4  ;;  %p3219_p12 = pnand %p2386_p1, %p66_p13  ;;  %s314_s28 = int_to_ptr.hbm [resolvable:$true] %s313_s28 }
  0x44   : > { %s402_s1 = scalar_lea.vmem [#allocation11], %s3148_s25  ;;  %s4292_s2 = sld [smem:[#allocation37_spill]] }
  0x45   : > { %s410_s17 = sshll.u32 %s402_s1, 4  ;;  %s2973_s11 = smov 12   ;;  %s411_s17 = int_to_ptr.vmem [resolvable:$true] %s410_s17 }
  0x46   : > { %2389 = dma.hbm_to_vmem [thread:$0]  (!%p3219_p12), %s314_s28, 16, %s316_s20, [#allocation6]  }
  0x47   : > { %s407_s18 = scalar_lea.hbm %s4288_s5, %s3135_s7  ;;  %s339_s20 = sshll.u32 %s4234_s3, 4  ;;  %s340_s20 = int_to_ptr.hbm [resolvable:$true] %s339_s20 }
  0x48   : > { %s408_s23 = sshll.u32 %s407_s18, 4  ;;  %s2971_s18 = smov [#allocation7]   ;;  %s409_s23 = int_to_ptr.hbm [resolvable:$true] %s408_s23 }
  0x49   : > { %2405 = dma.hbm_to_vmem [thread:$0]  (!%p3157_p11), %s409_s23, 2048, %s411_s17, %s3128_s21, %s4291_s8, %s4291_s8, %s4290_s9  }
  0x4a   : > { %s324_s5 = sshll.u32 %s4292_s2, 4  ;;  %s326_s14 = sshll.u32 %s2971_s18, 4  ;;  %s325_s5 = int_to_ptr.hbm [resolvable:$true] %s324_s5  ;;  %s327_s14 = int_to_ptr.vmem [resolvable:$true] %s326_s14 }
  0x4b   : > { %s2972_s28 = smov 192   ;;  %s2974_s17 = smov [#allocation8]  }
  0x4c   : > { %2392 = dma.hbm_to_vmem [thread:$0]  (!%p3219_p12), %s325_s5, 3072, %s327_s14, [#allocation6], %s2972_s28, %s2972_s28, %s2973_s11  }
  0x4d   : > { %s341_s23 = sshll.u32 %s2974_s17, 4  ;;  %s4293_s2 = sld [smem:[#allocation40_spill]]  ;;  %s342_s23 = int_to_ptr.vmem [resolvable:$true] %s341_s23 }
  0x4e   : > { %2395 = dma.hbm_to_vmem [thread:$0]  (!%p3219_p12), %s340_s20, 48, %s342_s23, [#allocation9]  }
  0x4f   : > { %s424_s12 = scalar_lea.vmem [#allocation12], %s3148_s25  ;;  %s3257_s5 = sand.u32 (!%p3207_p10), 1, %s2942_s13  }
  0x50   : > { %s432_s16 = sshll.u32 %s424_s12, 4  ;;  %s2048_s11 = sshll.u32 (!%p3207_p10), %s3257_s5, 7  ;;  %s433_s16 = int_to_ptr.vmem [resolvable:$true] %s432_s16 }
  0x51   : > { %444 = sbr.rel (%p3207_p10) target bundleno = 684 (0x2ac), region = 48  ;;  %s3262_s14 = scalar_lea.vmem (!%p3207_p10), [#allocation2], %s2048_s11 }
  0x53   : > { %s429_s30 = scalar_lea.hbm %s4293_s2, %s3135_s7  ;;  %s446_s2 = sand.u32 (!%p3207_p10), 1, %s3168_s6  }
  0x54   : > { %s430_s18 = sshll.u32 %s429_s30, 4  ;;  %s447_s12 = scalar_lea.sflag (!%p3207_p10), [#allocation3], %s446_s2  ;;  %s431_s18 = int_to_ptr.hbm [resolvable:$true] %s430_s18 }
  0x55   : > { %2408 = dma.hbm_to_vmem [thread:$0]  (!%p3157_p11), %s431_s18, 2048, %s433_s16, %s3128_s21, %s4291_s8, %s4291_s8, %s4290_s9  }
  0x56   : > { %2901 = dma.done.wait (%p3181_p4), %s447_s12, 2048  }
  0x57   : > { %2903 = vsyncadd (%p3181_p4), %s447_s12, 4294965248 }
  0x58   : > { %2905 = dma.done.wait (%p66_p13), [#allocation6], 3088  }
  0x59   : > { %2907 = vsyncadd (%p66_p13), [#allocation6], 4294964208 }
  0x5a   : > { %2909 = dma.done.wait (%p66_p13), [#allocation9], 48  }
  0x5b   : > { %2911 = vsyncadd (%p66_p13), [#allocation9], 4294967248  ;;  %s473_s8 = sand.u32 1, %s2930_s10  }
  0x5c   : > { %s3277_s21 = sshll.u32 %s473_s8, 7 }
  0x5d   : > { %s3280_s7 = scalar_lea.vmem [#allocation10], %s3277_s21 }
  0x5e   : > { %2913 = dma.done.wait (%p3187_p5), %s447_s12, 6144  }
  0x5f   : > { %2915 = vsyncadd (%p3187_p5), %s447_s12, 4294961152  ;;  %v3287_v0 = vld [vmem:[%s3262_s14 + $0x60] sm:$0xff]  ;;  %v3293_v2 = vld [vmem:[%s3262_s14 + $0x10] sm:$0xff]  ;;  %v2975_v28 = vmov 128.0   ;;  %s2976_s25 = smov 16   ;;  %s2977_s22 = smov 112  }
  0x60   : > { %v3290_v1 = vld [vmem:[%s3262_s14] sm:$0xff]  ;;  %v591_v3 = vmul.f32 %v3287_v0, %v3287_v0  ;;  %v581_v5 = vmul.f32 %v3293_v2, %v3293_v2  ;;  %v3302_v6 = vld [vmem:[%s3262_s14 + $0x68] sm:$0xff]  ;;  %v3308_v8 = vld [vmem:[%s3262_s14 + $0x18] sm:$0xff]  ;;  %2528 = vrcp.f32 %v2975_v28  ;;  %s3695_s24 = sshll.u32 %s3257_s5, 6  ;;  %s3875_s29 = scalar_lea.vmem [#allocation11], %s3277_s21 }
  0x61   : > { %v579_v4 = vmul.f32 %v3290_v1, %v3290_v1  ;;  %v3305_v7 = vld [vmem:[%s3262_s14 + $0x8] sm:$0xff]  ;;  %v592_v9 = vmul.f32 %v3302_v6, %v3302_v6  ;;  %v582_v11 = vmul.f32 %v3308_v8, %v3308_v8  ;;  %v3317_v12 = vld [vmem:[%s3262_s14 + $0x20] sm:$0xff]  ;;  %v3320_v13 = vld [vmem:[%s3262_s14 + $0x70] sm:$0xff]  ;;  %s3707_s15 = scalar_lea.vmem [#allocation16], %s3695_s24  ;;  %s3889_s30 = scalar_lea.vmem [#allocation12], %s3277_s21 }
  0x62   : > { %619 = vadd.xlane.f32.xlu2 %v591_v3  ;;  %599 = vadd.xlane.f32.xlu1 %v581_v5  ;;  %v580_v10 = vmul.f32 %v3305_v7, %v3305_v7  ;;  %v3323_v14 = vld [vmem:[%s3262_s14 + $0x28] sm:$0xff]  ;;  %v583_v15 = vmul.f32 %v3317_v12, %v3317_v12  ;;  %v593_v16 = vmul.f32 %v3320_v13, %v3320_v13  ;;  %v3332_v18 = vld [vmem:[%s3262_s14 + $0x78] sm:$0xff]  ;;  %v3338_v20 = vld [vmem:[%s3262_s14 + $0x30] sm:$0xff]  ;;  %s3912_s26 = scalar_lea.vmem [#allocation13], %s3695_s24  ;;  %s3956_s9 = scalar_lea.vmem [#allocation14], %s3695_s24 }
  0x63   : > { %595 = vadd.xlane.f32.xlu0 %v579_v4  ;;  %v584_v17 = vmul.f32 %v3323_v14, %v3323_v14  ;;  %v3335_v19 = vld [vmem:[%s3262_s14 + $0x38] sm:$0xff]  ;;  %v594_v21 = vmul.f32 %v3332_v18, %v3332_v18  ;;  %v585_v23 = vmul.f32 %v3338_v20, %v3338_v20  ;;  %v3347_v24 = vld [vmem:[%s3262_s14 + $0x40] sm:$0xff]  ;;  %v3350_v25 = vld [vmem:[%s3262_s14 + $0x48] sm:$0xff]  ;;  %s4308_s1 = sld [smem:[#allocation26_spill]]  ;;  %s1738_s12 = sshll.u32 %s3912_s26, 4  ;;  %s4106_s12 = int_to_ptr.vmem [resolvable:$true] %s1738_s12 }
  0x64   : > { %v586_v22 = vmul.f32 %v3335_v19, %v3335_v19  ;;  %v587_v26 = vmul.f32 %v3347_v24, %v3347_v24  ;;  %v588_v27 = vmul.f32 %v3350_v25, %v3350_v25  ;;  %v2144_v29 = vld [vmem:[#allocation7 + $0xa8] sm:$0xf]  ;;  %v2193_v30 = vld [vmem:[#allocation7 + $0xb0] sm:$0xf0]  ;;  %v2192_v31 = vld [vmem:[#allocation7 + $0xac] sm:$0xf] }
  0x65   : > { %v2145_v32 = vor.u32 %v2193_v30, %v2144_v29  ;;  %v2146_v33 = vld [vmem:[#allocation7 + $0xb4] sm:$0xf0]  ;;  %v2152_v34 = vld [vmem:[#allocation7 + $0xb0] sm:$0xf]  ;;  %v2194_v35 = vld [vmem:[#allocation7 + $0xb8] sm:$0xf0] }
  0x66   : > { %v3356_v36 = vor.u32 %v2192_v31, %v2146_v33  ;;  %v3358_v37 = vor.u32 %v2194_v35, %v2152_v34  ;;  %v3361_v38 = vld [vmem:[%s3262_s14 + $0x50] sm:$0xff]  ;;  %v3364_v39 = vld [vmem:[%s3262_s14 + $0x58] sm:$0xff]  ;;  %v3372_v42 = vpop.eup %2528  ;;  %v2134_v47 = vld [vmem:[#allocation7 + $0x9c] sm:$0xf0]  ;;  %s4309_s20 = sld [smem:[#allocation27_spill]]  ;;  %s1714_s21 = scalar_lea.sflag [#allocation4], %s3257_s5 }
  0x67   : > { %1038 = vmatpush.bf16.msra.mxu0 %v2145_v32  ;;  %2336 = vmatpush.bf16.msra.mxu3 %v2145_v32  ;;  %v589_v40 = vmul.f32 %v3361_v38, %v3361_v38  ;;  %v590_v41 = vmul.f32 %v3364_v39, %v3364_v39  ;;  %v2132_v43 = vld [vmem:[#allocation7 + $0x90] sm:$0xf]  ;;  %v2190_v44 = vld [vmem:[#allocation7 + $0x98] sm:$0xf0]  ;;  %v2189_v45 = vld [vmem:[#allocation7 + $0x94] sm:$0xf]  ;;  %vm632_vm0 = vweird.f32 %v3372_v42 }
  0x68   : > { %1087 = vmatpush.bf16.msra.mxu1 %v3356_v36  ;;  %1136 = vmatpush.bf16.msra.mxu2 %v3358_v37  ;;  %v2133_v46 = vor.u32 %v2190_v44, %v2132_v43  ;;  %v2140_v48 = vld [vmem:[#allocation7 + $0x98] sm:$0xf]  ;;  %v2191_v49 = vld [vmem:[#allocation7 + $0xa0] sm:$0xf0]  ;;  %v3374_v50 = vor.u32 %v2189_v45, %v2134_v47  ;;  %v628_v52 = vmul.f32 128.0, %v3372_v42  ;;  %s4310_s16 = sld [smem:[#allocation41_spill]] }
  0x69   : > { %v3376_v51 = vor.u32 %v2191_v49, %v2140_v48  ;;  %v2120_v53 = vld [vmem:[#allocation7 + $0x78] sm:$0xf]  ;;  %v2187_v54 = vld [vmem:[#allocation7 + $0x80] sm:$0xf0]  ;;  %v2186_v55 = vld [vmem:[#allocation7 + $0x7c] sm:$0xf] }
  0x6a   : > { %621 = vadd.xlane.f32.xlu2 %v592_v9  ;;  %601 = vadd.xlane.f32.xlu1 %v582_v11  ;;  %v2121_v56 = vor.u32 %v2187_v54, %v2120_v53  ;;  %v2122_v57 = vld [vmem:[#allocation7 + $0x84] sm:$0xf0]  ;;  %v2128_v58 = vld [vmem:[#allocation7 + $0x80] sm:$0xf]  ;;  %v2188_v59 = vld [vmem:[#allocation7 + $0x88] sm:$0xf0] }
  0x6b   : > { %597 = vadd.xlane.f32.xlu0 %v580_v10  ;;  %1039 = vmatpush.bf16.msra.mxu0 %v2133_v46  ;;  %v3381_v60 = vor.u32 %v2186_v55, %v2122_v57  ;;  %v3383_v61 = vor.u32 %v2188_v59, %v2128_v58  ;;  %v629_v62 = vsub.f32 1.0, %v628_v52  ;;  %v2108_v63 = vld [vmem:[#allocation7 + $0x60] sm:$0xf]  ;;  %v2184_v3 = vld [vmem:[#allocation7 + $0x68] sm:$0xf0]  ;;  %s2157_s28 = sshll.u32 %s4308_s1, 4 }
  0x6c   : > { %2337 = vmatpush.bf16.msra.mxu3 %v2133_v46  ;;  %1088 = vmatpush.bf16.msra.mxu1 %v3374_v50  ;;  %v2183_v4 = vld [vmem:[#allocation7 + $0x64] sm:$0xf]  ;;  %v2109_v5 = vor.u32 %v2184_v3, %v2108_v63  ;;  %v2110_v9 = vld [vmem:[#allocation7 + $0x6c] sm:$0xf0]  ;;  %v2116_v10 = vld [vmem:[#allocation7 + $0x68] sm:$0xf] }
  0x6d   : > { %1137 = vmatpush.bf16.msra.mxu2 %v3376_v51  ;;  %v2185_v11 = vld [vmem:[#allocation7 + $0x70] sm:$0xf0]  ;;  %v2104_v28 = vld [vmem:[#allocation7 + $0x50] sm:$0xf]  ;;  %v2182_v29 = vld [vmem:[#allocation7 + $0x58] sm:$0xf0] }
  0x6e   : > { %v3396_v31 = vor.u32 %v2182_v29, %v2104_v28  ;;  %v2084_v32 = vld [vmem:[#allocation7 + $0x30] sm:$0xf]  ;;  %v2178_v33 = vld [vmem:[#allocation7 + $0x38] sm:$0xf0]  ;;  %v2177_v34 = vld [vmem:[#allocation7 + $0x34] sm:$0xf]  ;;  %s4311_s8 = smov %s4310_s16 }
  0x6f   : > { %1040 = vmatpush.bf16.msra.mxu0 %v2121_v56  ;;  %v2092_v43 = vld [vmem:[#allocation7 + $0x38] sm:$0xf]  ;;  %v2179_v44 = vld [vmem:[#allocation7 + $0x40] sm:$0xf0]  ;;  %v2174_v49 = vld [vmem:[#allocation7 + $0x1c] sm:$0xf] }
  0x70   : > { %2338 = vmatpush.bf16.msra.mxu3 %v2121_v56  ;;  %1089 = vmatpush.bf16.msra.mxu1 %v3381_v60  ;;  %v3404_v46 = vor.u32 %v2179_v44, %v2092_v43  ;;  %v2072_v47 = vld [vmem:[#allocation7 + $0x18] sm:$0xf]  ;;  %v2175_v48 = vld [vmem:[#allocation7 + $0x20] sm:$0xf0]  ;;  %v2074_v54 = vld [vmem:[#allocation7 + $0x24] sm:$0xf0] }
  0x71   : > { %1138 = vmatpush.bf16.msra.mxu2 %v3383_v61  ;;  %v2073_v53 = vor.u32 %v2175_v48, %v2072_v47  ;;  %v2080_v55 = vld [vmem:[#allocation7 + $0x20] sm:$0xf]  ;;  %v2176_v56 = vld [vmem:[#allocation7 + $0x28] sm:$0xf0]  ;;  %v3411_v57 = vor.u32 %v2174_v49, %v2074_v54  ;;  %s2158_s17 = sshll.u32 %s4309_s20, 5 }
  0x72   : > { %623 = vadd.xlane.f32.xlu2 %v593_v16  ;;  %605 = vadd.xlane.f32.xlu1 %v584_v17  ;;  %v3389_v16 = vor.u32 %v2185_v11, %v2116_v10  ;;  %v2096_v17 = vld [vmem:[#allocation7 + $0x48] sm:$0xf]  ;;  %v3413_v58 = vor.u32 %v2176_v56, %v2080_v55  ;;  %v2062_v11 = vld [vmem:[#allocation7 + $0xc] sm:$0xf0]  ;;  %s1735_s23 = sadd.s32 %s2158_s17, %s2157_s28 }
  0x73   : > { %603 = vadd.xlane.f32.xlu0 %v583_v15  ;;  %v3387_v15 = vor.u32 %v2183_v4, %v2110_v9  ;;  %1041 = vmatpush.bf16.msra.mxu0 %v2109_v5  ;;  %v2171_v9 = vld [vmem:[#allocation7 + $0x4] sm:$0xf]  ;;  %s4093_s0 = sshll.u32 %s1735_s23, 2 }
  0x74   : > { %2339 = vmatpush.bf16.msra.mxu3 %v2109_v5  ;;  %v2172_v5 = vld [vmem:[#allocation7 + $0x8] sm:$0xf0]  ;;  %s1737_s11 = scalar_lea.hbm %s4310_s16, %s4093_s0 }
  0x75   : > { %1090 = vmatpush.bf16.msra.mxu1 %v3387_v15  ;;  %1139 = vmatpush.bf16.msra.mxu2 %v3389_v16  ;;  %s4104_s14 = sshll.u32 %s1737_s11, 4  ;;  %s1741_s14 = int_to_ptr.hbm [resolvable:$true] %s4104_s14 }
  0x79   : > { %1140 = vmatpush.bf16.msra.mxu2 %v3396_v31 }
  0x7a   : > { %609 = vadd.xlane.f32.xlu2 %v586_v22  ;;  %607 = vadd.xlane.f32.xlu1 %v585_v23  ;;  %v2180_v22 = vld [vmem:[#allocation7 + $0x4c] sm:$0xf]  ;;  %v630_v23 = vmul.f32 %v3372_v42, %v629_v62 }
  0x7b   : > { %625 = vadd.xlane.f32.xlu0 %v594_v21  ;;  %v2181_v21 = vld [vmem:[#allocation7 + $0x50] sm:$0xf0] }
  0x7c   : > { %v631_v35 = vadd.f32 %v3372_v42, %v630_v23 }
  0x7d   : > { %1141 = vmatpush.bf16.msra.mxu2 %v3404_v46 }
  0x7e   : > { %v3409_v52 = vsel %vm632_vm0, %v3372_v42, %v631_v35  ;;  %v2060_v42 = vld [vmem:[#allocation7] sm:$0xf] }
  0x7f   : > { %v2061_v10 = vor.u32 %v2172_v5, %v2060_v42 }
  0x81   : > { %1142 = vmatpush.bf16.msra.mxu2 %v3413_v58 }
  0x82   : > { %613 = vadd.xlane.f32.xlu1 %v588_v27  ;;  %615 = vadd.xlane.f32.xlu2 %v589_v40  ;;  %v2098_v27 = vld [vmem:[#allocation7 + $0x54] sm:$0xf0]  ;;  %v2085_v40 = vor.u32 %v2178_v33, %v2084_v32 }
  0x83   : > { %611 = vadd.xlane.f32.xlu0 %v587_v26  ;;  %v2097_v26 = vor.u32 %v2181_v21, %v2096_v17  ;;  %v3394_v30 = vor.u32 %v2180_v22, %v2098_v27  ;;  %v2068_v17 = vld [vmem:[#allocation7 + $0x8] sm:$0xf]  ;;  %v2173_v21 = vld [vmem:[#allocation7 + $0x10] sm:$0xf0] }
  0x84   : > { %v3425_v27 = vor.u32 %v2173_v21, %v2068_v17 }
  0x85   : > { %1042 = vmatpush.bf16.msra.mxu0 %v2097_v26  ;;  %2340 = vmatpush.bf16.msra.mxu3 %v2097_v26  ;;  %v3423_v26 = vor.u32 %v2171_v9, %v2062_v11 }
  0x86   : > { %1091 = vmatpush.bf16.msra.mxu1 %v3394_v30  ;;  %1143 = vmatpush.bf16.msra.mxu2 %v3425_v27 }
  0x89   : > { %1043 = vmatpush.bf16.msra.mxu0 %v2085_v40  ;;  %2341 = vmatpush.bf16.msra.mxu3 %v2085_v40 }
  0x8b   : > { %617 = vadd.xlane.f32.xlu0 %v590_v41  ;;  %v2086_v41 = vld [vmem:[#allocation7 + $0x3c] sm:$0xf0] }
  0x8c   : > { %v3402_v45 = vor.u32 %v2177_v34, %v2086_v41 }
  0x8d   : > { %1044 = vmatpush.bf16.msra.mxu0 %v2073_v53  ;;  %2342 = vmatpush.bf16.msra.mxu3 %v2073_v53 }
  0x8e   : > { %1092 = vmatpush.bf16.msra.mxu1 %v3402_v45 }
  0x91   : > { %1045 = vmatpush.bf16.msra.mxu0 %v2061_v10  ;;  %2343 = vmatpush.bf16.msra.mxu3 %v2061_v10 }
  0x92   : > { %1093 = vmatpush.bf16.msra.mxu1 %v3411_v57 }
  0x95   : > { %2344 = vmatpush.bf16.msrb.mxu3 %v3356_v36 }
  0x96   : > { %1094 = vmatpush.bf16.msra.mxu1 %v3423_v26 }
  0x99   : > { %2345 = vmatpush.bf16.msrb.mxu3 %v3374_v50 }
  0x9d   : > { %2346 = vmatpush.bf16.msrb.mxu3 %v3381_v60 }
  0xa1   : > { %2347 = vmatpush.bf16.msrb.mxu3 %v3387_v15 }
  0xa5   : > { %2348 = vmatpush.bf16.msrb.mxu3 %v3394_v30 }
  0xa9   : > { %2349 = vmatpush.bf16.msrb.mxu3 %v3402_v45 }
  0xad   : > { %2350 = vmatpush.bf16.msrb.mxu3 %v3411_v57 }
  0xb1   : > { %2351 = vmatpush.bf16.msrb.mxu3 %v3423_v26 }
  0xd5   : > { %v620_v59 = vpop.xlane.xlu2 %619  ;;  %v600_v4 = vpop.xlane.xlu1 %599 }
  0xd6   : > { %v596_v62 = vpop.xlane.xlu0 %595  ;;  %v646_v63 = vmul.f32 %v3409_v52, %v620_v59  ;;  %v636_v28 = vmul.f32 %v3409_v52, %v600_v4 }
  0xd7   : > { %v634_v3 = vmul.f32 %v3409_v52, %v596_v62 }
  0xd8   : > { %v3419_v22 = vadd.f32 1e-08, %v646_v63  ;;  %v3433_v29 = vadd.f32 1e-08, %v636_v28 }
  0xd9   : > { %v3421_v23 = vadd.f32 1e-08, %v634_v3 }
  0xda   : > { %2530 = vrsqrt.f32 %v3419_v22  ;;  %vm792_vm1 = vweird.f32 %v3419_v22  ;;  %vm692_vm13 = vweird.f32 %v3433_v29 }
  0xdb   : > { %2532 = vrsqrt.f32 %v3421_v23  ;;  %vm672_vm3 = vweird.f32 %v3421_v23 }
  0xdc   : > { %2534 = vrsqrt.f32 %v3433_v29 }
  0xdd   : > { %v622_v32 = vpop.xlane.xlu2 %621  ;;  %v602_v40 = vpop.xlane.xlu1 %601 }
  0xde   : > { %v598_v33 = vpop.xlane.xlu0 %597  ;;  %v647_v34 = vmul.f32 %v3409_v52, %v622_v32  ;;  %v637_v41 = vmul.f32 %v3409_v52, %v602_v40 }
  0xdf   : > { %v635_v35 = vmul.f32 %v3409_v52, %v598_v33 }
  0xe0   : > { %v3439_v43 = vpop.eup %2530  ;;  %v3441_v44 = vadd.f32 1e-08, %v647_v34  ;;  %v3450_v49 = vadd.f32 1e-08, %v637_v41 }
  0xe1   : > { %v3443_v47 = vadd.f32 1e-08, %v635_v35  ;;  %v3445_v36 = vpop.eup %2532  ;;  %v787_v48 = vmul.f32 %v3439_v43, %v3419_v22  ;;  %vm793_vm2 = vweird.f32 %v3439_v43 }
  0xe2   : > { %v667_v53 = vmul.f32 %v3445_v36, %v3421_v23  ;;  %2536 = vrsqrt.f32 %v3441_v44  ;;  %v3461_v4 = vpop.eup %2534  ;;  %vm673_vm4 = vweird.f32 %v3445_v36  ;;  %vm802_vm5 = vweird.f32 %v3441_v44  ;;  %vm3490_vm6 = vmor %vm792_vm1, %vm793_vm2 }
  0xe3   : > { %v788_v50 = vmul.f32 %v3439_v43, %v787_v48  ;;  %2538 = vrsqrt.f32 %v3443_v47  ;;  %v687_v28 = vmul.f32 %v3461_v4, %v3433_v29  ;;  %vm3506_vm8 = vmor %vm672_vm3, %vm673_vm4  ;;  %vm682_vm10 = vweird.f32 %v3443_v47 }
  0xe4   : > { %v668_v54 = vmul.f32 %v3445_v36, %v667_v53  ;;  %2540 = vrsqrt.f32 %v3450_v49  ;;  %vm693_vm14 = vweird.f32 %v3461_v4  ;;  %vm702_vm15 = vweird.f32 %v3450_v49 }
  0xe5   : > { %v789_v55 = vmul.f32 0.5, %v788_v50  ;;  %v624_v59 = vpop.xlane.xlu2 %623  ;;  %v606_v63 = vpop.xlane.xlu1 %605  ;;  %v688_v30 = vmul.f32 %v3461_v4, %v687_v28  ;;  %vm3551_vm3 = vmor %vm692_vm13, %vm693_vm14 }
  0xe6   : > { %v604_v56 = vpop.xlane.xlu0 %603  ;;  %v669_v62 = vmul.f32 0.5, %v668_v54  ;;  %v648_v3 = vmul.f32 %v3409_v52, %v624_v59  ;;  %v639_v17 = vmul.f32 %v3409_v52, %v606_v63 }
  0xe7   : > { %v790_v42 = vsub.f32 1.5, %v789_v55  ;;  %v638_v9 = vmul.f32 %v3409_v52, %v604_v56  ;;  %v689_v45 = vmul.f32 0.5, %v688_v30 }
  0xe8   : > { %v2537_v5 = vpop.eup %2536  ;;  %v670_v10 = vsub.f32 1.5, %v669_v62  ;;  %v3473_v33 = vadd.f32 1e-08, %v648_v3  ;;  %v3486_v50 = vadd.f32 1e-08, %v639_v17 }
  0xe9   : > { %v2539_v60 = vpop.eup %2538  ;;  %v797_v11 = vmul.f32 %v2537_v5, %v3441_v44  ;;  %v791_v15 = vmul.f32 %v3439_v43, %v790_v42  ;;  %v3482_v41 = vadd.f32 1e-08, %v638_v9  ;;  %vm803_vm7 = vweird.f32 %v2537_v5 }
  0xea   : > { %v3467_v21 = vpop.eup %2540  ;;  %v677_v32 = vmul.f32 %v2539_v60, %v3443_v47  ;;  %v671_v48 = vmul.f32 %v3445_v36, %v670_v10  ;;  %2542 = vrsqrt.f32 %v3473_v33  ;;  %vm683_vm9 = vweird.f32 %v2539_v60  ;;  %vm804_vm11 = vmor %vm802_vm5, %vm803_vm7 }
  0xeb   : > { %v798_v34 = vmul.f32 %v2537_v5, %v797_v11  ;;  %v697_v35 = vmul.f32 %v3467_v21, %v3450_v49  ;;  %v795_v62 = vsel %vm3490_vm6, %v3439_v43, %v791_v15  ;;  %2544 = vrsqrt.f32 %v3482_v41  ;;  %v3521_v11 = vld [vmem:[#allocation5] ss:$0 sm:$0xff]  ;;  %vm684_vm12 = vmor %vm682_vm10, %vm683_vm9 }
  0xec   : > { %v678_v40 = vmul.f32 %v2539_v60, %v677_v32  ;;  %v675_v43 = vsel %vm3506_vm8, %v3445_v36, %v671_v48  ;;  %2546 = vrsqrt.f32 %v3486_v50  ;;  %v838_v17 = vmul.f32 %v795_v62, %v3287_v0 }
  0xed   : > { %v799_v53 = vmul.f32 0.5, %v798_v34  ;;  %v698_v3 = vmul.f32 %v3467_v21, %v697_v35  ;;  %v826_v15 = vmul.f32 %v675_v43, %v3290_v1  ;;  %vm703_vm0 = vweird.f32 %v3467_v21  ;;  %v610_v49 = vpop.xlane.xlu2 %609 }
  0xee   : > { %v626_v54 = vpop.xlane.xlu0 %625  ;;  %v679_v56 = vmul.f32 0.5, %v678_v40  ;;  %v690_v40 = vsub.f32 1.5, %v689_v45  ;;  %vm812_vm1 = vweird.f32 %v3473_v33  ;;  %vm3561_vm4 = vmor %vm702_vm15, %vm703_vm0  ;;  %v608_v45 = vpop.xlane.xlu1 %607  ;;  %vm712_vm9 = vweird.f32 %v3482_v41 }
  0xef   : > { %v649_v59 = vmul.f32 %v3409_v52, %v626_v54  ;;  %v800_v63 = vsub.f32 1.5, %v799_v53  ;;  %v699_v32 = vmul.f32 0.5, %v698_v3  ;;  %v846_v53 = vmul.f32 %v3521_v11, %v826_v15 }
  0xf0   : > { %v680_v42 = vsub.f32 1.5, %v679_v56  ;;  %v2543_v36 = vpop.eup %2542  ;;  %v691_v56 = vmul.f32 %v3461_v4, %v690_v40 }
  0xf1   : > { %v3511_v9 = vadd.f32 1e-08, %v649_v59  ;;  %v801_v10 = vmul.f32 %v2537_v5, %v800_v63  ;;  %v807_v44 = vmul.f32 %v2543_v36, %v3473_v33  ;;  %v3529_v35 = vpop.eup %2544  ;;  %v700_v1 = vsub.f32 1.5, %v699_v32 }
  0xf2   : > { %v681_v23 = vmul.f32 %v2539_v60, %v680_v42  ;;  %v3534_v57 = vpop.eup %2546  ;;  %vm813_vm2 = vweird.f32 %v2543_v36  ;;  %v707_v59 = vmul.f32 %v3529_v35, %v3482_v41  ;;  %vm713_vm10 = vweird.f32 %v3529_v35 }
  0xf3   : > { %2548 = vrsqrt.f32 %v3511_v9  ;;  %v805_v28 = vsel %vm804_vm11, %v2537_v5, %v801_v10  ;;  %v858_v5 = vmul.f32 %v3521_v11, %v838_v17  ;;  %v701_v33 = vmul.f32 %v3467_v21, %v700_v1  ;;  %vm3568_vm5 = vmor %vm812_vm1, %vm813_vm2 }
  0xf4   : > { %v685_v47 = vsel %vm684_vm12, %v2539_v60, %v681_v23  ;;  %v839_v34 = vmul.f32 %v805_v28, %v3302_v6  ;;  %v808_v6 = vmul.f32 %v2543_v36, %v807_v44  ;;  %v717_v29 = vmul.f32 %v3534_v57, %v3486_v50  ;;  %vm3615_vm13 = vmor %vm712_vm9, %vm713_vm10 }
  0xf5   : > { %v827_v0 = vmul.f32 %v685_v47, %v3305_v7  ;;  %vm822_vm6 = vweird.f32 %v3511_v9  ;;  %v695_v23 = vsel %vm3551_vm3, %v3461_v4, %v691_v56  ;;  %v641_v17 = vmul.f32 %v3409_v52, %v610_v49 }
  0xf6   : > { %v859_v48 = vmul.f32 %v3521_v11, %v839_v34  ;;  %v809_v55 = vmul.f32 0.5, %v808_v6  ;;  %v640_v28 = vmul.f32 %v3409_v52, %v608_v45  ;;  %v705_v32 = vsel %vm3561_vm4, %v3467_v21, %v701_v33  ;;  %v612_v56 = vpop.xlane.xlu0 %611 }
  0xf7   : > { %v847_v7 = vmul.f32 %v3521_v11, %v827_v0  ;;  %v3587_v34 = vadd.f32 1e-08, %v641_v17  ;;  %v828_v0 = vmul.f32 %v695_v23, %v3293_v2  ;;  %v829_v21 = vmul.f32 %v705_v32, %v3308_v8 }
  0xf8   : > { %v3542_v54 = vpack.c.bf16 %v859_v48, %v858_v5  ;;  %v810_v3 = vsub.f32 1.5, %v809_v55  ;;  %v3589_v44 = vadd.f32 1e-08, %v640_v28  ;;  %vm722_vm11 = vweird.f32 %v3486_v50 }
  0xf9   : > { %v2549_v60 = vpop.eup %2548  ;;  %v862_v62 = vpack.c.bf16 %v847_v7, %v846_v53  ;;  %2550 = vrsqrt.f32 %v3587_v34  ;;  %v848_v1 = vmul.f32 %v3521_v11, %v828_v0  ;;  %v849_v6 = vmul.f32 %v3521_v11, %v829_v21 }
  0xfa   : > { %v817_v30 = vmul.f32 %v2549_v60, %v3511_v9  ;;  %1076 = vmatmul.bf16.vlgmr.msra.gmra.mxu3 %v3542_v54  ;;  %v811_v43 = vmul.f32 %v2543_v36, %v810_v3  ;;  %vm823_vm7 = vweird.f32 %v2549_v60  ;;  %v718_v9 = vmul.f32 %v3534_v57, %v717_v29 }
  0xfb   : > { %2352 = vmatpush.bf16.msra.mxu3 %v3358_v37  ;;  %1046 = vmatmul.bf16.vlgmr.msra.gmra.mxu0 %v862_v62  ;;  %v708_v37 = vmul.f32 %v3529_v35, %v707_v59  ;;  %vm824_vm8 = vmor %vm822_vm6, %vm823_vm7  ;;  %2552 = vrsqrt.f32 %v3589_v44  ;;  %vm723_vm12 = vweird.f32 %v3534_v57  ;;  %v863_v55 = vpack.c.bf16 %v849_v6, %v848_v1 }
  0xfc   : > { %v818_v22 = vmul.f32 %v2549_v60, %v817_v30  ;;  %1095 = vmatmul.bf16.vlgmr.msra.gmra.mxu1 %v862_v62  ;;  %1144 = vmatmul.bf16.vlgmr.msra.gmra.mxu2 %v862_v62  ;;  %v815_v47 = vsel %vm3568_vm5, %v2543_v36, %v811_v43  ;;  %v719_v48 = vmul.f32 0.5, %v718_v9  ;;  %v614_v30 = vpop.xlane.xlu1 %613  ;;  %v642_v62 = vmul.f32 %v3409_v52, %v612_v56  ;;  %vm3623_vm14 = vmor %vm722_vm11, %vm723_vm12 }
  0xfd   : > { %v840_v4 = vmul.f32 %v815_v47, %v3320_v13  ;;  %v709_v5 = vmul.f32 0.5, %v708_v37  ;;  %v643_v59 = vmul.f32 %v3409_v52, %v614_v30  ;;  %vm742_vm15 = vweird.f32 %v3587_v34 }
  0xfe   : > { %v819_v10 = vmul.f32 0.5, %v818_v22  ;;  %v720_v53 = vsub.f32 1.5, %v719_v48  ;;  %v658_v22 = vadd.f32 1e-08, %v642_v62  ;;  %vm732_vm1 = vweird.f32 %v3589_v44 }
  0xff   : > { %2353 = vmatpush.bf16.msra.mxu3 %v3376_v51  ;;  %v860_v51 = vmul.f32 %v3521_v11, %v840_v4  ;;  %v710_v8 = vsub.f32 1.5, %v709_v5  ;;  %v3602_v7 = vpop.eup %2550  ;;  %v659_v3 = vadd.f32 1e-08, %v643_v59 }
 0x100   : > { %v820_v15 = vsub.f32 1.5, %v819_v10  ;;  %v721_v50 = vmul.f32 %v3534_v57, %v720_v53  ;;  %vm743_vm0 = vweird.f32 %v3602_v7  ;;  %vm752_vm7 = vweird.f32 %v658_v22 }
 0x101   : > { %v711_v41 = vmul.f32 %v3529_v35, %v710_v8  ;;  %2554 = vrsqrt.f32 %v659_v3  ;;  %vm744_vm3 = vmor %vm742_vm15, %vm743_vm0  ;;  %vm762_vm5 = vweird.f32 %v659_v3  ;;  %v618_v8 = vpop.xlane.xlu0 %617 }
 0x102   : > { %v821_v40 = vmul.f32 %v2549_v60, %v820_v15  ;;  %v725_v42 = vsel %vm3623_vm14, %v3534_v57, %v721_v50  ;;  %2556 = vrsqrt.f32 %v658_v22 }
 0x103   : > { %2354 = vmatpush.bf16.msra.mxu3 %v3383_v61  ;;  %v831_v45 = vmul.f32 %v725_v42, %v3323_v14 }
 0x104   : > { %v825_v36 = vsel %vm824_vm8, %v2549_v60, %v821_v40  ;;  %v737_v60 = vmul.f32 %v3602_v7, %v3587_v34 }
 0x105   : > { %v841_v13 = vmul.f32 %v825_v36, %v3332_v18  ;;  %v2553_v18 = vpop.eup %2552  ;;  %v851_v57 = vmul.f32 %v3521_v11, %v831_v45 }
 0x106   : > { %v738_v63 = vmul.f32 %v3602_v7, %v737_v60  ;;  %vm733_vm2 = vweird.f32 %v2553_v18 }
 0x107   : > { %v861_v2 = vmul.f32 %v3521_v11, %v841_v13  ;;  %2355 = vmatpush.bf16.msra.mxu3 %v3389_v16  ;;  %v727_v16 = vmul.f32 %v2553_v18, %v3589_v44  ;;  %v2555_v23 = vpop.eup %2554  ;;  %vm734_vm4 = vmor %vm732_vm1, %vm733_vm2 }
 0x108   : > { %v739_v43 = vmul.f32 0.5, %v738_v63  ;;  %vm763_vm6 = vweird.f32 %v2555_v23 }
 0x109   : > { %v3606_v61 = vpack.c.bf16 %v861_v2, %v860_v51  ;;  %v728_v29 = vmul.f32 %v2553_v18, %v727_v16  ;;  %vm764_vm9 = vmor %vm762_vm5, %vm763_vm6  ;;  %v616_v2 = vpop.xlane.xlu2 %615 }
 0x10a   : > { %v740_v37 = vsub.f32 1.5, %v739_v43  ;;  %v644_v53 = vmul.f32 %v3409_v52, %v616_v2 }
 0x10b   : > { %1081 = vmatmul.bf16.gmra.mxu3 %v3606_v61  ;;  %1051 = vmatmul.bf16.gmra.mxu0 %v863_v55  ;;  %v729_v10 = vmul.f32 0.5, %v728_v29 }
 0x10c   : > { %2356 = vmatpush.bf16.msra.mxu3 %v3396_v31  ;;  %1100 = vmatmul.bf16.gmra.mxu1 %v863_v55  ;;  %v715_v31 = vsel %vm3615_vm13, %v3529_v35, %v711_v41  ;;  %v2557_v35 = vpop.eup %2556 }
 0x10d   : > { %1149 = vmatmul.bf16.gmra.mxu2 %v863_v55  ;;  %v830_v49 = vmul.f32 %v715_v31, %v3317_v12  ;;  %v730_v17 = vsub.f32 1.5, %v729_v10  ;;  %v741_v12 = vmul.f32 %v3602_v7, %v740_v37  ;;  %vm753_vm8 = vweird.f32 %v2557_v35 }
 0x10e   : > { %vm754_vm10 = vmor %vm752_vm7, %vm753_vm8 }
 0x10f   : > { %v850_v28 = vmul.f32 %v3521_v11, %v830_v49  ;;  %v731_v14 = vmul.f32 %v2553_v18, %v730_v17  ;;  %v745_v9 = vsel %vm744_vm3, %v3602_v7, %v741_v12  ;;  %v645_v7 = vmul.f32 %v3409_v52, %v618_v8  ;;  %v902_v49 = vld [vmem:[#allocation8] sm:$0x7] }
 0x110   : > { %2357 = vmatpush.bf16.msra.mxu3 %v3404_v46  ;;  %v757_v46 = vmul.f32 %v2555_v23, %v659_v3  ;;  %v833_v34 = vmul.f32 %v745_v9, %v3335_v19  ;;  %v3664_v45 = vperm.slane %v902_v49, 0  ;;  %v3690_v12 = vperm.slane %v902_v49, 2 }
 0x111   : > { %v864_v32 = vpack.c.bf16 %v851_v57, %v850_v28  ;;  %v735_v47 = vsel %vm734_vm4, %v2553_v18, %v731_v14  ;;  %v660_v18 = vadd.f32 1e-08, %v644_v53  ;;  %v661_v60 = vadd.f32 1e-08, %v645_v7 }
 0x112   : > { %v758_v15 = vmul.f32 %v2555_v23, %v757_v46  ;;  %v853_v21 = vmul.f32 %v3521_v11, %v833_v34 }
 0x113   : > { %2558 = vrsqrt.f32 %v660_v18  ;;  %vm772_vm11 = vweird.f32 %v660_v18  ;;  %vm782_vm13 = vweird.f32 %v661_v60 }
 0x114   : > { %2358 = vmatpush.bf16.msra.mxu3 %v3413_v58  ;;  %v747_v58 = vmul.f32 %v2557_v35, %v658_v22  ;;  %v759_v44 = vmul.f32 0.5, %v758_v15  ;;  %2560 = vrsqrt.f32 %v661_v60 }
 0x116   : > { %v748_v4 = vmul.f32 %v2557_v35, %v747_v58  ;;  %v760_v5 = vsub.f32 1.5, %v759_v44 }
 0x118   : > { %2359 = vmatpush.bf16.msra.mxu3 %v3425_v27  ;;  %v832_v27 = vmul.f32 %v735_v47, %v3338_v20  ;;  %v749_v40 = vmul.f32 0.5, %v748_v4  ;;  %v761_v13 = vmul.f32 %v2555_v23, %v760_v5 }
 0x11a   : > { %v852_v0 = vmul.f32 %v3521_v11, %v832_v27  ;;  %v750_v48 = vsub.f32 1.5, %v749_v40  ;;  %v765_v19 = vsel %vm764_vm9, %v2555_v23, %v761_v13  ;;  %v3666_v23 = vperm.slane %v902_v49, 1 }
 0x11b   : > { %1125 = vmatmul.bf16.vlgmr.msrb.gmra.mxu3 %v3542_v54  ;;  %1056 = vmatmul.bf16.gmra.mxu0 %v864_v32  ;;  %v835_v6 = vmul.f32 %v765_v19, %v3350_v25 }
 0x11c   : > { %1105 = vmatmul.bf16.gmra.mxu1 %v864_v32  ;;  %v865_v36 = vpack.c.bf16 %v853_v21, %v852_v0  ;;  %v751_v51 = vmul.f32 %v2557_v35, %v750_v48 }
 0x11d   : > { %1154 = vmatmul.bf16.gmra.mxu2 %v864_v32  ;;  %v855_v16 = vmul.f32 %v3521_v11, %v835_v6 }
 0x11e   : > { %v755_v20 = vsel %vm754_vm10, %v2557_v35, %v751_v51 }
 0x11f   : > { %v834_v1 = vmul.f32 %v755_v20, %v3347_v24  ;;  %v2559_v24 = vpop.eup %2558 }
 0x120   : > { %v2561_v25 = vpop.eup %2560  ;;  %v767_v56 = vmul.f32 %v2559_v24, %v660_v18  ;;  %vm773_vm12 = vweird.f32 %v2559_v24 }
 0x121   : > { %v854_v55 = vmul.f32 %v3521_v11, %v834_v1  ;;  %v777_v41 = vmul.f32 %v2561_v25, %v661_v60  ;;  %vm783_vm14 = vweird.f32 %v2561_v25  ;;  %vm774_vm15 = vmor %vm772_vm11, %vm773_vm12  ;;  %v3738_v1 = vld [vmem:[%s3280_s7 + $0x60] sm:$0xff] }
 0x122   : > { %v768_v26 = vmul.f32 %v2559_v24, %v767_v56  ;;  %vm784_vm0 = vmor %vm782_vm13, %vm783_vm14 }
 0x123   : > { %v866_v30 = vpack.c.bf16 %v855_v16, %v854_v55  ;;  %v778_v52 = vmul.f32 %v2561_v25, %v777_v41 }
 0x124   : > { %v769_v50 = vmul.f32 0.5, %v768_v26 }
 0x125   : > { %v779_v59 = vmul.f32 0.5, %v778_v52 }
 0x126   : > { %v770_v62 = vsub.f32 1.5, %v769_v50 }
 0x127   : > { %v780_v33 = vsub.f32 1.5, %v779_v59 }
 0x128   : > { %v771_v63 = vmul.f32 %v2559_v24, %v770_v62 }
 0x12a   : > { %v775_v29 = vsel %vm774_vm15, %v2559_v24, %v771_v63 }
 0x12b   : > { %1130 = vmatmul.bf16.gmra.mxu3 %v3606_v61  ;;  %1061 = vmatmul.bf16.gmra.mxu0 %v865_v36  ;;  %v836_v22 = vmul.f32 %v775_v29, %v3361_v38 }
 0x12c   : > { %1110 = vmatmul.bf16.gmra.mxu1 %v865_v36 }
 0x12d   : > { %1159 = vmatmul.bf16.gmra.mxu2 %v865_v36  ;;  %v856_v42 = vmul.f32 %v3521_v11, %v836_v22 }
 0x13b   : > { %1174 = vmatmul.bf16.vlgmr.msra.gmra.mxu3 %v3542_v54  ;;  %1066 = vmatmul.bf16.gmra.mxu0 %v866_v30  ;;  %v781_v54 = vmul.f32 %v2561_v25, %v780_v33 }
 0x13c   : > { %1115 = vmatmul.bf16.gmra.mxu1 %v866_v30 }
 0x13d   : > { %1164 = vmatmul.bf16.gmra.mxu2 %v866_v30  ;;  %v785_v3 = vsel %vm784_vm0, %v2561_v25, %v781_v54 }
 0x13e   : > { %v837_v31 = vmul.f32 %v785_v3, %v3364_v39 }
 0x140   : > { %v857_v43 = vmul.f32 %v3521_v11, %v837_v31 }
 0x142   : > { %v867_v10 = vpack.c.bf16 %v857_v43, %v856_v42 }
 0x14b   : > { %1179 = vmatmul.bf16.gmra.mxu3 %v3606_v61  ;;  %1071 = vmatmul.bf16.gmra.mxu0 %v867_v10 }
 0x14c   : > { %1120 = vmatmul.bf16.gmra.mxu1 %v867_v10 }
 0x14d   : > { %1169 = vmatmul.bf16.gmra.mxu2 %v867_v10 }
 0x178   : > { %v1047_v37 = vpop.f32.mrf.mxu0 }
 0x179   : > { %v1096_v17 = vpop.f32.mrf.mxu1  ;;  %v3669_v38 = vadd.f32 %v1047_v37, %v3664_v45 }
 0x17a   : > { %v3672_v39 = vadd.f32 %v1096_v17, %v3666_v23 }
 0x17b   : > { %1249 = vrot.lane.b32.xlu1 %v3669_v38, %s2977_s22 }
 0x17c   : > { %1521 = vrot.lane.b32.xlu2 %v3672_v39, %s2976_s25  ;;  %1473 = vrot.lane.b32.xlu0 %v3672_v39, %s2977_s22 }
 0x17d   : > { %v1077_v11 = vpop.f32.mrf.mxu3 }
 0x17e   : > { %v3681_v28 = vadd.f32 %v1077_v11, %v3664_v45 }
 0x17f   : > { %v1145_v61 = vpop.f32.mrf.mxu2 }
 0x180   : > { %v1049_v35 = vpop.f32.mrf.mxu0  ;;  %v1146_v58 = vadd.f32 %v1145_v61, %v3690_v12 }
 0x181   : > { %v3684_v57 = vadd.f32 %v1049_v35, %v3664_v45  ;;  %v1098_v15 = vpop.f32.mrf.mxu1 }
 0x182   : > { %v3713_v44 = vadd.f32 %v1098_v15, %v3666_v23 }
 0x183   : > { %1297 = vrot.lane.b32.xlu1 %v3669_v38, %s2976_s25 }
 0x184   : > { %1273 = vrot.lane.b32.xlu2 %v3681_v28, %s2977_s22  ;;  %1299 = vrot.lane.b32.xlu0 %v3684_v57, %s2976_s25 }
 0x185   : > { %v1079_v14 = vpop.f32.mrf.mxu3 }
 0x186   : > { %v3700_v9 = vadd.f32 %v1079_v14, %v3664_v45 }
 0x187   : > { %v1147_v46 = vpop.f32.mrf.mxu2 }
 0x188   : > { %v1148_v32 = vadd.f32 %v1147_v46, %v3690_v12  ;;  %v1052_v27 = vpop.f32.mrf.mxu0 }
 0x189   : > { %v3716_v40 = vadd.f32 %v1052_v27, %v3664_v45  ;;  %v1101_v21 = vpop.f32.mrf.mxu1 }
 0x18a   : > { %v2278_v47 = vpack.c.bf16 %v1148_v32, %v1146_v58  ;;  %v3727_v13 = vadd.f32 %v1101_v21, %v3666_v23 }
 0x18b   : > { %1321 = vrot.lane.b32.xlu1 %v3681_v28, %s2976_s25 }
 0x18c   : > { %1323 = vrot.lane.b32.xlu0 %v3700_v9, %s2976_s25  ;;  %1251 = vrot.lane.b32.xlu2 %v3684_v57, %s2977_s22  ;;  %2279 = vst [vmem:[%s3707_s15] sm:$0xff] %v2278_v47  }
 0x18e   : > { %v1082_v4 = vpop.f32.mrf.mxu3 }
 0x18f   : > { %v3744_v8 = vadd.f32 %v1082_v4, %v3664_v45 }
 0x190   : > { %v1150_v34 = vpop.f32.mrf.mxu2  ;;  %v1054_v53 = vpop.f32.mrf.mxu0 }
 0x191   : > { %v1151_v48 = vadd.f32 %v1150_v34, %v3690_v12  ;;  %v1103_v18 = vpop.f32.mrf.mxu1  ;;  %v3757_v30 = vadd.f32 %v1054_v53, %v3664_v45 }
 0x192   : > { %v3760_v24 = vadd.f32 %v1103_v18, %v3666_v23 }
 0x193   : > { %1523 = vrot.lane.b32.xlu1 %v3713_v44, %s2976_s25 }
 0x194   : > { %1253 = vrot.lane.b32.xlu0 %v3716_v40, %s2977_s22  ;;  %1475 = vrot.lane.b32.xlu2 %v3713_v44, %s2977_s22 }
 0x196   : > { %v1084_v0 = vpop.f32.mrf.mxu3 }
 0x197   : > { %v3773_v50 = vadd.f32 %v1084_v0, %v3664_v45 }
 0x198   : > { %v1152_v5 = vpop.f32.mrf.mxu2  ;;  %v1057_v41 = vpop.f32.mrf.mxu0 }
 0x199   : > { %v1153_v36 = vadd.f32 %v1152_v5, %v3690_v12  ;;  %v3770_v52 = vadd.f32 %v1057_v41, %v3664_v45  ;;  %v1106_v29 = vpop.f32.mrf.mxu1 }
 0x19a   : > { %v3790_v42 = vadd.f32 %v1106_v29, %v3666_v23  ;;  %v1201_v29 = vld [vmem:[%s3875_s29] sm:$0xff] }
 0x19b   : > { %v2283_v51 = vpack.c.bf16 %v1153_v36, %v1151_v48  ;;  %1275 = vrot.lane.b32.xlu1 %v3700_v9, %s2977_s22 }
 0x19c   : > { %1525 = vrot.lane.b32.xlu0 %v3727_v13, %s2976_s25  ;;  %1301 = vrot.lane.b32.xlu2 %v3716_v40, %s2976_s25 }
 0x19d   : > { %2329 = vst [vmem:[%s3707_s15 + $0x8] sm:$0xff] %v2283_v51  }
 0x19e   : > { %v1126_v19 = vpop.f32.mrf.mxu3 }
 0x19f   : > { %v1127_v20 = vadd.f32 %v1126_v19, %v3666_v23 }
 0x1a0   : > { %v1155_v6 = vpop.f32.mrf.mxu2  ;;  %v1059_v22 = vpop.f32.mrf.mxu0 }
 0x1a1   : > { %v3741_v2 = vmul.f32 %v3738_v1, %v1127_v20  ;;  %v1156_v55 = vadd.f32 %v1155_v6, %v3690_v12  ;;  %v3793_v43 = vadd.f32 %v1059_v22, %v3664_v45  ;;  %v1108_v17 = vpop.f32.mrf.mxu1  ;;  %v1186_v22 = vld [vmem:[%s3280_s7 + $0x8] sm:$0xff] }
 0x1a2   : > { %v3806_v46 = vadd.f32 %v1108_v17, %v3666_v23 }
 0x1a3   : > { %1477 = vrot.lane.b32.xlu1 %v3727_v13, %s2977_s22 }
 0x1a4   : > { %1325 = vrot.lane.b32.xlu2 %v3744_v8, %s2976_s25  ;;  %1277 = vrot.lane.b32.xlu0 %v3744_v8, %s2977_s22 }
 0x1a6   : > { %v3752_v7 = vpop.f32.mrf.mxu3 }
 0x1a7   : > { %v3833_v19 = vadd.f32 %v3752_v7, %v3666_v23 }
 0x1a8   : > { %v1157_v60 = vpop.f32.mrf.mxu2  ;;  %v1062_v32 = vpop.f32.mrf.mxu0 }
 0x1a9   : > { %v1158_v16 = vadd.f32 %v1157_v60, %v3690_v12  ;;  %v1111_v15 = vpop.f32.mrf.mxu1  ;;  %v3819_v27 = vadd.f32 %v1062_v32, %v3664_v45 }
 0x1aa   : > { %v3816_v4 = vadd.f32 %v1111_v15, %v3666_v23 }
 0x1ab   : > { %v2288_v25 = vpack.c.bf16 %v1158_v16, %v1156_v55  ;;  %1303 = vrot.lane.b32.xlu1 %v3757_v30, %s2976_s25 }
 0x1ac   : > { %1255 = vrot.lane.b32.xlu2 %v3757_v30, %s2977_s22  ;;  %1479 = vrot.lane.b32.xlu0 %v3760_v24, %s2977_s22 }
 0x1ad   : > { %2330 = vst [vmem:[%s3707_s15 + $0x10] sm:$0xff] %v2288_v25  }
 0x1ae   : > { %v1131_v56 = vpop.f32.mrf.mxu3 }
 0x1af   : > { %v3841_v53 = vadd.f32 %v1131_v56, %v3666_v23 }
 0x1b0   : > { %v1160_v26 = vpop.f32.mrf.mxu2  ;;  %v1064_v36 = vpop.f32.mrf.mxu0 }
 0x1b1   : > { %v1161_v62 = vadd.f32 %v1160_v26, %v3690_v12  ;;  %v1113_v25 = vpop.f32.mrf.mxu1 }
 0x1b2   : > { %v3866_v26 = vadd.f32 %v1113_v25, %v3666_v23 }
 0x1b3   : > { %1327 = vrot.lane.b32.xlu1 %v3773_v50, %s2976_s25 }
 0x1b4   : > { %1527 = vrot.lane.b32.xlu2 %v3760_v24, %s2976_s25  ;;  %1305 = vrot.lane.b32.xlu0 %v3770_v52, %s2976_s25 }
 0x1b6   : > { %v1133_v59 = vpop.f32.mrf.mxu3 }
 0x1b7   : > { %v3854_v16 = vadd.f32 %v1133_v59, %v3666_v23 }
 0x1b8   : > { %v1162_v33 = vpop.f32.mrf.mxu2  ;;  %v1067_v56 = vpop.f32.mrf.mxu0 }
 0x1b9   : > { %v1163_v63 = vadd.f32 %v1162_v33, %v3690_v12  ;;  %v3863_v41 = vadd.f32 %v1067_v56, %v3664_v45  ;;  %v1116_v59 = vpop.f32.mrf.mxu1 }
 0x1bb   : > { %v2293_v54 = vpack.c.bf16 %v1163_v63, %v1161_v62  ;;  %1257 = vrot.lane.b32.xlu1 %v3770_v52, %s2977_s22 }
 0x1bc   : > { %1279 = vrot.lane.b32.xlu2 %v3773_v50, %s2977_s22  ;;  %1497 = vrot.lane.b32.xlu0 %v1127_v20, %s2977_s22 }
 0x1bd   : > { %2331 = vst [vmem:[%s3707_s15 + $0x18] sm:$0xff] %v2293_v54   ;;  %v1202_v54 = vld [vmem:[%s3875_s29 + $0x8] sm:$0xff] }
 0x1be   : > { %v1175_v3 = vpop.f32.mrf.mxu3 }
 0x1bf   : > { %v1176_v49 = vadd.f32 %v1175_v3, %v3690_v12  ;;  %v3880_v3 = vadd.f32 %v1116_v59, %v3666_v23 }
 0x1c0   : > { %v1165_v31 = vpop.f32.mrf.mxu2  ;;  %v1069_v17 = vpop.f32.mrf.mxu0 }
 0x1c1   : > { %v1166_v11 = vadd.f32 %v1165_v31, %v3690_v12  ;;  %v1118_v32 = vpop.f32.mrf.mxu1 }
 0x1c3   : > { %1529 = vrot.lane.b32.xlu1 %v3790_v42, %s2976_s25 }
 0x1c4   : > { %1481 = vrot.lane.b32.xlu2 %v3790_v42, %s2977_s22  ;;  %1259 = vrot.lane.b32.xlu0 %v3793_v43, %s2977_s22 }
 0x1c6   : > { %v1177_v10 = vpop.f32.mrf.mxu3 }
 0x1c7   : > { %v1178_v37 = vadd.f32 %v1177_v10, %v3690_v12  ;;  %v1185_v10 = vld [vmem:[%s3280_s7] sm:$0xff] }
 0x1c8   : > { %v1167_v35 = vpop.f32.mrf.mxu2  ;;  %v1569_v59 = vmul.f32 %v1185_v10, %v3672_v39 }
 0x1c9   : > { %v2308_v61 = vpack.c.bf16 %v1178_v37, %v1176_v49  ;;  %v1168_v14 = vadd.f32 %v1167_v35, %v3690_v12  ;;  %v1218_v37 = vld [vmem:[%s3889_s30 + $0x8] sm:$0xff] }
 0x1cb   : > { %2334 = vst [vmem:[%s3707_s15 + $0x30] sm:$0xff] %v2308_v61   ;;  %v2298_v58 = vpack.c.bf16 %v1168_v14, %v1166_v11  ;;  %1483 = vrot.lane.b32.xlu1 %v3806_v46, %s2977_s22  ;;  %v1346_v11 = vmul.f32 %v1186_v22, %v3684_v57  ;;  %v1345_v61 = vmul.f32 %v1185_v10, %v3669_v38 }
 0x1cc   : > { %1545 = vrot.lane.b32.xlu2 %v1127_v20, %s2976_s25  ;;  %1531 = vrot.lane.b32.xlu0 %v3806_v46, %s2976_s25  ;;  %v3836_v20 = vadd.f32 %v1064_v36, %v3664_v45  ;;  %v3900_v36 = vadd.f32 %v1118_v32, %v3666_v23 }
 0x1cd   : > { %2332 = vst [vmem:[%s3707_s15 + $0x20] sm:$0xff] %v2298_v58   ;;  %v1217_v58 = vld [vmem:[%s3889_s30] sm:$0xff] }
 0x1ce   : > { %v1180_v47 = vpop.f32.mrf.mxu3 }
 0x1cf   : > { %v1181_v21 = vadd.f32 %v1180_v47, %v3690_v12 }
 0x1d0   : > { %v1170_v34 = vpop.f32.mrf.mxu2 }
 0x1d1   : > { %v1171_v6 = vadd.f32 %v1170_v34, %v3690_v12 }
 0x1d3   : > { %1309 = vrot.lane.b32.xlu1 %v3819_v27, %s2976_s25 }
 0x1d4   : > { %1307 = vrot.lane.b32.xlu2 %v3793_v43, %s2976_s25  ;;  %1485 = vrot.lane.b32.xlu0 %v3816_v4, %s2977_s22 }
 0x1d6   : > { %v1182_v0 = vpop.f32.mrf.mxu3  ;;  %v3828_v5 = vpop.permute.xlu2 %1521 }
 0x1d7   : > { %v1183_v48 = vadd.f32 %v1182_v0, %v3690_v12 }
 0x1d8   : > { %v1172_v18 = vpop.f32.mrf.mxu2 }
 0x1d9   : > { %v2313_v51 = vpack.c.bf16 %v1183_v48, %v1181_v21  ;;  %v1173_v60 = vadd.f32 %v1172_v18, %v3690_v12 }
 0x1db   : > { %2335 = vst [vmem:[%s3707_s15 + $0x38] sm:$0xff] %v2313_v51   ;;  %1501 = vrot.lane.b32.xlu1 %v3841_v53, %s2977_s22  ;;  %v2303_v55 = vpack.c.bf16 %v1173_v60, %v1171_v6  ;;  %v3903_v51 = vadd.f32 %v1069_v17, %v3664_v45  ;;  %v1072_v6 = vpop.f32.mrf.mxu0 }
 0x1dc   : > { %1499 = vrot.lane.b32.xlu2 %v3833_v19, %s2977_s22  ;;  %1311 = vrot.lane.b32.xlu0 %v3836_v20, %s2976_s25  ;;  %v3918_v25 = vadd.f32 %v1072_v6, %v3664_v45 }
 0x1dd   : > { %2333 = vst [vmem:[%s3707_s15 + $0x28] sm:$0xff] %v2303_v55  }
 0x1de   : > { %v3850_v7 = vpop.permute.xlu2 %1273 }
 0x1e3   : > { %1263 = vrot.lane.b32.xlu1 %v3836_v20, %s2977_s22 }
 0x1e4   : > { %1261 = vrot.lane.b32.xlu2 %v3819_v27, %s2977_s22  ;;  %1503 = vrot.lane.b32.xlu0 %v3854_v16, %s2977_s22 }
 0x1e6   : > { %v1252_v12 = vpop.permute.xlu2 %1251 }
 0x1e7   : > { %v1362_v31 = vmul.f32 %v1252_v12, %v1202_v54 }
 0x1e9   : > { %v1378_v47 = vadd.f32 %v1362_v31, %v1346_v11  ;;  %v1570_v31 = vmul.f32 %v1186_v22, %v3713_v44  ;;  %v3933_v44 = vld [vmem:[%s3875_s29 + $0x60] sm:$0xff] }
 0x1eb   : > { %1535 = vrot.lane.b32.xlu1 %v3866_v26, %s2976_s25 }
 0x1ec   : > { %1533 = vrot.lane.b32.xlu2 %v3816_v4, %s2976_s25  ;;  %1265 = vrot.lane.b32.xlu0 %v3863_v41, %s2977_s22 }
 0x1ed   : > { %v1250_v63 = vpop.permute.xlu1 %1249 }
 0x1ee   : > { %v1476_v62 = vpop.permute.xlu2 %1475  ;;  %v1474_v33 = vpop.permute.xlu0 %1473  ;;  %v1361_v49 = vmul.f32 %v1250_v63, %v1201_v29 }
 0x1ef   : > { %v1585_v12 = vmul.f32 %v1474_v33, %v1201_v29  ;;  %v1586_v56 = vmul.f32 %v1476_v62, %v1202_v54  ;;  %v1121_v63 = vpop.f32.mrf.mxu1  ;;  %v1074_v62 = vpop.f32.mrf.mxu0  ;;  %v1617_v54 = vmul.f32 %v3828_v5, %v1217_v58  ;;  %v3943_v5 = vld [vmem:[%s3889_s30 + $0x60] sm:$0xff] }
 0x1f0   : > { %v1377_v0 = vadd.f32 %v1361_v49, %v1345_v61  ;;  %v3930_v61 = vadd.f32 %v1074_v62, %v3664_v45  ;;  %v3936_v22 = vadd.f32 %v1121_v63, %v3666_v23  ;;  %v3948_v45 = vld [vmem:[%s3280_s7 + $0x68] sm:$0xff]  ;;  %v1203_v63 = vld [vmem:[%s3875_s29 + $0x10] sm:$0xff] }
 0x1f1   : > { %v1601_v49 = vadd.f32 %v1585_v12, %v1569_v59  ;;  %v1602_v29 = vadd.f32 %v1586_v56, %v1570_v31 }
 0x1f3   : > { %1489 = vrot.lane.b32.xlu1 %v3880_v3, %s2977_s22  ;;  %v1633_v11 = vadd.f32 %v1617_v54, %v1601_v49  ;;  %v1187_v49 = vld [vmem:[%s3280_s7 + $0x10] sm:$0xff] }
 0x1f4   : > { %1487 = vrot.lane.b32.xlu2 %v3866_v26, %s2977_s22  ;;  %1537 = vrot.lane.b32.xlu0 %v3880_v3, %s2976_s25 }
 0x1f5   : > { %v1298_v15 = vpop.permute.xlu1 %1297 }
 0x1f6   : > { %v3896_v35 = vpop.permute.xlu2 %1301  ;;  %v1300_v14 = vpop.permute.xlu0 %1299  ;;  %v1393_v21 = vmul.f32 %v1298_v15, %v1217_v58  ;;  %v1373_v58 = vmul.f32 %v3850_v7, %v3933_v44 }
 0x1f7   : > { %v1394_v34 = vmul.f32 %v1300_v14, %v1218_v37 }
 0x1f8   : > { %v1409_v57 = vadd.f32 %v1393_v21, %v1377_v0  ;;  %v3960_v0 = vld [vmem:[%s3889_s30 + $0x68] sm:$0xff] }
 0x1f9   : > { %v1410_v48 = vadd.f32 %v1394_v34, %v1378_v47  ;;  %v1123_v34 = vpop.f32.mrf.mxu1 }
 0x1fa   : > { %v3969_v12 = vadd.f32 %v1123_v34, %v3666_v23 }
 0x1fb   : > { %v2198_v38 = vpack.c.bf16 %v1410_v48, %v1409_v57  ;;  %1315 = vrot.lane.b32.xlu1 %v3903_v51, %s2976_s25  ;;  %v1357_v48 = vmul.f32 %v3738_v1, %v3681_v28 }
 0x1fc   : > { %1313 = vrot.lane.b32.xlu2 %v3863_v41, %s2976_s25  ;;  %1491 = vrot.lane.b32.xlu0 %v3900_v36, %s2977_s22 }
 0x1fd   : > { %2199 = vst [vmem:[%s3912_s26] sm:$0xff] %v2198_v38   ;;  %v1322_v55 = vpop.permute.xlu1 %1321  ;;  %v1358_v38 = vmul.f32 %v3948_v45, %v3700_v9  ;;  %v1389_v6 = vadd.f32 %v1373_v58, %v1357_v48 }
 0x1fe   : > { %v3915_v18 = vpop.permute.xlu2 %1325  ;;  %v1324_v60 = vpop.permute.xlu0 %1323  ;;  %v1405_v57 = vmul.f32 %v1322_v55, %v3943_v5 }
 0x1ff   : > { %v1406_v56 = vmul.f32 %v1324_v60, %v3960_v0  ;;  %v1204_v60 = vld [vmem:[%s3875_s29 + $0x18] sm:$0xff] }
 0x200   : > { %v1421_v28 = vadd.f32 %v1405_v57, %v1389_v6 }
 0x203   : > { %1269 = vrot.lane.b32.xlu1 %v3918_v25, %s2977_s22 }
 0x204   : > { %1267 = vrot.lane.b32.xlu2 %v3903_v51, %s2977_s22  ;;  %1317 = vrot.lane.b32.xlu0 %v3918_v25, %s2976_s25 }
 0x205   : > { %v1524_v39 = vpop.permute.xlu1 %1523 }
 0x206   : > { %v1256_v17 = vpop.permute.xlu2 %1255  ;;  %v1254_v33 = vpop.permute.xlu0 %1253  ;;  %v1618_v10 = vmul.f32 %v1524_v39, %v1218_v37  ;;  %v3951_v37 = vld [vmem:[%s3875_s29 + $0x68] sm:$0xff]  ;;  %v1188_v39 = vld [vmem:[%s3280_s7 + $0x18] sm:$0xff] }
 0x207   : > { %v1363_v62 = vmul.f32 %v1254_v33, %v1203_v63  ;;  %v1348_v33 = vmul.f32 %v1188_v39, %v3757_v30  ;;  %v1572_v57 = vmul.f32 %v1188_v39, %v3760_v24 }
 0x208   : > { %v1634_v14 = vadd.f32 %v1618_v10, %v1602_v29  ;;  %v1364_v29 = vmul.f32 %v1256_v17, %v1204_v60  ;;  %v1347_v10 = vmul.f32 %v1187_v49, %v3716_v40  ;;  %v1220_v17 = vld [vmem:[%s3889_s30 + $0x18] sm:$0xff] }
 0x20a   : > { %v2238_v32 = vpack.c.bf16 %v1634_v14, %v1633_v11  ;;  %v1219_v11 = vld [vmem:[%s3889_s30 + $0x10] sm:$0xff]  ;;  %v1571_v14 = vmul.f32 %v1187_v49, %v3727_v13 }
 0x20b   : > { %1541 = vrot.lane.b32.xlu1 %v3936_v22, %s2976_s25 }
 0x20c   : > { %1539 = vrot.lane.b32.xlu2 %v3900_v36, %s2976_s25  ;;  %1271 = vrot.lane.b32.xlu0 %v3930_v61, %s2977_s22  ;;  %2239 = vst [vmem:[%s3956_s9] sm:$0xff] %v2238_v32   ;;  %v1379_v32 = vadd.f32 %v1363_v62, %v1347_v10  ;;  %v4017_v62 = vld [vmem:[%s3889_s30 + $0x70] sm:$0xff] }
 0x20d   : > { %v1276_v21 = vpop.permute.xlu1 %1275 }
 0x20e   : > { %v1528_v47 = vpop.permute.xlu2 %1527  ;;  %v1526_v15 = vpop.permute.xlu0 %1525  ;;  %v1374_v7 = vmul.f32 %v1276_v21, %v3951_v37  ;;  %v3997_v21 = vld [vmem:[%s3875_s29 + $0x70] sm:$0xff] }
 0x20f   : > { %v1620_v30 = vmul.f32 %v1528_v47, %v1220_v17 }
 0x210   : > { %v1390_v59 = vadd.f32 %v1374_v7, %v1358_v38  ;;  %v1395_v38 = vmul.f32 %v3896_v35, %v1219_v11  ;;  %v1380_v7 = vadd.f32 %v1364_v29, %v1348_v33 }
 0x212   : > { %v1422_v1 = vadd.f32 %v1406_v56, %v1390_v59  ;;  %v1619_v56 = vmul.f32 %v1526_v15, %v1219_v11  ;;  %v4002_v59 = vld [vmem:[%s3875_s29 + $0x78] sm:$0xff] }
 0x213   : > { %1495 = vrot.lane.b32.xlu1 %v3969_v12, %s2977_s22 }
 0x214   : > { %1493 = vrot.lane.b32.xlu2 %v3936_v22, %s2977_s22  ;;  %1543 = vrot.lane.b32.xlu0 %v3969_v12, %s2976_s25  ;;  %v2228_v9 = vpack.c.bf16 %v1422_v1, %v1421_v28  ;;  %v4005_v28 = vld [vmem:[%s3280_s7 + $0x70] sm:$0xff] }
 0x215   : > { %v1478_v31 = vpop.permute.xlu1 %1477  ;;  %v1359_v47 = vmul.f32 %v4005_v28, %v3744_v8 }
 0x216   : > { %v1280_v55 = vpop.permute.xlu2 %1279  ;;  %v1278_v23 = vpop.permute.xlu0 %1277  ;;  %2320 = vst [vmem:[%s3912_s26 + $0x30] sm:$0xff] %v2228_v9   ;;  %v1587_v54 = vmul.f32 %v1478_v31, %v1203_v63  ;;  %v1411_v9 = vadd.f32 %v1395_v38, %v1379_v32  ;;  %v1189_v38 = vld [vmem:[%s3280_s7 + $0x20] sm:$0xff] }
 0x217   : > { %v1375_v63 = vmul.f32 %v1278_v23, %v3997_v21  ;;  %v1376_v49 = vmul.f32 %v1280_v55, %v4002_v59  ;;  %v4020_v23 = vld [vmem:[%s3889_s30 + $0x78] sm:$0xff] }
 0x218   : > { %v1603_v34 = vadd.f32 %v1587_v54, %v1571_v14  ;;  %v1407_v14 = vmul.f32 %v3915_v18, %v4017_v62  ;;  %v1205_v18 = vld [vmem:[%s3875_s29 + $0x20] sm:$0xff] }
 0x219   : > { %v1391_v29 = vadd.f32 %v1375_v63, %v1359_v47  ;;  %v1222_v63 = vld [vmem:[%s3889_s30 + $0x28] sm:$0xff] }
 0x21a   : > { %v1635_v24 = vadd.f32 %v1619_v56, %v1603_v34  ;;  %v1206_v56 = vld [vmem:[%s3875_s29 + $0x28] sm:$0xff] }
 0x21b   : > { %1547 = vrot.lane.b32.xlu1 %v3833_v19, %s2976_s25 }
 0x21c   : > { %1319 = vrot.lane.b32.xlu2 %v3930_v61, %s2976_s25  ;;  %1549 = vrot.lane.b32.xlu0 %v3841_v53, %s2976_s25 }
 0x21d   : > { %v1304_v48 = vpop.permute.xlu1 %1303 }
 0x21e   : > { %v3994_v58 = vpop.permute.xlu2 %1481  ;;  %v1480_v40 = vpop.permute.xlu0 %1479  ;;  %v1396_v6 = vmul.f32 %v1304_v48, %v1220_v17  ;;  %v1423_v17 = vadd.f32 %v1407_v14, %v1391_v29 }
 0x21f   : > { %v1588_v13 = vmul.f32 %v1480_v40, %v1204_v60  ;;  %v4009_v60 = vld [vmem:[%s3280_s7 + $0x78] sm:$0xff] }
 0x220   : > { %v1412_v31 = vadd.f32 %v1396_v6, %v1380_v7  ;;  %v1360_v54 = vmul.f32 %v4009_v60, %v3773_v50 }
 0x221   : > { %v1604_v1 = vadd.f32 %v1588_v13, %v1572_v57 }
 0x222   : > { %v2203_v15 = vpack.c.bf16 %v1412_v31, %v1411_v9  ;;  %v1392_v33 = vadd.f32 %v1376_v49, %v1360_v54  ;;  %v1221_v9 = vld [vmem:[%s3889_s30 + $0x20] sm:$0xff] }
 0x223   : > { %v1636_v35 = vadd.f32 %v1620_v30, %v1604_v1  ;;  %v1190_v30 = vld [vmem:[%s3280_s7 + $0x28] sm:$0xff]  ;;  %v1349_v1 = vmul.f32 %v1189_v38, %v3770_v52 }
 0x224   : > { %1551 = vrot.lane.b32.xlu2 %v3854_v16, %s2976_s25  ;;  %2315 = vst [vmem:[%s3912_s26 + $0x8] sm:$0xff] %v2203_v15  }
 0x225   : > { %v2243_v39 = vpack.c.bf16 %v1636_v35, %v1635_v24  ;;  %v1328_v8 = vpop.permute.xlu1 %1327  ;;  %v1350_v24 = vmul.f32 %v1190_v30, %v3793_v43  ;;  %v1589_v43 = vmul.f32 %v3994_v58, %v1205_v18 }
 0x226   : > { %v1546_v10 = vpop.permute.xlu2 %1545  ;;  %v1306_v55 = vpop.permute.xlu0 %1305  ;;  %v1408_v32 = vmul.f32 %v1328_v8, %v4020_v23 }
 0x227   : > { %2322 = vst [vmem:[%s3956_s9 + $0x8] sm:$0xff] %v2243_v39   ;;  %v1629_v11 = vmul.f32 %v1546_v10, %v3943_v5  ;;  %v1397_v39 = vmul.f32 %v1306_v55, %v1221_v9 }
 0x228   : > { %v1424_v50 = vadd.f32 %v1408_v32, %v1392_v33 }
 0x22a   : > { %v2233_v40 = vpack.c.bf16 %v1424_v50, %v1423_v17 }
 0x22c   : > { %2321 = vst [vmem:[%s3912_s26 + $0x38] sm:$0xff] %v2233_v40  }
 0x22d   : > { %v1258_v57 = vpop.permute.xlu1 %1257 }
 0x22e   : > { %v1308_v34 = vpop.permute.xlu2 %1307  ;;  %v1498_v48 = vpop.permute.xlu0 %1497  ;;  %v1365_v7 = vmul.f32 %v1258_v57, %v1205_v18  ;;  %v1583_v18 = vmul.f32 %v4005_v28, %v3841_v53 }
 0x22f   : > { %v1597_v13 = vmul.f32 %v1498_v48, %v3933_v44  ;;  %v1398_v54 = vmul.f32 %v1308_v34, %v1222_v63 }
 0x230   : > { %v1381_v49 = vadd.f32 %v1365_v7, %v1349_v1  ;;  %v1191_v1 = vld [vmem:[%s3280_s7 + $0x30] sm:$0xff] }
 0x231   : > { %v1613_v5 = vadd.f32 %v1597_v13, %v3741_v2  ;;  %v1582_v2 = vmul.f32 %v3948_v45, %v3833_v19  ;;  %v1573_v19 = vmul.f32 %v1189_v38, %v3790_v42  ;;  %v1351_v53 = vmul.f32 %v1191_v1, %v3819_v27 }
 0x232   : > { %v1413_v10 = vadd.f32 %v1397_v39, %v1381_v49  ;;  %v1208_v49 = vld [vmem:[%s3875_s29 + $0x38] sm:$0xff] }
 0x233   : > { %v4035_v6 = vadd.f32 %v1629_v11, %v1613_v5  ;;  %v1605_v17 = vadd.f32 %v1589_v43, %v1573_v19 }
 0x235   : > { %v1530_v44 = vpop.permute.xlu1 %1529 }
 0x236   : > { %v1500_v31 = vpop.permute.xlu2 %1499  ;;  %v1260_v35 = vpop.permute.xlu0 %1259  ;;  %v1621_v45 = vmul.f32 %v1530_v44, %v1221_v9  ;;  %v1223_v9 = vld [vmem:[%s3889_s30 + $0x30] sm:$0xff]  ;;  %v1224_v44 = vld [vmem:[%s3889_s30 + $0x38] sm:$0xff] }
 0x237   : > { %v1598_v47 = vmul.f32 %v1500_v31, %v3951_v37  ;;  %v1366_v15 = vmul.f32 %v1260_v35, %v1206_v56  ;;  %v1574_v37 = vmul.f32 %v1190_v30, %v3806_v46 }
 0x238   : > { %v1637_v34 = vadd.f32 %v1621_v45, %v1605_v17 }
 0x239   : > { %v4046_v29 = vadd.f32 %v1598_v47, %v1582_v2  ;;  %v1382_v52 = vadd.f32 %v1366_v15, %v1350_v24  ;;  %v1584_v47 = vmul.f32 %v4009_v60, %v3854_v16 }
 0x23b   : > { %v1414_v8 = vadd.f32 %v1398_v54, %v1382_v52 }
 0x23d   : > { %v2208_v11 = vpack.c.bf16 %v1414_v8, %v1413_v10  ;;  %v1484_v32 = vpop.permute.xlu1 %1483 }
 0x23e   : > { %v1262_v14 = vpop.permute.xlu2 %1261  ;;  %v1532_v33 = vpop.permute.xlu0 %1531  ;;  %v1590_v55 = vmul.f32 %v1484_v32, %v1206_v56  ;;  %v1207_v56 = vld [vmem:[%s3875_s29 + $0x30] sm:$0xff] }
 0x23f   : > { %2316 = vst [vmem:[%s3912_s26 + $0x10] sm:$0xff] %v2208_v11   ;;  %v1622_v40 = vmul.f32 %v1532_v33, %v1222_v63  ;;  %v1192_v63 = vld [vmem:[%s3280_s7 + $0x38] sm:$0xff]  ;;  %v1367_v31 = vmul.f32 %v1262_v14, %v1207_v56  ;;  %v1575_v14 = vmul.f32 %v1191_v1, %v3816_v4 }
 0x240   : > { %v1606_v50 = vadd.f32 %v1590_v55, %v1574_v37  ;;  %v1352_v28 = vmul.f32 %v1192_v63, %v3836_v20  ;;  %v1576_v27 = vmul.f32 %v1192_v63, %v3866_v26 }
 0x241   : > { %v1383_v52 = vadd.f32 %v1367_v31, %v1351_v53 }
 0x242   : > { %v1638_v58 = vadd.f32 %v1622_v40, %v1606_v50 }
 0x244   : > { %v2248_v48 = vpack.c.bf16 %v1638_v58, %v1637_v34  ;;  %v1209_v34 = vld [vmem:[%s3875_s29 + $0x40] sm:$0xff]  ;;  %v1210_v58 = vld [vmem:[%s3875_s29 + $0x48] sm:$0xff] }
 0x245   : > { %v1310_v5 = vpop.permute.xlu1 %1309 }
 0x246   : > { %v1534_v57 = vpop.permute.xlu2 %1533  ;;  %v1486_v13 = vpop.permute.xlu0 %1485  ;;  %2323 = vst [vmem:[%s3956_s9 + $0x10] sm:$0xff] %v2248_v48   ;;  %v1193_v48 = vld [vmem:[%s3280_s7 + $0x40] sm:$0xff] }
 0x247   : > { %v1591_v10 = vmul.f32 %v1486_v13, %v1207_v56  ;;  %v1623_v19 = vmul.f32 %v1534_v57, %v1223_v9 }
 0x24d   : > { %v1502_v46 = vpop.permute.xlu1 %1501 }
 0x24e   : > { %v1488_v42 = vpop.permute.xlu2 %1487  ;;  %v1312_v38 = vpop.permute.xlu0 %1311  ;;  %v1599_v7 = vmul.f32 %v1502_v46, %v3997_v21  ;;  %v1399_v21 = vmul.f32 %v1310_v5, %v1223_v9  ;;  %v1353_v46 = vmul.f32 %v1193_v48, %v3863_v41  ;;  %v1226_v9 = vld [vmem:[%s3889_s30 + $0x48] sm:$0xff] }
 0x24f   : > { %v1400_v8 = vmul.f32 %v1312_v38, %v1224_v44  ;;  %v1592_v16 = vmul.f32 %v1488_v42, %v1208_v49  ;;  %v1194_v42 = vld [vmem:[%s3280_s7 + $0x48] sm:$0xff] }
 0x250   : > { %v4056_v30 = vadd.f32 %v1599_v7, %v1583_v18  ;;  %v1415_v43 = vadd.f32 %v1399_v21, %v1383_v52  ;;  %v1225_v18 = vld [vmem:[%s3889_s30 + $0x40] sm:$0xff]  ;;  %v1577_v7 = vmul.f32 %v1193_v48, %v3880_v3  ;;  %v1354_v56 = vmul.f32 %v1194_v42, %v3903_v51 }
 0x251   : > { %v1608_v45 = vadd.f32 %v1592_v16, %v1576_v27  ;;  %v1196_v16 = vld [vmem:[%s3280_s7 + $0x58] sm:$0xff] }
 0x252   : > { %v1228_v27 = vld [vmem:[%s3889_s30 + $0x58] sm:$0xff] }
 0x255   : > { %v1264_v2 = vpop.permute.xlu1 %1263 }
 0x256   : > { %v1314_v24 = vpop.permute.xlu2 %1313  ;;  %v1504_v35 = vpop.permute.xlu0 %1503  ;;  %v1368_v39 = vmul.f32 %v1264_v2, %v1208_v49  ;;  %v1578_v49 = vmul.f32 %v1194_v42, %v3900_v36 }
 0x257   : > { %v1600_v15 = vmul.f32 %v1504_v35, %v4002_v59  ;;  %v1607_v59 = vadd.f32 %v1591_v10, %v1575_v14  ;;  %v1401_v2 = vmul.f32 %v1314_v24, %v1225_v18 }
 0x258   : > { %v1384_v11 = vadd.f32 %v1368_v39, %v1352_v28 }
 0x259   : > { %v4069_v54 = vadd.f32 %v1600_v15, %v1584_v47  ;;  %v1639_v4 = vadd.f32 %v1623_v19, %v1607_v59 }
 0x25a   : > { %v1416_v60 = vadd.f32 %v1400_v8, %v1384_v11  ;;  %v1195_v11 = vld [vmem:[%s3280_s7 + $0x50] sm:$0xff]  ;;  %s2786_s7 = sshra.s32 %s1741_s14, 4  ;;  %s2787_s7 = int_to_ptr.hbm [resolvable:$true] %s2786_s7 }
 0x25b   : > { %v1355_v59 = vmul.f32 %v1195_v11, %v3918_v25  ;;  %v1579_v48 = vmul.f32 %v1195_v11, %v3936_v22  ;;  %s2788_s25 = scalar_lea.hbm %s2787_s7, 64  ;;  %p2793_p2 = scmp.lt.s32.totalorder %s2787_s7, %s4311_s8 }
 0x25c   : > { %v2213_v20 = vpack.c.bf16 %v1416_v60, %v1415_v43  ;;  %v1211_v43 = vld [vmem:[%s3875_s29 + $0x50] sm:$0xff]  ;;  %v1212_v60 = vld [vmem:[%s3875_s29 + $0x58] sm:$0xff]  ;;  %p2789_p11 = scmp.ne.s32.totalorder %s2787_s7, %s2788_s25  ;;  %s2792_s29 = scalar_lea.hbm %s4311_s8, 256 }
 0x25d   : > { %v1536_v32 = vpop.permute.xlu1 %1535  ;;  %p2794_p3 = scmp.lt.s32.totalorder %s2792_s29, %s2788_s25 }
 0x25e   : > { %v1266_v33 = vpop.permute.xlu0 %1265  ;;  %2317 = vst [vmem:[%s3912_s26 + $0x18] sm:$0xff] %v2213_v20   ;;  %v1624_v37 = vmul.f32 %v1536_v32, %v1224_v44  ;;  %v1268_v55 = vpop.permute.xlu2 %1267  ;;  %p2790_p13 = pnand %p2789_p11, %p3194_p6 }
 0x25f   : > { %v1369_v13 = vmul.f32 %v1266_v33, %v1209_v34  ;;  %v1370_v38 = vmul.f32 %v1268_v55, %v1210_v58  ;;  %v1227_v33 = vld [vmem:[%s3889_s30 + $0x50] sm:$0xff]  ;;  %p2795_p4 = por %p2794_p3, %p2793_p2 }
 0x260   : > { %v1640_v17 = vadd.f32 %v1624_v37, %v1608_v45  ;;  %v1356_v37 = vmul.f32 %v1196_v16, %v3930_v61  ;;  %p2791_p0 = pneg %p2790_p13 }
 0x261   : > { %v1385_v1 = vadd.f32 %v1369_v13, %v1353_v46  ;;  %v1386_v47 = vadd.f32 %v1370_v38, %v1354_v56 }
 0x262   : > { %v2253_v50 = vpack.c.bf16 %v1640_v17, %v1639_v4  ;;  %p2796_p5 = pnand %p2795_p4, %p2791_p0 }
 0x263   : > { %v1417_v51 = vadd.f32 %v1401_v2, %v1385_v1 }
 0x264   : > { %2324 = vst [vmem:[%s3956_s9 + $0x18] sm:$0xff] %v2253_v50  }
 0x265   : > { %v1490_v26 = vpop.permute.xlu1 %1489 }
 0x266   : > { %v1538_v40 = vpop.permute.xlu0 %1537  ;;  %v1540_v5 = vpop.permute.xlu2 %1539  ;;  %v1593_v57 = vmul.f32 %v1490_v26, %v1209_v34 }
 0x267   : > { %v1626_v15 = vmul.f32 %v1540_v5, %v1226_v9  ;;  %v1625_v53 = vmul.f32 %v1538_v40, %v1225_v18  ;;  %v1580_v5 = vmul.f32 %v1196_v16, %v3969_v12 }
 0x268   : > { %v1609_v31 = vadd.f32 %v1593_v57, %v1577_v7 }
 0x26a   : > { %v1641_v28 = vadd.f32 %v1625_v53, %v1609_v31 }
 0x26d   : > { %v1316_v35 = vpop.permute.xlu1 %1315 }
 0x26e   : > { %v1492_v63 = vpop.permute.xlu0 %1491  ;;  %v1402_v41 = vmul.f32 %v1316_v35, %v1226_v9  ;;  %v1494_v36 = vpop.permute.xlu2 %1493 }
 0x26f   : > { %v1594_v44 = vmul.f32 %v1492_v63, %v1210_v58  ;;  %v1595_v61 = vmul.f32 %v1494_v36, %v1211_v43 }
 0x270   : > { %v1418_v21 = vadd.f32 %v1402_v41, %v1386_v47 }
 0x271   : > { %v1610_v3 = vadd.f32 %v1594_v44, %v1578_v49 }
 0x272   : > { %v2218_v52 = vpack.c.bf16 %v1418_v21, %v1417_v51 }
 0x273   : > { %v1642_v39 = vadd.f32 %v1626_v15, %v1610_v3 }
 0x274   : > { %2318 = vst [vmem:[%s3912_s26 + $0x20] sm:$0xff] %v2218_v52  }
 0x275   : > { %v2258_v10 = vpack.c.bf16 %v1642_v39, %v1641_v28  ;;  %v1270_v8 = vpop.permute.xlu1 %1269 }
 0x276   : > { %v1318_v24 = vpop.permute.xlu0 %1317  ;;  %v1371_v14 = vmul.f32 %v1270_v8, %v1211_v43  ;;  %v1320_v20 = vpop.permute.xlu2 %1319 }
 0x277   : > { %2325 = vst [vmem:[%s3956_s9 + $0x20] sm:$0xff] %v2258_v10   ;;  %v1404_v4 = vmul.f32 %v1320_v20, %v1228_v27  ;;  %v1403_v17 = vmul.f32 %v1318_v24, %v1227_v33 }
 0x278   : > { %v1387_v19 = vadd.f32 %v1371_v14, %v1355_v59 }
 0x27a   : > { %v1419_v25 = vadd.f32 %v1403_v17, %v1387_v19 }
 0x27d   : > { %v1542_v45 = vpop.permute.xlu1 %1541 }
 0x27e   : > { %v1272_v32 = vpop.permute.xlu0 %1271  ;;  %v1627_v13 = vmul.f32 %v1542_v45, %v1227_v33 }
 0x27f   : > { %v1372_v55 = vmul.f32 %v1272_v32, %v1212_v60 }
 0x281   : > { %v1388_v50 = vadd.f32 %v1372_v55, %v1356_v37 }
 0x283   : > { %v1420_v40 = vadd.f32 %v1404_v4, %v1388_v50 }
 0x285   : > { %v2223_v34 = vpack.c.bf16 %v1420_v40, %v1419_v25  ;;  %v1496_v58 = vpop.permute.xlu1 %1495 }
 0x286   : > { %v1544_v26 = vpop.permute.xlu0 %1543  ;;  %v1596_v42 = vmul.f32 %v1496_v58, %v1212_v60 }
 0x287   : > { %2319 = vst [vmem:[%s3912_s26 + $0x28] sm:$0xff] %v2223_v34  }
 0x288   : > { %2799 = shalt.err (!%p2796_p5)
}
 0x289   : > { %s2978_s5 = smov 64   ;;  %s2979_s1 = smov 4   ;;  %v1611_v22 = vadd.f32 %v1595_v61, %v1579_v48  ;;  %v1552_v12 = vpop.permute.xlu2 %1551  ;;  %v1612_v57 = vadd.f32 %v1596_v42, %v1580_v5  ;;  %v1628_v38 = vmul.f32 %v1544_v26, %v1228_v27 }
 0x28a   : > { %2380 = dma.vmem_to_hbm [thread:$0]  (%p3194_p6), %s4106_s12, 1024, %s1741_s14, %s1714_s21, %s2978_s5, %s2978_s5, %s2979_s1   ;;  %v1632_v7 = vmul.f32 %v1552_v12, %v4020_v23 }
 0x28b   : > { %v1643_v46 = vadd.f32 %v1627_v13, %v1611_v22  ;;  %v1644_v18 = vadd.f32 %v1628_v38, %v1612_v57  ;;  %s4312_s17 = sld [smem:[#allocation42_spill]]  ;;  %s1757_s14 = sshll.u32 %s3956_s9, 4  ;;  %s1758_s14 = int_to_ptr.vmem [resolvable:$true] %s1757_s14 }
 0x28c   : > { %s4314_s11 = sld [smem:[#allocation43_spill]]  ;;  %v1648_v23 = vadd.f32 %v1632_v7, %v4069_v54  ;;  %s1776_s25 = sshll.u32 %s3707_s15, 4  ;;  %s4150_s25 = int_to_ptr.vmem [resolvable:$true] %s1776_s25 }
 0x28d   : > { %v2263_v56 = vpack.c.bf16 %v1644_v18, %v1643_v46  ;;  %v1548_v9 = vpop.permute.xlu1 %1547 }
 0x28e   : > { %v1550_v1 = vpop.permute.xlu0 %1549  ;;  %v1630_v31 = vmul.f32 %v1548_v9, %v3960_v0 }
 0x28f   : > { %v1631_v63 = vmul.f32 %v1550_v1, %v4017_v62  ;;  %2326 = vst [vmem:[%s3956_s9 + $0x28] sm:$0xff] %v2263_v56  }
 0x290   : > { %v1646_v62 = vadd.f32 %v1630_v31, %v4046_v29 }
 0x291   : > { %s4313_s23 = smov %s4312_s17  ;;  %s1756_s4 = scalar_lea.hbm %s4312_s17, %s4093_s0  ;;  %v1647_v35 = vadd.f32 %v1631_v63, %v4056_v30 }
 0x292   : > { %s4315_s21 = smov %s4314_s11  ;;  %s1775_s12 = scalar_lea.hbm %s4314_s11, %s4093_s0  ;;  %v2268_v44 = vpack.c.bf16 %v1646_v62, %v4035_v6 }
 0x293   : > { %s4142_s7 = sshll.u32 %s1756_s4, 4  ;;  %s4146_s22 = sshll.u32 %s1775_s12, 4  ;;  %v2273_v49 = vpack.c.bf16 %v1648_v23, %v1647_v35  ;;  %s1760_s7 = int_to_ptr.hbm [resolvable:$true] %s4142_s7  ;;  %s1779_s22 = int_to_ptr.hbm [resolvable:$true] %s4146_s22 }
 0x294   : > { %2327 = vst [vmem:[%s3956_s9 + $0x30] sm:$0xff] %v2268_v44   ;;  %s4157_s0 = scalar_lea.sflag [#allocation15], %s446_s2  ;;  %s2814_s15 = sshra.s32 %s1760_s7, 4  ;;  %s2815_s15 = int_to_ptr.hbm [resolvable:$true] %s2814_s15 }
 0x295   : > { %2328 = vst [vmem:[%s3956_s9 + $0x38] sm:$0xff] %v2273_v49   ;;  %s2816_s24 = scalar_lea.hbm %s2815_s15, 64  ;;  %s2820_s26 = scalar_lea.hbm %s4313_s23, 256 }
 0x296   : > { %p2817_p8 = scmp.ne.s32.totalorder %s2815_s15, %s2816_s24  ;;  %p2821_p1 = scmp.lt.s32.totalorder %s2815_s15, %s4313_s23 }
 0x297   : > { %p2822_p12 = scmp.lt.s32.totalorder %s2820_s26, %s2816_s24 }
 0x298   : > { %p2818_p9 = pnand %p2817_p8, %p3194_p6 }
 0x299   : > { %p2823_p11 = por %p2822_p12, %p2821_p1 }
 0x29a   : > { %p2819_p10 = pneg %p2818_p9 }
 0x29c   : > { %p2824_p13 = pnand %p2823_p11, %p2819_p10 }
 0x29e   : > { %2827 = shalt.err (!%p2824_p13)
}
 0x29f   : > { %2381 = dma.vmem_to_hbm [thread:$0]  (%p3194_p6), %s1758_s14, 1024, %s1760_s7, %s4157_s0, %s2978_s5, %s2978_s5, %s2979_s1  }
 0x2a0   : > { %s2842_s6 = sshra.s32 %s1779_s22, 4  ;;  %s2848_s4 = scalar_lea.hbm %s4315_s21, 256  ;;  %s2843_s6 = int_to_ptr.hbm [resolvable:$true] %s2842_s6 }
 0x2a1   : > { %s2844_s2 = scalar_lea.hbm %s2843_s6, 64  ;;  %p2849_p4 = scmp.lt.s32.totalorder %s2843_s6, %s4315_s21 }
 0x2a2   : > { %p2845_p0 = scmp.ne.s32.totalorder %s2843_s6, %s2844_s2  ;;  %p2850_p5 = scmp.lt.s32.totalorder %s2848_s4, %s2844_s2 }
 0x2a4   : > { %p2846_p2 = pnand %p2845_p0, %p3194_p6  ;;  %p2851_p8 = por %p2850_p5, %p2849_p4 }
 0x2a6   : > { %p2847_p3 = pneg %p2846_p2 }
 0x2a8   : > { %p2852_p9 = pnand %p2851_p8, %p2847_p3 }
 0x2aa   : > { %2855 = shalt.err (!%p2852_p9)
}
 0x2ab   : > { %2382 = dma.vmem_to_hbm [thread:$0]  (%p3194_p6), %s4150_s25, 1024, %s1779_s22, %s4157_s0, %s2978_s5, %s2978_s5, %s2979_s1  }
 0x2ac PF: > { %s4316_s11 = sld [smem:[#allocation24_spill]]  ;;  %p2426_p10 = scmp.ge.s32.totalorder %s2966_s19, 2 }
 0x2ae   : > { %p2410_p1 = pnand %p2426_p10, %p3198_p7 }
 0x2b0   : > { %p2411_p12 = pneg %p2410_p1 }
 0x2b2   : > { %s1793_s14 = sand.u32 1, %s4316_s11  }
 0x2b3   : > { %s1794_s7 = scalar_lea.sflag [#allocation4], %s1793_s14 }
 0x2b4   : > { %2917 = dma.done.wait (%p2411_p12), %s1794_s7, 1024  }
 0x2b5   : > { %2919 = vsyncadd (%p2411_p12), %s1794_s7, 4294966272  ;;  %s4318_s27 = sadd.s32 4294967294, %s2966_s19  }
 0x2b6   : > { %s1803_s15 = sand.u32 1, %s4318_s27  }
 0x2b7   : > { %s1804_s24 = scalar_lea.sflag [#allocation15], %s1803_s15 }
 0x2b8   : > { %2921 = dma.done.wait (%p2411_p12), %s1804_s24, 2048  }
 0x2b9   : > { %2923 = vsyncadd (%p2411_p12), %s1804_s24, 4294965248  ;;  %s31_s19 = sadd.s32 1, %s2966_s19   ;;  %s4319_s5 = sld [smem:[#allocation23_spill]] }
 0x2ba   : > { %p28_p6 = scmp.ge.s32.totalorder %s31_s19, 6   ;;  %s4320_s11 = sld [smem:[#allocation33_spill]] }
 0x2bb   : > { %s4321_s1 = sld [smem:[#allocation25_spill]]  ;;  %s4327_s30 = smov %s2930_s10 }
 0x2bc   : > { %s4322_s14 = sld [smem:[#allocation32_spill]]  ;;  %s4329_s12 = smov %s2942_s13 }
 0x2bd   : > { %s4323_s15 = sld [smem:[#allocation28_spill]]  ;;  %30 = sbr.rel (!%p28_p6) target bundleno = 23 (0x17), region = 170 }
 0x2be   : > { %s4324_s16 = sld [smem:[#allocation29_spill]] }
 0x2bf   : > { %s4325_s17 = sld [smem:[#allocation30_spill]]  ;;  %s4328_s10 = smov %s4319_s5 }
 0x2c0   : > { %s4326_s18 = sld [smem:[#allocation31_spill]] }
 0x2c1   : > { %s4330_s13 = smov %s4321_s1 }
 0x2c2   :  { %1820 = vsyncpa [#allocation3], 1 }
 0x2c3   :  { %1822 = vsyncpa [#allocation3 + $0x1], 1 }
 0x2c4   :  { %1823 = vsyncpa [#allocation6], 1 }
 0x2c5   :  { %1824 = vsyncpa [#allocation9], 1 }
 0x2c6   :  { %1825 = vsyncpa [#allocation4], 1 }
 0x2c7   :  { %1827 = vsyncpa [#allocation4 + $0x1], 1 }
 0x2c8   :  { %1828 = vsyncpa [#allocation15], 1 }
 0x2c9   :  { %1830 = vsyncpa [#allocation15 + $0x1], 1 }

</bundles_post_ra>
